<compile_context>
chip_gen: v5e
topology: v5e:2x2
jax: 0.10.0
libtpu: 0.0.40
codegen_flags: <defaults>
</compile_context>

<pallas_src>
import functools

import jax
import jax.numpy as jnp
from jax.experimental import pallas as pl
from jax.experimental.pallas import tpu as pltpu

NEG_SLOPE = 0.01  # torch.nn.LeakyReLU() default


def _mlp_kernel(n_layers, x_ref, *refs):
    """Fused MLP over one batch tile: n_layers x (Linear + LeakyReLU).

    refs = (w0, b0, w1, b1, ..., w_{L-1}, b_{L-1}, out_ref)
    wi: (in_i, out_i) bf16 in VMEM (resident across the batch grid),
    bi: (1, out_i)  f32 in VMEM.
    Matmul inputs are bf16, accumulation is f32 (MXU), LeakyReLU runs in f32.
    """
    out_ref = refs[-1]
    params = refs[:-1]
    h = x_ref[...]  # f32 (TB, in_0)
    for i in range(n_layers):
        w = params[2 * i][...]        # bf16 (in_i, out_i)
        b = params[2 * i + 1][...]    # f32  (1, out_i)
        h = jnp.dot(h.astype(jnp.bfloat16), w,
                    preferred_element_type=jnp.float32) + b
        h = jnp.where(h > 0, h, NEG_SLOPE * h)  # LeakyReLU on f32 result
    out_ref[...] = h


def q_layer_forward(x, weights, biases, n_joint, *, batch_tile=256):
    """x: (B, inputdim) f32. weights[i]: (in_i, out_i). biases[i]: (out_i,)."""
    n_layers = len(weights)
    batch, in0 = x.shape
    out_dim = weights[-1].shape[1]
    assert out_dim == 2 * n_joint

    # Pad final layer to a multiple of 128 lanes -> unmasked vst on the output.
    out_padded = ((out_dim + 127) // 128) * 128

    # Prepare params: bf16 weights (halves HBM weight traffic, the dominant
    # cost at small batch), f32 biases as (1, out) rows.
    w_list, b_list = [], []
    for li, (w, b) in enumerate(zip(weights, biases)):
        wq = w.astype(jnp.bfloat16)
        bq = b.reshape(1, -1).astype(jnp.float32)
        if li == n_layers - 1 and out_padded != out_dim:
            pad = out_padded - out_dim
            wq = jnp.pad(wq, ((0, 0), (0, pad)))
            bq = jnp.pad(bq, ((0, 0), (0, pad)))
        w_list.append(wq)
        b_list.append(bq)

    # 1-D grid over batch; weights stay resident (same block index every step).
    tb = batch if batch <= batch_tile else batch_tile
    grid = (pl.cdiv(batch, tb),)

    in_specs = [pl.BlockSpec((tb, in0), lambda i: (i, 0))]
    flat_params = []
    for w, b in zip(w_list, b_list):
        in_specs.append(pl.BlockSpec(w.shape, lambda i: (0, 0)))
        in_specs.append(pl.BlockSpec(b.shape, lambda i: (0, 0)))
        flat_params.append(w)
        flat_params.append(b)
    out_spec = pl.BlockSpec((tb, out_padded), lambda i: (i, 0))

    # VMEM budget: all params + double-buffered activation tiles + headroom.
    param_bytes = sum(int(p.size) * p.dtype.itemsize for p in flat_params)
    widest = max([in0] + [w.shape[1] for w in w_list])
    act_bytes = 4 * tb * widest * 4                      # in-flight f32 temps
    io_bytes = 2 * tb * (in0 + out_padded) * 4           # double-buffered x/out
    vmem_limit = int(min(max(param_bytes + act_bytes + io_bytes + (8 << 20),
                             16 << 20), 64 << 20))
    # TODO(synk): for inputdim >= ~32 on v7x (64 MiB VMEM) the largest layers no
    # longer fit resident; move them to memory_space=pl.ANY and stream K/N tiles
    # with pltpu.emit_pipeline / make_async_copy double-buffering.
    # TODO(synk): optional int8 weight path (per-channel scales) for v5e/v6e.

    flops = 2 * batch * sum(w.shape[0] * w.shape[1] for w in w_list)
    bytes_accessed = param_bytes + batch * (in0 + out_padded) * 4
    cost = pl.CostEstimate(flops=flops, transcendentals=0,
                           bytes_accessed=bytes_accessed)

    out = pl.pallas_call(
        functools.partial(_mlp_kernel, n_layers),
        out_shape=jax.ShapeDtypeStruct((batch, out_padded), jnp.float32),
        grid_spec=pltpu.PrefetchScalarGridSpec(
            num_scalar_prefetch=0,
            grid=grid,
            in_specs=in_specs,
            out_specs=out_spec,
        ),
        compiler_params=pltpu.CompilerParams(
            dimension_semantics=("parallel",),
            vmem_limit_bytes=vmem_limit,
        ),
        cost_estimate=cost,
    )(x.astype(jnp.float32), *flat_params)

    # Glue: drop lane padding, reshape like torch's out.reshape(-1, n_joint, 2).
    return out[:, :out_dim].reshape(-1, n_joint, 2)


def build_params(key, inputdim, n_joint, n_layers=7):
    """Deterministic Xavier-uniform weights + small uniform biases.

    Mirrors q_layer.__init__: n_layers doubling layers, (n_layers-3) halving
    layers, then a final layer to 2*n_joint.
    """
    dims = []
    d = inputdim
    for _ in range(n_layers):
        dims.append((d, 2 * d))
        d = 2 * d
    for _ in range(n_layers - 3):
        dims.append((d, d // 2))
        d = d // 2
    dims.append((d, 2 * n_joint))

    weights, biases = [], []
    for (fan_in, fan_out) in dims:
        key, kw, kb = jax.random.split(key, 3)
        bound_w = (6.0 / (fan_in + fan_out)) ** 0.5  # xavier_uniform_
        w = jax.random.uniform(kw, (fan_in, fan_out), jnp.float32,
                               minval=-bound_w, maxval=bound_w)
        bound_b = 1.0 / (fan_in ** 0.5)  # torch Linear default bias init
        b = jax.random.uniform(kb, (fan_out,), jnp.float32,
                               minval=-bound_b, maxval=bound_b)
        weights.append(w)
        biases.append(b)
    return weights, biases


if __name__ == "__main__":
    key = jax.random.PRNGKey(0)
    batch = 2
    inputdim = 8
    branchLs = [0, 1, 2, 3]        # n_joint = 4
    n_joint = len(branchLs)
    n_layers = 7

    key, kx, kp = jax.random.split(key, 3)
    x = jax.random.normal(kx, (batch, inputdim), jnp.float32)
    weights, biases = build_params(kp, inputdim, n_joint, n_layers)

    q_value = q_layer_forward(x, weights, biases, n_joint)
    q_value = jax.block_until_ready(q_value)
    assert q_value.shape == (batch, n_joint, 2)

    # Reference mirroring the kernel's numerics (bf16 weights/inputs to the
    # dot, f32 accumulation, f32 LeakyReLU) -> tight tolerance.
    h = x
    for w, b in zip(weights, biases):
        h = jnp.dot(h.astype(jnp.bfloat16), w.astype(jnp.bfloat16),
                    preferred_element_type=jnp.float32) + b
        h = jnp.where(h > 0, h, NEG_SLOPE * h)
    ref_bf16 = h.reshape(-1, n_joint, 2)
    assert jnp.allclose(q_value, ref_bf16, atol=2e-3, rtol=2e-3)

    # Loose sanity check against the full-f32 reference (bf16 weight rounding
    # accumulates over 12 layers, so only report the deviation).
    h32 = x
    for w, b in zip(weights, biases):
        h32 = h32 @ w + b
        h32 = jnp.where(h32 > 0, h32, NEG_SLOPE * h32)
    ref_f32 = h32.reshape(-1, n_joint, 2)
    max_dev = float(jnp.max(jnp.abs(q_value - ref_f32)))
    assert max_dev < 0.25, f"bf16 path deviates too much from f32: {max_dev}"

    print("KERNEL_OK")
</pallas_src>

<mosaic_0001>
module attributes {stable_mosaic.version = 11 : i64} {
  func.func @_mlp_kernel(%arg0: i32, %arg1: memref<2x8xf32, #tpu.memory_space<vmem>>, %arg2: memref<8x16xbf16, #tpu.memory_space<vmem>>, %arg3: memref<1x16xf32, #tpu.memory_space<vmem>>, %arg4: memref<16x32xbf16, #tpu.memory_space<vmem>>, %arg5: memref<1x32xf32, #tpu.memory_space<vmem>>, %arg6: memref<32x64xbf16, #tpu.memory_space<vmem>>, %arg7: memref<1x64xf32, #tpu.memory_space<vmem>>, %arg8: memref<64x128xbf16, #tpu.memory_space<vmem>>, %arg9: memref<1x128xf32, #tpu.memory_space<vmem>>, %arg10: memref<128x256xbf16, #tpu.memory_space<vmem>>, %arg11: memref<1x256xf32, #tpu.memory_space<vmem>>, %arg12: memref<256x512xbf16, #tpu.memory_space<vmem>>, %arg13: memref<1x512xf32, #tpu.memory_space<vmem>>, %arg14: memref<512x1024xbf16, #tpu.memory_space<vmem>>, %arg15: memref<1x1024xf32, #tpu.memory_space<vmem>>, %arg16: memref<1024x512xbf16, #tpu.memory_space<vmem>>, %arg17: memref<1x512xf32, #tpu.memory_space<vmem>>, %arg18: memref<512x256xbf16, #tpu.memory_space<vmem>>, %arg19: memref<1x256xf32, #tpu.memory_space<vmem>>, %arg20: memref<256x128xbf16, #tpu.memory_space<vmem>>, %arg21: memref<1x128xf32, #tpu.memory_space<vmem>>, %arg22: memref<128x64xbf16, #tpu.memory_space<vmem>>, %arg23: memref<1x64xf32, #tpu.memory_space<vmem>>, %arg24: memref<64x128xbf16, #tpu.memory_space<vmem>>, %arg25: memref<1x128xf32, #tpu.memory_space<vmem>>, %arg26: memref<2x128xf32, #tpu.memory_space<vmem>>) attributes {dimension_semantics = [#tpu.dimension_semantics<parallel>], iteration_bounds = array<i64: 1>, scalar_prefetch = 0 : i64, scratch_operands = 0 : i64, tpu.core_type = #tpu.core_type<tc>, window_params = [{transform_indices = @transform_0, window_bounds = array<i64: 2, 8>}, {pipeline_mode = #tpu.pipeline_mode<synchronous>, transform_indices = @transform_1, window_bounds = array<i64: 8, 16>}, {pipeline_mode = #tpu.pipeline_mode<synchronous>, transform_indices = @transform_2, window_bounds = array<i64: 1, 16>}, {pipeline_mode = #tpu.pipeline_mode<synchronous>, transform_indices = @transform_3, window_bounds = array<i64: 16, 32>}, {pipeline_mode = #tpu.pipeline_mode<synchronous>, transform_indices = @transform_4, window_bounds = array<i64: 1, 32>}, {pipeline_mode = #tpu.pipeline_mode<synchronous>, transform_indices = @transform_5, window_bounds = array<i64: 32, 64>}, {pipeline_mode = #tpu.pipeline_mode<synchronous>, transform_indices = @transform_6, window_bounds = array<i64: 1, 64>}, {pipeline_mode = #tpu.pipeline_mode<synchronous>, transform_indices = @transform_7, window_bounds = array<i64: 64, 128>}, {pipeline_mode = #tpu.pipeline_mode<synchronous>, transform_indices = @transform_8, window_bounds = array<i64: 1, 128>}, {pipeline_mode = #tpu.pipeline_mode<synchronous>, transform_indices = @transform_9, window_bounds = array<i64: 128, 256>}, {pipeline_mode = #tpu.pipeline_mode<synchronous>, transform_indices = @transform_10, window_bounds = array<i64: 1, 256>}, {pipeline_mode = #tpu.pipeline_mode<synchronous>, transform_indices = @transform_11, window_bounds = array<i64: 256, 512>}, {pipeline_mode = #tpu.pipeline_mode<synchronous>, transform_indices = @transform_12, window_bounds = array<i64: 1, 512>}, {pipeline_mode = #tpu.pipeline_mode<synchronous>, transform_indices = @transform_13, window_bounds = array<i64: 512, 1024>}, {pipeline_mode = #tpu.pipeline_mode<synchronous>, transform_indices = @transform_14, window_bounds = array<i64: 1, 1024>}, {pipeline_mode = #tpu.pipeline_mode<synchronous>, transform_indices = @transform_15, window_bounds = array<i64: 1024, 512>}, {pipeline_mode = #tpu.pipeline_mode<synchronous>, transform_indices = @transform_16, window_bounds = array<i64: 1, 512>}, {pipeline_mode = #tpu.pipeline_mode<synchronous>, transform_indices = @transform_17, window_bounds = array<i64: 512, 256>}, {pipeline_mode = #tpu.pipeline_mode<synchronous>, transform_indices = @transform_18, window_bounds = array<i64: 1, 256>}, {pipeline_mode = #tpu.pipeline_mode<synchronous>, transform_indices = @transform_19, window_bounds = array<i64: 256, 128>}, {pipeline_mode = #tpu.pipeline_mode<synchronous>, transform_indices = @transform_20, window_bounds = array<i64: 1, 128>}, {pipeline_mode = #tpu.pipeline_mode<synchronous>, transform_indices = @transform_21, window_bounds = array<i64: 128, 64>}, {pipeline_mode = #tpu.pipeline_mode<synchronous>, transform_indices = @transform_22, window_bounds = array<i64: 1, 64>}, {pipeline_mode = #tpu.pipeline_mode<synchronous>, transform_indices = @transform_23, window_bounds = array<i64: 64, 128>}, {pipeline_mode = #tpu.pipeline_mode<synchronous>, transform_indices = @transform_24, window_bounds = array<i64: 1, 128>}, {transform_indices = @transform_25, window_bounds = array<i64: 2, 128>}]} {
    %c0 = arith.constant 0 : index
    %c0_0 = arith.constant 0 : index
    %0 = vector.load %arg1[%c0, %c0_0] : memref<2x8xf32, #tpu.memory_space<vmem>>, vector<2x8xf32>
    %c0_1 = arith.constant 0 : index
    %c0_2 = arith.constant 0 : index
    %1 = vector.load %arg2[%c0_1, %c0_2] : memref<8x16xbf16, #tpu.memory_space<vmem>>, vector<8x16xbf16>
    %c0_3 = arith.constant 0 : index
    %c0_4 = arith.constant 0 : index
    %2 = vector.load %arg3[%c0_3, %c0_4] : memref<1x16xf32, #tpu.memory_space<vmem>>, vector<1x16xf32>
    %3 = arith.truncf %0 : vector<2x8xf32> to vector<2x8xbf16>
    %cst = arith.constant dense<0.000000e+00> : vector<2x16xf32>
    %4 = tpu.matmul %3, %1, %cst {dimension_numbers = #tpu.dot_dimension_numbers<[1], [0], [0], [1], [0, 0, 1, 1], [], []>} : vector<2x8xbf16>, vector<8x16xbf16>, vector<2x16xf32> -> vector<2x16xf32>
    %5 = vector.broadcast %2 : vector<1x16xf32> to vector<2x16xf32>
    %6 = arith.addf %4, %5 : vector<2x16xf32>
    %cst_5 = arith.constant 0.000000e+00 : f32
    %7 = vector.broadcast %cst_5 : f32 to vector<2x16xf32>
    %8 = arith.cmpf ogt, %6, %7 : vector<2x16xf32>
    %cst_6 = arith.constant 0.00999999977 : f32
    %9 = vector.broadcast %cst_6 : f32 to vector<2x16xf32>
    %10 = arith.mulf %9, %6 : vector<2x16xf32>
    %11 = arith.select %8, %6, %10 : vector<2x16xi1>, vector<2x16xf32>
    %c0_7 = arith.constant 0 : index
    %c0_8 = arith.constant 0 : index
    %12 = vector.load %arg4[%c0_7, %c0_8] : memref<16x32xbf16, #tpu.memory_space<vmem>>, vector<16x32xbf16>
    %c0_9 = arith.constant 0 : index
    %c0_10 = arith.constant 0 : index
    %13 = vector.load %arg5[%c0_9, %c0_10] : memref<1x32xf32, #tpu.memory_space<vmem>>, vector<1x32xf32>
    %14 = arith.truncf %11 : vector<2x16xf32> to vector<2x16xbf16>
    %cst_11 = arith.constant dense<0.000000e+00> : vector<2x32xf32>
    %15 = tpu.matmul %14, %12, %cst_11 {dimension_numbers = #tpu.dot_dimension_numbers<[1], [0], [0], [1], [0, 0, 1, 1], [], []>} : vector<2x16xbf16>, vector<16x32xbf16>, vector<2x32xf32> -> vector<2x32xf32>
    %16 = vector.broadcast %13 : vector<1x32xf32> to vector<2x32xf32>
    %17 = arith.addf %15, %16 : vector<2x32xf32>
    %cst_12 = arith.constant 0.000000e+00 : f32
    %18 = vector.broadcast %cst_12 : f32 to vector<2x32xf32>
    %19 = arith.cmpf ogt, %17, %18 : vector<2x32xf32>
    %cst_13 = arith.constant 0.00999999977 : f32
    %20 = vector.broadcast %cst_13 : f32 to vector<2x32xf32>
    %21 = arith.mulf %20, %17 : vector<2x32xf32>
    %22 = arith.select %19, %17, %21 : vector<2x32xi1>, vector<2x32xf32>
    %c0_14 = arith.constant 0 : index
    %c0_15 = arith.constant 0 : index
    %23 = vector.load %arg6[%c0_14, %c0_15] : memref<32x64xbf16, #tpu.memory_space<vmem>>, vector<32x64xbf16>
    %c0_16 = arith.constant 0 : index
    %c0_17 = arith.constant 0 : index
    %24 = vector.load %arg7[%c0_16, %c0_17] : memref<1x64xf32, #tpu.memory_space<vmem>>, vector<1x64xf32>
    %25 = arith.truncf %22 : vector<2x32xf32> to vector<2x32xbf16>
    %cst_18 = arith.constant dense<0.000000e+00> : vector<2x64xf32>
    %26 = tpu.matmul %25, %23, %cst_18 {dimension_numbers = #tpu.dot_dimension_numbers<[1], [0], [0], [1], [0, 0, 1, 1], [], []>} : vector<2x32xbf16>, vector<32x64xbf16>, vector<2x64xf32> -> vector<2x64xf32>
    %27 = vector.broadcast %24 : vector<1x64xf32> to vector<2x64xf32>
    %28 = arith.addf %26, %27 : vector<2x64xf32>
    %cst_19 = arith.constant 0.000000e+00 : f32
    %29 = vector.broadcast %cst_19 : f32 to vector<2x64xf32>
    %30 = arith.cmpf ogt, %28, %29 : vector<2x64xf32>
    %cst_20 = arith.constant 0.00999999977 : f32
    %31 = vector.broadcast %cst_20 : f32 to vector<2x64xf32>
    %32 = arith.mulf %31, %28 : vector<2x64xf32>
    %33 = arith.select %30, %28, %32 : vector<2x64xi1>, vector<2x64xf32>
    %c0_21 = arith.constant 0 : index
    %c0_22 = arith.constant 0 : index
    %34 = vector.load %arg8[%c0_21, %c0_22] : memref<64x128xbf16, #tpu.memory_space<vmem>>, vector<64x128xbf16>
    %c0_23 = arith.constant 0 : index
    %c0_24 = arith.constant 0 : index
    %35 = vector.load %arg9[%c0_23, %c0_24] : memref<1x128xf32, #tpu.memory_space<vmem>>, vector<1x128xf32>
    %36 = arith.truncf %33 : vector<2x64xf32> to vector<2x64xbf16>
    %cst_25 = arith.constant dense<0.000000e+00> : vector<2x128xf32>
    %37 = tpu.matmul %36, %34, %cst_25 {dimension_numbers = #tpu.dot_dimension_numbers<[1], [0], [0], [1], [0, 0, 1, 1], [], []>} : vector<2x64xbf16>, vector<64x128xbf16>, vector<2x128xf32> -> vector<2x128xf32>
    %38 = vector.broadcast %35 : vector<1x128xf32> to vector<2x128xf32>
    %39 = arith.addf %37, %38 : vector<2x128xf32>
    %cst_26 = arith.constant 0.000000e+00 : f32
    %40 = vector.broadcast %cst_26 : f32 to vector<2x128xf32>
    %41 = arith.cmpf ogt, %39, %40 : vector<2x128xf32>
    %cst_27 = arith.constant 0.00999999977 : f32
    %42 = vector.broadcast %cst_27 : f32 to vector<2x128xf32>
    %43 = arith.mulf %42, %39 : vector<2x128xf32>
    %44 = arith.select %41, %39, %43 : vector<2x128xi1>, vector<2x128xf32>
    %c0_28 = arith.constant 0 : index
    %c0_29 = arith.constant 0 : index
    %45 = vector.load %arg10[%c0_28, %c0_29] : memref<128x256xbf16, #tpu.memory_space<vmem>>, vector<128x256xbf16>
    %c0_30 = arith.constant 0 : index
    %c0_31 = arith.constant 0 : index
    %46 = vector.load %arg11[%c0_30, %c0_31] : memref<1x256xf32, #tpu.memory_space<vmem>>, vector<1x256xf32>
    %47 = arith.truncf %44 : vector<2x128xf32> to vector<2x128xbf16>
    %cst_32 = arith.constant dense<0.000000e+00> : vector<2x256xf32>
    %48 = tpu.matmul %47, %45, %cst_32 {dimension_numbers = #tpu.dot_dimension_numbers<[1], [0], [0], [1], [0, 0, 1, 1], [], []>} : vector<2x128xbf16>, vector<128x256xbf16>, vector<2x256xf32> -> vector<2x256xf32>
    %49 = vector.broadcast %46 : vector<1x256xf32> to vector<2x256xf32>
    %50 = arith.addf %48, %49 : vector<2x256xf32>
    %cst_33 = arith.constant 0.000000e+00 : f32
    %51 = vector.broadcast %cst_33 : f32 to vector<2x256xf32>
    %52 = arith.cmpf ogt, %50, %51 : vector<2x256xf32>
    %cst_34 = arith.constant 0.00999999977 : f32
    %53 = vector.broadcast %cst_34 : f32 to vector<2x256xf32>
    %54 = arith.mulf %53, %50 : vector<2x256xf32>
    %55 = arith.select %52, %50, %54 : vector<2x256xi1>, vector<2x256xf32>
    %c0_35 = arith.constant 0 : index
    %c0_36 = arith.constant 0 : index
    %56 = vector.load %arg12[%c0_35, %c0_36] : memref<256x512xbf16, #tpu.memory_space<vmem>>, vector<256x512xbf16>
    %c0_37 = arith.constant 0 : index
    %c0_38 = arith.constant 0 : index
    %57 = vector.load %arg13[%c0_37, %c0_38] : memref<1x512xf32, #tpu.memory_space<vmem>>, vector<1x512xf32>
    %58 = arith.truncf %55 : vector<2x256xf32> to vector<2x256xbf16>
    %cst_39 = arith.constant dense<0.000000e+00> : vector<2x512xf32>
    %59 = tpu.matmul %58, %56, %cst_39 {dimension_numbers = #tpu.dot_dimension_numbers<[1], [0], [0], [1], [0, 0, 1, 1], [], []>} : vector<2x256xbf16>, vector<256x512xbf16>, vector<2x512xf32> -> vector<2x512xf32>
    %60 = vector.broadcast %57 : vector<1x512xf32> to vector<2x512xf32>
    %61 = arith.addf %59, %60 : vector<2x512xf32>
    %cst_40 = arith.constant 0.000000e+00 : f32
    %62 = vector.broadcast %cst_40 : f32 to vector<2x512xf32>
    %63 = arith.cmpf ogt, %61, %62 : vector<2x512xf32>
    %cst_41 = arith.constant 0.00999999977 : f32
    %64 = vector.broadcast %cst_41 : f32 to vector<2x512xf32>
    %65 = arith.mulf %64, %61 : vector<2x512xf32>
    %66 = arith.select %63, %61, %65 : vector<2x512xi1>, vector<2x512xf32>
    %c0_42 = arith.constant 0 : index
    %c0_43 = arith.constant 0 : index
    %67 = vector.load %arg14[%c0_42, %c0_43] : memref<512x1024xbf16, #tpu.memory_space<vmem>>, vector<512x1024xbf16>
    %c0_44 = arith.constant 0 : index
    %c0_45 = arith.constant 0 : index
    %68 = vector.load %arg15[%c0_44, %c0_45] : memref<1x1024xf32, #tpu.memory_space<vmem>>, vector<1x1024xf32>
    %69 = arith.truncf %66 : vector<2x512xf32> to vector<2x512xbf16>
    %cst_46 = arith.constant dense<0.000000e+00> : vector<2x1024xf32>
    %70 = tpu.matmul %69, %67, %cst_46 {dimension_numbers = #tpu.dot_dimension_numbers<[1], [0], [0], [1], [0, 0, 1, 1], [], []>} : vector<2x512xbf16>, vector<512x1024xbf16>, vector<2x1024xf32> -> vector<2x1024xf32>
    %71 = vector.broadcast %68 : vector<1x1024xf32> to vector<2x1024xf32>
    %72 = arith.addf %70, %71 : vector<2x1024xf32>
    %cst_47 = arith.constant 0.000000e+00 : f32
    %73 = vector.broadcast %cst_47 : f32 to vector<2x1024xf32>
    %74 = arith.cmpf ogt, %72, %73 : vector<2x1024xf32>
    %cst_48 = arith.constant 0.00999999977 : f32
    %75 = vector.broadcast %cst_48 : f32 to vector<2x1024xf32>
    %76 = arith.mulf %75, %72 : vector<2x1024xf32>
    %77 = arith.select %74, %72, %76 : vector<2x1024xi1>, vector<2x1024xf32>
    %c0_49 = arith.constant 0 : index
    %c0_50 = arith.constant 0 : index
    %78 = vector.load %arg16[%c0_49, %c0_50] : memref<1024x512xbf16, #tpu.memory_space<vmem>>, vector<1024x512xbf16>
    %c0_51 = arith.constant 0 : index
    %c0_52 = arith.constant 0 : index
    %79 = vector.load %arg17[%c0_51, %c0_52] : memref<1x512xf32, #tpu.memory_space<vmem>>, vector<1x512xf32>
    %80 = arith.truncf %77 : vector<2x1024xf32> to vector<2x1024xbf16>
    %cst_53 = arith.constant dense<0.000000e+00> : vector<2x512xf32>
    %81 = tpu.matmul %80, %78, %cst_53 {dimension_numbers = #tpu.dot_dimension_numbers<[1], [0], [0], [1], [0, 0, 1, 1], [], []>} : vector<2x1024xbf16>, vector<1024x512xbf16>, vector<2x512xf32> -> vector<2x512xf32>
    %82 = vector.broadcast %79 : vector<1x512xf32> to vector<2x512xf32>
    %83 = arith.addf %81, %82 : vector<2x512xf32>
    %cst_54 = arith.constant 0.000000e+00 : f32
    %84 = vector.broadcast %cst_54 : f32 to vector<2x512xf32>
    %85 = arith.cmpf ogt, %83, %84 : vector<2x512xf32>
    %cst_55 = arith.constant 0.00999999977 : f32
    %86 = vector.broadcast %cst_55 : f32 to vector<2x512xf32>
    %87 = arith.mulf %86, %83 : vector<2x512xf32>
    %88 = arith.select %85, %83, %87 : vector<2x512xi1>, vector<2x512xf32>
    %c0_56 = arith.constant 0 : index
    %c0_57 = arith.constant 0 : index
    %89 = vector.load %arg18[%c0_56, %c0_57] : memref<512x256xbf16, #tpu.memory_space<vmem>>, vector<512x256xbf16>
    %c0_58 = arith.constant 0 : index
    %c0_59 = arith.constant 0 : index
    %90 = vector.load %arg19[%c0_58, %c0_59] : memref<1x256xf32, #tpu.memory_space<vmem>>, vector<1x256xf32>
    %91 = arith.truncf %88 : vector<2x512xf32> to vector<2x512xbf16>
    %cst_60 = arith.constant dense<0.000000e+00> : vector<2x256xf32>
    %92 = tpu.matmul %91, %89, %cst_60 {dimension_numbers = #tpu.dot_dimension_numbers<[1], [0], [0], [1], [0, 0, 1, 1], [], []>} : vector<2x512xbf16>, vector<512x256xbf16>, vector<2x256xf32> -> vector<2x256xf32>
    %93 = vector.broadcast %90 : vector<1x256xf32> to vector<2x256xf32>
    %94 = arith.addf %92, %93 : vector<2x256xf32>
    %cst_61 = arith.constant 0.000000e+00 : f32
    %95 = vector.broadcast %cst_61 : f32 to vector<2x256xf32>
    %96 = arith.cmpf ogt, %94, %95 : vector<2x256xf32>
    %cst_62 = arith.constant 0.00999999977 : f32
    %97 = vector.broadcast %cst_62 : f32 to vector<2x256xf32>
    %98 = arith.mulf %97, %94 : vector<2x256xf32>
    %99 = arith.select %96, %94, %98 : vector<2x256xi1>, vector<2x256xf32>
    %c0_63 = arith.constant 0 : index
    %c0_64 = arith.constant 0 : index
    %100 = vector.load %arg20[%c0_63, %c0_64] : memref<256x128xbf16, #tpu.memory_space<vmem>>, vector<256x128xbf16>
    %c0_65 = arith.constant 0 : index
    %c0_66 = arith.constant 0 : index
    %101 = vector.load %arg21[%c0_65, %c0_66] : memref<1x128xf32, #tpu.memory_space<vmem>>, vector<1x128xf32>
    %102 = arith.truncf %99 : vector<2x256xf32> to vector<2x256xbf16>
    %cst_67 = arith.constant dense<0.000000e+00> : vector<2x128xf32>
    %103 = tpu.matmul %102, %100, %cst_67 {dimension_numbers = #tpu.dot_dimension_numbers<[1], [0], [0], [1], [0, 0, 1, 1], [], []>} : vector<2x256xbf16>, vector<256x128xbf16>, vector<2x128xf32> -> vector<2x128xf32>
    %104 = vector.broadcast %101 : vector<1x128xf32> to vector<2x128xf32>
    %105 = arith.addf %103, %104 : vector<2x128xf32>
    %cst_68 = arith.constant 0.000000e+00 : f32
    %106 = vector.broadcast %cst_68 : f32 to vector<2x128xf32>
    %107 = arith.cmpf ogt, %105, %106 : vector<2x128xf32>
    %cst_69 = arith.constant 0.00999999977 : f32
    %108 = vector.broadcast %cst_69 : f32 to vector<2x128xf32>
    %109 = arith.mulf %108, %105 : vector<2x128xf32>
    %110 = arith.select %107, %105, %109 : vector<2x128xi1>, vector<2x128xf32>
    %c0_70 = arith.constant 0 : index
    %c0_71 = arith.constant 0 : index
    %111 = vector.load %arg22[%c0_70, %c0_71] : memref<128x64xbf16, #tpu.memory_space<vmem>>, vector<128x64xbf16>
    %c0_72 = arith.constant 0 : index
    %c0_73 = arith.constant 0 : index
    %112 = vector.load %arg23[%c0_72, %c0_73] : memref<1x64xf32, #tpu.memory_space<vmem>>, vector<1x64xf32>
    %113 = arith.truncf %110 : vector<2x128xf32> to vector<2x128xbf16>
    %cst_74 = arith.constant dense<0.000000e+00> : vector<2x64xf32>
    %114 = tpu.matmul %113, %111, %cst_74 {dimension_numbers = #tpu.dot_dimension_numbers<[1], [0], [0], [1], [0, 0, 1, 1], [], []>} : vector<2x128xbf16>, vector<128x64xbf16>, vector<2x64xf32> -> vector<2x64xf32>
    %115 = vector.broadcast %112 : vector<1x64xf32> to vector<2x64xf32>
    %116 = arith.addf %114, %115 : vector<2x64xf32>
    %cst_75 = arith.constant 0.000000e+00 : f32
    %117 = vector.broadcast %cst_75 : f32 to vector<2x64xf32>
    %118 = arith.cmpf ogt, %116, %117 : vector<2x64xf32>
    %cst_76 = arith.constant 0.00999999977 : f32
    %119 = vector.broadcast %cst_76 : f32 to vector<2x64xf32>
    %120 = arith.mulf %119, %116 : vector<2x64xf32>
    %121 = arith.select %118, %116, %120 : vector<2x64xi1>, vector<2x64xf32>
    %c0_77 = arith.constant 0 : index
    %c0_78 = arith.constant 0 : index
    %122 = vector.load %arg24[%c0_77, %c0_78] : memref<64x128xbf16, #tpu.memory_space<vmem>>, vector<64x128xbf16>
    %c0_79 = arith.constant 0 : index
    %c0_80 = arith.constant 0 : index
    %123 = vector.load %arg25[%c0_79, %c0_80] : memref<1x128xf32, #tpu.memory_space<vmem>>, vector<1x128xf32>
    %124 = arith.truncf %121 : vector<2x64xf32> to vector<2x64xbf16>
    %cst_81 = arith.constant dense<0.000000e+00> : vector<2x128xf32>
    %125 = tpu.matmul %124, %122, %cst_81 {dimension_numbers = #tpu.dot_dimension_numbers<[1], [0], [0], [1], [0, 0, 1, 1], [], []>} : vector<2x64xbf16>, vector<64x128xbf16>, vector<2x128xf32> -> vector<2x128xf32>
    %126 = vector.broadcast %123 : vector<1x128xf32> to vector<2x128xf32>
    %127 = arith.addf %125, %126 : vector<2x128xf32>
    %cst_82 = arith.constant 0.000000e+00 : f32
    %128 = vector.broadcast %cst_82 : f32 to vector<2x128xf32>
    %129 = arith.cmpf ogt, %127, %128 : vector<2x128xf32>
    %cst_83 = arith.constant 0.00999999977 : f32
    %130 = vector.broadcast %cst_83 : f32 to vector<2x128xf32>
    %131 = arith.mulf %130, %127 : vector<2x128xf32>
    %132 = arith.select %129, %127, %131 : vector<2x128xi1>, vector<2x128xf32>
    %c0_84 = arith.constant 0 : index
    %c0_85 = arith.constant 0 : index
    %133 = vector.load %arg26[%c0_84, %c0_85] : memref<2x128xf32, #tpu.memory_space<vmem>>, vector<2x128xf32>
    tpu.vector_store %arg26[%c0_84, %c0_85], %132 {strides = array<i32>} : memref<2x128xf32, #tpu.memory_space<vmem>>, vector<2x128xf32>,
    return
  }
  func.func @transform_0(%arg0: i32) -> (i32, i32) {
    %c0_i32 = arith.constant 0 : i32
    %c0_i32_0 = arith.constant 0 : i32
    return %arg0, %c0_i32 : i32, i32
  }
  func.func @transform_1(%arg0: i32) -> (i32, i32) {
    %c0_i32 = arith.constant 0 : i32
    %c0_i32_0 = arith.constant 0 : i32
    %c0_i32_1 = arith.constant 0 : i32
    return %c0_i32, %c0_i32_0 : i32, i32
  }
  func.func @transform_2(%arg0: i32) -> (i32, i32) {
    %c0_i32 = arith.constant 0 : i32
    %c0_i32_0 = arith.constant 0 : i32
    %c0_i32_1 = arith.constant 0 : i32
    return %c0_i32, %c0_i32_0 : i32, i32
  }
  func.func @transform_3(%arg0: i32) -> (i32, i32) {
    %c0_i32 = arith.constant 0 : i32
    %c0_i32_0 = arith.constant 0 : i32
    %c0_i32_1 = arith.constant 0 : i32
    return %c0_i32, %c0_i32_0 : i32, i32
  }
  func.func @transform_4(%arg0: i32) -> (i32, i32) {
    %c0_i32 = arith.constant 0 : i32
    %c0_i32_0 = arith.constant 0 : i32
    %c0_i32_1 = arith.constant 0 : i32
    return %c0_i32, %c0_i32_0 : i32, i32
  }
  func.func @transform_5(%arg0: i32) -> (i32, i32) {
    %c0_i32 = arith.constant 0 : i32
    %c0_i32_0 = arith.constant 0 : i32
    %c0_i32_1 = arith.constant 0 : i32
    return %c0_i32, %c0_i32_0 : i32, i32
  }
  func.func @transform_6(%arg0: i32) -> (i32, i32) {
    %c0_i32 = arith.constant 0 : i32
    %c0_i32_0 = arith.constant 0 : i32
    %c0_i32_1 = arith.constant 0 : i32
    return %c0_i32, %c0_i32_0 : i32, i32
  }
  func.func @transform_7(%arg0: i32) -> (i32, i32) {
    %c0_i32 = arith.constant 0 : i32
    %c0_i32_0 = arith.constant 0 : i32
    %c0_i32_1 = arith.constant 0 : i32
    return %c0_i32, %c0_i32_0 : i32, i32
  }
  func.func @transform_8(%arg0: i32) -> (i32, i32) {
    %c0_i32 = arith.constant 0 : i32
    %c0_i32_0 = arith.constant 0 : i32
    %c0_i32_1 = arith.constant 0 : i32
    return %c0_i32, %c0_i32_0 : i32, i32
  }
  func.func @transform_9(%arg0: i32) -> (i32, i32) {
    %c0_i32 = arith.constant 0 : i32
    %c0_i32_0 = arith.constant 0 : i32
    %c0_i32_1 = arith.constant 0 : i32
    return %c0_i32, %c0_i32_0 : i32, i32
  }
  func.func @transform_10(%arg0: i32) -> (i32, i32) {
    %c0_i32 = arith.constant 0 : i32
    %c0_i32_0 = arith.constant 0 : i32
    %c0_i32_1 = arith.constant 0 : i32
    return %c0_i32, %c0_i32_0 : i32, i32
  }
  func.func @transform_11(%arg0: i32) -> (i32, i32) {
    %c0_i32 = arith.constant 0 : i32
    %c0_i32_0 = arith.constant 0 : i32
    %c0_i32_1 = arith.constant 0 : i32
    return %c0_i32, %c0_i32_0 : i32, i32
  }
  func.func @transform_12(%arg0: i32) -> (i32, i32) {
    %c0_i32 = arith.constant 0 : i32
    %c0_i32_0 = arith.constant 0 : i32
    %c0_i32_1 = arith.constant 0 : i32
    return %c0_i32, %c0_i32_0 : i32, i32
  }
  func.func @transform_13(%arg0: i32) -> (i32, i32) {
    %c0_i32 = arith.constant 0 : i32
    %c0_i32_0 = arith.constant 0 : i32
    %c0_i32_1 = arith.constant 0 : i32
    return %c0_i32, %c0_i32_0 : i32, i32
  }
  func.func @transform_14(%arg0: i32) -> (i32, i32) {
    %c0_i32 = arith.constant 0 : i32
    %c0_i32_0 = arith.constant 0 : i32
    %c0_i32_1 = arith.constant 0 : i32
    return %c0_i32, %c0_i32_0 : i32, i32
  }
  func.func @transform_15(%arg0: i32) -> (i32, i32) {
    %c0_i32 = arith.constant 0 : i32
    %c0_i32_0 = arith.constant 0 : i32
    %c0_i32_1 = arith.constant 0 : i32
    return %c0_i32, %c0_i32_0 : i32, i32
  }
  func.func @transform_16(%arg0: i32) -> (i32, i32) {
    %c0_i32 = arith.constant 0 : i32
    %c0_i32_0 = arith.constant 0 : i32
    %c0_i32_1 = arith.constant 0 : i32
    return %c0_i32, %c0_i32_0 : i32, i32
  }
  func.func @transform_17(%arg0: i32) -> (i32, i32) {
    %c0_i32 = arith.constant 0 : i32
    %c0_i32_0 = arith.constant 0 : i32
    %c0_i32_1 = arith.constant 0 : i32
    return %c0_i32, %c0_i32_0 : i32, i32
  }
  func.func @transform_18(%arg0: i32) -> (i32, i32) {
    %c0_i32 = arith.constant 0 : i32
    %c0_i32_0 = arith.constant 0 : i32
    %c0_i32_1 = arith.constant 0 : i32
    return %c0_i32, %c0_i32_0 : i32, i32
  }
  func.func @transform_19(%arg0: i32) -> (i32, i32) {
    %c0_i32 = arith.constant 0 : i32
    %c0_i32_0 = arith.constant 0 : i32
    %c0_i32_1 = arith.constant 0 : i32
    return %c0_i32, %c0_i32_0 : i32, i32
  }
  func.func @transform_20(%arg0: i32) -> (i32, i32) {
    %c0_i32 = arith.constant 0 : i32
    %c0_i32_0 = arith.constant 0 : i32
    %c0_i32_1 = arith.constant 0 : i32
    return %c0_i32, %c0_i32_0 : i32, i32
  }
  func.func @transform_21(%arg0: i32) -> (i32, i32) {
    %c0_i32 = arith.constant 0 : i32
    %c0_i32_0 = arith.constant 0 : i32
    %c0_i32_1 = arith.constant 0 : i32
    return %c0_i32, %c0_i32_0 : i32, i32
  }
  func.func @transform_22(%arg0: i32) -> (i32, i32) {
    %c0_i32 = arith.constant 0 : i32
    %c0_i32_0 = arith.constant 0 : i32
    %c0_i32_1 = arith.constant 0 : i32
    return %c0_i32, %c0_i32_0 : i32, i32
  }
  func.func @transform_23(%arg0: i32) -> (i32, i32) {
    %c0_i32 = arith.constant 0 : i32
    %c0_i32_0 = arith.constant 0 : i32
    %c0_i32_1 = arith.constant 0 : i32
    return %c0_i32, %c0_i32_0 : i32, i32
  }
  func.func @transform_24(%arg0: i32) -> (i32, i32) {
    %c0_i32 = arith.constant 0 : i32
    %c0_i32_0 = arith.constant 0 : i32
    %c0_i32_1 = arith.constant 0 : i32
    return %c0_i32, %c0_i32_0 : i32, i32
  }
  func.func @transform_25(%arg0: i32) -> (i32, i32) {
    %c0_i32 = arith.constant 0 : i32
    %c0_i32_0 = arith.constant 0 : i32
    return %arg0, %c0_i32 : i32, i32
  }
}

</mosaic_0001>

<bundles_post_ra>
// kernel: tpu_custom_call.1
= control target key start
LH: loop header
LB: loop body
LE: loop exit
PB: predicated region body
PF: predicated region fallthrough
CT: control target
= control target key end

     0   :  { %s10199_s0 = inlined_call_operand.hbm [shape: f32[2,8], index: 0, kind: input, shape index: {}]   ;;  %s10200_s1 = inlined_call_operand.hbm [shape: bf16[8,16], index: 1, kind: input, shape index: {}]   ;;  %s10201_s2 = inlined_call_operand.vmem [shape: f32[1,16], index: 2, kind: input, shape index: {}]   ;;  %s10202_s3 = inlined_call_operand.vmem [shape: bf16[16,32], index: 3, kind: input, shape index: {}]   ;;  %s10203_s4 = inlined_call_operand.hbm [shape: f32[1,32], index: 4, kind: input, shape index: {}]   ;;  %s10204_s5 = inlined_call_operand.vmem [shape: bf16[32,64], index: 5, kind: input, shape index: {}]   ;;  %s10205_s6 = inlined_call_operand.hbm [shape: f32[1,64], index: 6, kind: input, shape index: {}]   ;;  %s10206_s7 = inlined_call_operand.vmem [shape: bf16[64,128], index: 7, kind: input, shape index: {}]   ;;  %s10207_s8 = inlined_call_operand.hbm [shape: f32[1,128], index: 8, kind: input, shape index: {}]   ;;  %s10208_s9 = inlined_call_operand.hbm [shape: bf16[128,256], index: 9, kind: input, shape index: {}]   ;;  %s10209_s10 = inlined_call_operand.hbm [shape: f32[1,256], index: 10, kind: input, shape index: {}]   ;;  %s10210_s11 = inlined_call_operand.hbm [shape: bf16[256,512], index: 11, kind: input, shape index: {}]   ;;  %s10211_s12 = inlined_call_operand.vmem [shape: f32[1,512], index: 12, kind: input, shape index: {}]   ;;  %s10212_s13 = inlined_call_operand.hbm [shape: bf16[512,1024], index: 13, kind: input, shape index: {}]   ;;  %s10213_s14 = inlined_call_operand.vmem [shape: f32[1,1024], index: 14, kind: input, shape index: {}]   ;;  %s10214_s15 = inlined_call_operand.hbm [shape: bf16[1024,512], index: 15, kind: input, shape index: {}]   ;;  %s10215_s16 = inlined_call_operand.vmem [shape: f32[1,512], index: 16, kind: input, shape index: {}]   ;;  %s10216_s17 = inlined_call_operand.hbm [shape: bf16[512,256], index: 17, kind: input, shape index: {}]   ;;  %s10217_s18 = inlined_call_operand.vmem [shape: f32[1,256], index: 18, kind: input, shape index: {}]   ;;  %s10218_s19 = inlined_call_operand.hbm [shape: bf16[256,128], index: 19, kind: input, shape index: {}]   ;;  %s10219_s20 = inlined_call_operand.vmem [shape: f32[1,128], index: 20, kind: input, shape index: {}]   ;;  %s10220_s21 = inlined_call_operand.vmem [shape: bf16[128,64], index: 21, kind: input, shape index: {}]   ;;  %s10221_s22 = inlined_call_operand.vmem [shape: f32[1,64], index: 22, kind: input, shape index: {}]   ;;  %s10222_s23 = inlined_call_operand.vmem [shape: bf16[64,128], index: 23, kind: input, shape index: {}]   ;;  %s10223_s24 = inlined_call_operand.vmem [shape: f32[1,128], index: 24, kind: input, shape index: {}]   ;;  %s10224_s25 = inlined_call_operand.hbm [shape: f32[2,128], index: 25, kind: output, shape index: {}]  }
   0x1   :  { %10229 = sst [smem:[#allocation31_spill]] %s10199_s0 }
   0x2   :  { %10230 = sst [smem:[#allocation32_spill]] %s10200_s1 }
   0x3   :  { %10231 = sst [smem:[#allocation33_spill]] %s10201_s2 }
   0x4   :  { %10232 = sst [smem:[#allocation34_spill]] %s10202_s3 }
   0x5   :  { %10233 = sst [smem:[#allocation35_spill]] %s10203_s4 }
   0x6   :  { %10234 = sst [smem:[#allocation36_spill]] %s10204_s5 }
   0x7   :  { %10235 = sst [smem:[#allocation37_spill]] %s10205_s6 }
   0x8   :  { %10236 = sst [smem:[#allocation38_spill]] %s10206_s7 }
   0x9   :  { %10237 = sst [smem:[#allocation39_spill]] %s10207_s8 }
   0xa   :  { %10238 = sst [smem:[#allocation40_spill]] %s10208_s9 }
   0xb   :  { %10239 = sst [smem:[#allocation41_spill]] %s10221_s22 }
   0xc   :  { %10240 = sst [smem:[#allocation42_spill]] %s10223_s24 }
   0xd   :  { %10241 = sst [smem:[#allocation43_spill]] %s10224_s25 }
   0xe   :  { %30 = vsyncpa [#allocation3], 0 }
   0xf   :  { %31 = vsyncpa [#allocation6], 0 }
  0x10   :  { %32 = vsyncpa [#allocation9], 0 }
  0x11   :  { %33 = vsyncpa [#allocation12], 0 }
  0x12   :  { %34 = vsyncpa [#allocation15], 0 }
  0x13   :  { %35 = vsyncpa [#allocation18], 0 }
  0x14   :  { %36 = vsyncpa [#allocation21], 0  ;;  %s10242_s6 = sld [smem:[#allocation32_spill]] }
  0x1a   :  { %s54_s30 = sshll.u32 %s10242_s6, 4  ;;  %s55_s30 = int_to_ptr.hbm [resolvable:$true] %s54_s30 }
  0x1b   :  { %37 = vsyncpa [#allocation4], 0  ;;  %s9696_s7 = smov [#allocation5]   ;;  %s10243_s8 = sld [smem:[#allocation37_spill]] }
  0x1c   :  { %s56_s3 = sshll.u32 %s9696_s7, 4  ;;  %s9697_s4 = smov [#allocation8]   ;;  %s57_s3 = int_to_ptr.vmem [resolvable:$true] %s56_s3 }
  0x1d   :  { %59 = dma.hbm_to_vmem [thread:$0]  %s55_s30, 64, %s57_s3, [#allocation6]  }
  0x1e   :  { %s84_s28 = sshll.u32 %s9697_s4, 4  ;;  %s10244_s0 = sld [smem:[#allocation40_spill]]  ;;  %s85_s28 = int_to_ptr.vmem [resolvable:$true] %s84_s28 }
  0x1f   :  { %s9698_s29 = smov [#allocation11]   ;;  %s129_s24 = sshll.u32 %s10210_s11, 4  ;;  %s130_s24 = int_to_ptr.hbm [resolvable:$true] %s129_s24 }
  0x20   :  { %s107_s2 = sshll.u32 %s9698_s29, 4  ;;  %s10227_s26 = smov 128   ;;  %s108_s2 = int_to_ptr.vmem [resolvable:$true] %s107_s2 }
  0x21   :  { %s82_s27 = sshll.u32 %s10243_s8, 4  ;;  %s10228_s1 = smov 8   ;;  %s83_s27 = int_to_ptr.hbm [resolvable:$true] %s82_s27 }
  0x22   :  { %87 = dma.hbm_to_vmem [thread:$0]  %s83_s27, 16, %s85_s28, [#allocation9]  }
  0x23   :  { %s9701_s30 = smov [#allocation14]   ;;  %s9702_s8 = smov 256  }
  0x24   :  { %s105_s25 = sshll.u32 %s10244_s0, 4  ;;  %s131_s3 = sshll.u32 %s9701_s30, 4  ;;  %s106_s25 = int_to_ptr.hbm [resolvable:$true] %s105_s25  ;;  %s132_s3 = int_to_ptr.vmem [resolvable:$true] %s131_s3 }
  0x25   :  { %113 = dma.hbm_to_vmem [thread:$0]  %s106_s25, 2048, %s108_s2, [#allocation12], %s10227_s26, %s10227_s26, %s10228_s1  }
  0x26   :  { %s9703_s4 = smov 16   ;;  %s159_s9 = sshll.u32 %s10214_s15, 4  ;;  %s160_s9 = int_to_ptr.hbm [resolvable:$true] %s159_s9 }
  0x27   :  { %137 = dma.hbm_to_vmem [thread:$0]  %s130_s24, 8192, %s132_s3, [#allocation15], %s9702_s8, %s9702_s8, %s9703_s4  }
  0x28   :  { %s9704_s5 = smov [#allocation17]   ;;  %s10245_s6 = sld [smem:[#allocation31_spill]] }
  0x29   :  { %s161_s11 = sshll.u32 %s9704_s5, 4  ;;  %s9705_s25 = smov [#allocation2]   ;;  %s162_s11 = int_to_ptr.vmem [resolvable:$true] %s161_s11 }
  0x2a   :  { %167 = dma.hbm_to_vmem [thread:$0]  %s160_s9, 32768, %s162_s11, [#allocation18], %s9702_s8, %s9702_s8, %s9703_s4  }
  0x2b   :  { %s45_s2 = sshll.u32 %s9705_s25, 4  ;;  %s10246_s1 = sld [smem:[#allocation35_spill]]  ;;  %s46_s2 = int_to_ptr.vmem [resolvable:$true] %s45_s2 }
  0x2c   :  { %s10247_s27 = sld [smem:[#allocation39_spill]]  ;;  %s9706_s5 = smov [#allocation7]  }
  0x2d   :  { %s71_s22 = sshll.u32 %s9706_s5, 4  ;;  %s9707_s8 = smov [#allocation10]   ;;  %s72_s22 = int_to_ptr.vmem [resolvable:$true] %s71_s22 }
  0x2e   :  { %s43_s7 = sshll.u32 %s10245_s6, 4  ;;  %s97_s4 = sshll.u32 %s9707_s8, 4  ;;  %s44_s7 = int_to_ptr.hbm [resolvable:$true] %s43_s7  ;;  %s98_s4 = int_to_ptr.vmem [resolvable:$true] %s97_s4 }
  0x2f   :  { %48 = dma.hbm_to_vmem [thread:$0]  %s44_s7, 32, %s46_s2, [#allocation3]  }
  0x30   :  { %s119_s0 = sshll.u32 %s10209_s10, 4  ;;  %s144_s29 = sshll.u32 %s10212_s13, 4  ;;  %s120_s0 = int_to_ptr.hbm [resolvable:$true] %s119_s0  ;;  %s145_s29 = int_to_ptr.hbm [resolvable:$true] %s144_s29 }
  0x31   :  { %s69_s24 = sshll.u32 %s10246_s1, 4  ;;  %s9708_s6 = smov [#allocation13]   ;;  %s70_s24 = int_to_ptr.hbm [resolvable:$true] %s69_s24 }
  0x32   :  { %s95_s28 = sshll.u32 %s10247_s27, 4  ;;  %s121_s7 = sshll.u32 %s9708_s6, 4  ;;  %s96_s28 = int_to_ptr.hbm [resolvable:$true] %s95_s28  ;;  %s122_s7 = int_to_ptr.vmem [resolvable:$true] %s121_s7 }
  0x33   :  { %74 = dma.hbm_to_vmem [thread:$0]  %s70_s24, 16, %s72_s22, [#allocation6]  }
  0x34   :  { %100 = dma.hbm_to_vmem [thread:$0]  %s96_s28, 16, %s98_s4, [#allocation9]  }
  0x35   :  { %124 = dma.hbm_to_vmem [thread:$0]  %s120_s0, 32, %s122_s7, [#allocation12]  }
  0x36   :  { %s9709_s25 = smov [#allocation16]   ;;  %s9710_s2 = smov 512  }
  0x37   :  { %s146_s22 = sshll.u32 %s9709_s25, 4  ;;  %s9711_s30 = smov 32   ;;  %s147_s22 = int_to_ptr.vmem [resolvable:$true] %s146_s22 }
  0x38   :  { %152 = dma.hbm_to_vmem [thread:$0]  %s145_s29, 32768, %s147_s22, [#allocation15], %s9710_s2, %s9710_s2, %s9711_s30  }
  0x39   :  { %s174_s15 = sshll.u32 %s10216_s17, 4  ;;  %s9712_s3 = smov [#allocation19]   ;;  %s175_s15 = int_to_ptr.hbm [resolvable:$true] %s174_s15 }
  0x3a   :  { %s176_s27 = sshll.u32 %s9712_s3, 4  ;;  %s189_s5 = sshll.u32 %s10218_s19, 4  ;;  %s177_s27 = int_to_ptr.vmem [resolvable:$true] %s176_s27  ;;  %s190_s5 = int_to_ptr.hbm [resolvable:$true] %s189_s5 }
  0x3b   :  { %s10248_s8 = smov 8   ;;  %s10249_s4 = smov 128  }
  0x3c   :  { %182 = dma.hbm_to_vmem [thread:$0]  %s175_s15, 8192, %s177_s27, [#allocation18], %s10249_s4, %s10249_s4, %s10248_s8  }
  0x3d   :  { %s9713_s9 = smov [#allocation20]   ;;  %s9714_s0 = smov 64  }
  0x3e   :  { %s191_s11 = sshll.u32 %s9713_s9, 4  ;;  %s9715_s26 = smov 4   ;;  %s192_s11 = int_to_ptr.vmem [resolvable:$true] %s191_s11 }
  0x3f   :  { %197 = dma.hbm_to_vmem [thread:$0]  %s190_s5, 2048, %s192_s11, [#allocation21], %s9714_s0, %s9714_s0, %s9715_s26  }
  0x40   :  { %9680 = dma.done.wait [#allocation3], 32  }
  0x41   :  { %9681 = vsyncadd [#allocation3], 4294967264 }
  0x42   :  { %9682 = dma.done.wait [#allocation6], 80  }
  0x43   :  { %9683 = vsyncadd [#allocation6], 4294967216 }
  0x44   :  { %9684 = dma.done.wait [#allocation9], 32  }
  0x45   :  { %9685 = vsyncadd [#allocation9], 4294967264 }
  0x46   :  { %9686 = dma.done.wait [#allocation12], 2080  }
  0x47   :  { %9687 = vsyncadd [#allocation12], 4294965216 }
  0x48   :  { %9688 = dma.done.wait [#allocation15], 40960  }
  0x49   :  { %9689 = vsyncadd [#allocation15], 4294926336 }
  0x4a   :  { %9690 = dma.done.wait [#allocation18], 40960  }
  0x4b   :  { %9691 = vsyncadd [#allocation18], 4294926336 }
  0x4c   :  { %9692 = dma.done.wait [#allocation21], 2048  }
  0x4d   :  { %9693 = vsyncadd [#allocation21], 4294965248  ;;  %vm268_vm0 = vcmask 1043456   ;;  %v258_v0 = vld [vmem:[#allocation5] sm:$0xf]  ;;  %vm264_vm1 = vcmask 64512  }
  0x4e   :  { %v257_v1 = vld [vmem:[#allocation2] sm:$0x3]  ;;  %v270_v2 = vsel %vm268_vm0, %v258_v0, 0  ;;  %s10250_s1 = sld [smem:[#allocation34_spill]]  ;;  %vm301_vm3 = vcmask 130048   ;;  %vm342_vm5 = vcmask 261120  }
  0x4f   :  { %v260_v3 = vpack.c.bf16 %v257_v1, %v257_v1  ;;  %279 = vmatpush.bf16.msra.mxu2 %v270_v2  ;;  %s10251_s7 = sld [smem:[#allocation33_spill]]  ;;  %v9360_v16 = vld [vmem:[#allocation7] ss:$0 sm:$0xff]  ;;  %v5968_v25 = vld [vmem:[#allocation11 + $0x70] sm:$0xf]  ;;  %vm399_vm7 = vcmask 523264  }
  0x50   :  { %s10252_s2 = sld [smem:[#allocation36_spill]]  ;;  %v8669_v26 = vld [vmem:[#allocation11 + $0x74] sm:$0xf0]  ;;  %v8668_v27 = vld [vmem:[#allocation11 + $0x74] sm:$0xf] }
  0x51   :  { %s10253_s3 = sld [smem:[#allocation38_spill]]  ;;  %v5969_v28 = vor.u32 %v8669_v26, %v5968_v25  ;;  %v5970_v29 = vld [vmem:[#allocation11 + $0x78] sm:$0xf0]  ;;  %v5960_v30 = vld [vmem:[#allocation11 + $0x60] sm:$0xf] }
  0x52   :  { %5878 = vmatmul.msk.bf16.vlgmr.msra.gmra.mxu2 %vm264_vm1, %v260_v3  ;;  %v8667_v31 = vld [vmem:[#allocation11 + $0x64] sm:$0xf0]  ;;  %v5973_v32 = vor.u32 %v8668_v27, %v5970_v29  ;;  %v8666_v33 = vld [vmem:[#allocation11 + $0x64] sm:$0xf]  ;;  %v5962_v34 = vld [vmem:[#allocation11 + $0x68] sm:$0xf0] }
  0x53   :  { %522 = vmatpush.bf16.msra.mxu0 %v5969_v28  ;;  %v5961_v35 = vor.u32 %v8667_v31, %v5960_v30  ;;  %v5965_v36 = vor.u32 %v8666_v33, %v5962_v34  ;;  %v5952_v37 = vld [vmem:[#allocation11 + $0x50] sm:$0xf]  ;;  %v8665_v38 = vld [vmem:[#allocation11 + $0x54] sm:$0xf0]  ;;  %v8664_v39 = vld [vmem:[#allocation11 + $0x54] sm:$0xf] }
  0x54   :  { %v8647_v4 = vld [vmem:[%s10250_s1] sm:$0xff]  ;;  %v5954_v40 = vld [vmem:[#allocation11 + $0x58] sm:$0xf0]  ;;  %v5953_v41 = vor.u32 %v8665_v38, %v5952_v37  ;;  %v5944_v43 = vld [vmem:[#allocation11 + $0x40] sm:$0xf]  ;;  %s10256_s30 = sld [smem:[#allocation43_spill]] }
  0x55   :  { %312 = vmatpush.bf16.msra.mxu1 %v8647_v4  ;;  %v9359_v5 = vld [vmem:[%s10251_s7] ss:$0 sm:$0xff]  ;;  %v5957_v42 = vor.u32 %v8664_v39, %v5954_v40  ;;  %v8663_v44 = vld [vmem:[#allocation11 + $0x44] sm:$0xf0]  ;;  %v8662_v45 = vld [vmem:[#allocation11 + $0x44] sm:$0xf] }
  0x56   :  { %v8649_v12 = vld [vmem:[%s10252_s2 + $0x8] sm:$0xff]  ;;  %v8648_v13 = vld [vmem:[%s10252_s2] sm:$0xff]  ;;  %v5946_v46 = vld [vmem:[#allocation11 + $0x48] sm:$0xf0]  ;;  %v5945_v47 = vor.u32 %v8663_v44, %v5944_v43  ;;  %s10255_s7 = sld [smem:[#allocation42_spill]] }
  0x57   :  { %352 = vmatpush.bf16.msrb.mxu2 %v8649_v12  ;;  %v8653_v14 = vld [vmem:[%s10253_s3 + $0x18] sm:$0xff]  ;;  %v8652_v15 = vld [vmem:[%s10253_s3 + $0x10] sm:$0xff]  ;;  %v8651_v23 = vld [vmem:[%s10253_s3 + $0x8] sm:$0xff]  ;;  %523 = vmatpush.bf16.msra.mxu0 %v5961_v35  ;;  %v5949_v48 = vor.u32 %v8662_v45, %v5946_v46 }
  0x58   :  { %407 = vmatpush.bf16.msra.mxu3 %v8653_v14  ;;  %v8650_v24 = vld [vmem:[%s10253_s3] sm:$0xff]  ;;  %v5936_v49 = vld [vmem:[#allocation11 + $0x30] sm:$0xf]  ;;  %v5938_v52 = vld [vmem:[#allocation11 + $0x38] sm:$0xf0] }
  0x59   :  { %535 = vmatpush.bf16.msrb.mxu1 %v5973_v32  ;;  %v8661_v50 = vld [vmem:[#allocation11 + $0x34] sm:$0xf0]  ;;  %v8660_v51 = vld [vmem:[#allocation11 + $0x34] sm:$0xf]  ;;  %v5928_v55 = vld [vmem:[#allocation11 + $0x20] sm:$0xf] }
  0x5a   :  { %v5937_v53 = vor.u32 %v8661_v50, %v5936_v49  ;;  %v5941_v54 = vor.u32 %v8660_v51, %v5938_v52  ;;  %v8659_v56 = vld [vmem:[#allocation11 + $0x24] sm:$0xf0]  ;;  %v8658_v57 = vld [vmem:[#allocation11 + $0x24] sm:$0xf]  ;;  %v5930_v58 = vld [vmem:[#allocation11 + $0x28] sm:$0xf0] }
  0x5b   :  { %353 = vmatpush.bf16.msrb.mxu2 %v8648_v13  ;;  %524 = vmatpush.bf16.msra.mxu0 %v5953_v41  ;;  %v5929_v59 = vor.u32 %v8659_v56, %v5928_v55  ;;  %v5933_v60 = vor.u32 %v8658_v57, %v5930_v58  ;;  %v9361_v61 = vld [vmem:[#allocation8] ss:$0 sm:$0xff]  ;;  %v5920_v4 = vld [vmem:[#allocation11 + $0x10] sm:$0xf]  ;;  %v8654_v12 = vld [vmem:[#allocation11 + $0x4] sm:$0xf] }
  0x5c   :  { %408 = vmatpush.bf16.msra.mxu3 %v8652_v15  ;;  %v5914_v14 = vld [vmem:[#allocation11 + $0x8] sm:$0xf0]  ;;  %v8730_v25 = vld [vmem:[#allocation14 + $0x1e4] sm:$0xf]  ;;  %v6218_v26 = vld [vmem:[#allocation14 + $0x1f0] sm:$0xf0] }
  0x5d   :  { %536 = vmatpush.bf16.msrb.mxu1 %v5965_v36  ;;  %v5917_v15 = vor.u32 %v8654_v12, %v5914_v14  ;;  %v6072_v27 = vld [vmem:[#allocation14 + $0xc0] sm:$0xf]  ;;  %v6221_v28 = vor.u32 %v8730_v25, %v6218_v26  ;;  %v8696_v29 = vld [vmem:[#allocation14 + $0xcc] sm:$0xf0]  ;;  %v8694_v34 = vld [vmem:[#allocation14 + $0xc4] sm:$0xf] }
  0x5e   :  { %v6200_v30 = vld [vmem:[#allocation14 + $0x1c0] sm:$0xf]  ;;  %v8728_v31 = vld [vmem:[#allocation14 + $0x1cc] sm:$0xf0]  ;;  %v6073_v32 = vor.u32 %v8696_v29, %v6072_v27  ;;  %v6074_v35 = vld [vmem:[#allocation14 + $0xd0] sm:$0xf0] }
  0x5f   :  { %525 = vmatpush.bf16.msra.mxu0 %v5945_v47  ;;  %v6201_v33 = vor.u32 %v8728_v31, %v6200_v30  ;;  %v8726_v36 = vld [vmem:[#allocation14 + $0x1c4] sm:$0xf]  ;;  %v6077_v37 = vor.u32 %v8694_v34, %v6074_v35  ;;  %v6202_v38 = vld [vmem:[#allocation14 + $0x1d0] sm:$0xf0]  ;;  %v6056_v39 = vld [vmem:[#allocation14 + $0xa0] sm:$0xf] }
  0x60   :  { %409 = vmatpush.bf16.msra.mxu3 %v8651_v23  ;;  %v8692_v40 = vld [vmem:[#allocation14 + $0xac] sm:$0xf0]  ;;  %v6205_v41 = vor.u32 %v8726_v36, %v6202_v38  ;;  %v8690_v44 = vld [vmem:[#allocation14 + $0xa4] sm:$0xf]  ;;  %v6058_v46 = vld [vmem:[#allocation14 + $0xb0] sm:$0xf0] }
  0x61   :  { %537 = vmatpush.bf16.msrb.mxu1 %v5957_v42  ;;  %v6184_v42 = vld [vmem:[#allocation14 + $0x1a0] sm:$0xf]  ;;  %v8724_v43 = vld [vmem:[#allocation14 + $0x1ac] sm:$0xf0]  ;;  %v6057_v45 = vor.u32 %v8692_v40, %v6056_v39  ;;  %v8722_v47 = vld [vmem:[#allocation14 + $0x1a4] sm:$0xf]  ;;  %v6061_v50 = vor.u32 %v8690_v44, %v6058_v46 }
  0x62   :  { %v6185_v49 = vor.u32 %v8724_v43, %v6184_v42  ;;  %v6040_v51 = vld [vmem:[#allocation14 + $0x80] sm:$0xf]  ;;  %v8688_v52 = vld [vmem:[#allocation14 + $0x8c] sm:$0xf0]  ;;  %v8686_v56 = vld [vmem:[#allocation14 + $0x84] sm:$0xf] }
  0x63   :  { %526 = vmatpush.bf16.msra.mxu0 %v5937_v53  ;;  %v6168_v53 = vld [vmem:[#allocation14 + $0x180] sm:$0xf]  ;;  %v8720_v55 = vld [vmem:[#allocation14 + $0x18c] sm:$0xf0]  ;;  %v6042_v57 = vld [vmem:[#allocation14 + $0x90] sm:$0xf0] }
  0x64   :  { %410 = vmatpush.bf16.msra.mxu3 %v8650_v24  ;;  %v8718_v58 = vld [vmem:[#allocation14 + $0x184] sm:$0xf]  ;;  %v8680_v12 = vld [vmem:[#allocation14 + $0x4c] sm:$0xf0]  ;;  %v6120_v26 = vld [vmem:[#allocation14 + $0x120] sm:$0xf] }
  0x65   :  { %538 = vmatpush.bf16.msrb.mxu1 %v5949_v48  ;;  %v6186_v48 = vld [vmem:[#allocation14 + $0x1b0] sm:$0xf0]  ;;  %v8676_v25 = vld [vmem:[#allocation14 + $0x2c] sm:$0xf0]  ;;  %v8674_v29 = vld [vmem:[#allocation14 + $0x24] sm:$0xf] }
  0x66   :  { %v5994_v30 = vld [vmem:[#allocation14 + $0x30] sm:$0xf0]  ;;  %v8706_v31 = vld [vmem:[#allocation14 + $0x124] sm:$0xf]  ;;  %v5976_v34 = vld [vmem:[#allocation14] sm:$0xf] }
  0x67   :  { %527 = vmatpush.bf16.msra.mxu0 %v5929_v59  ;;  %v6170_v59 = vld [vmem:[#allocation14 + $0x190] sm:$0xf0]  ;;  %v8672_v38 = vld [vmem:[#allocation14 + $0xc] sm:$0xf0]  ;;  %v6104_v39 = vld [vmem:[#allocation14 + $0x100] sm:$0xf] }
  0x68   :  { %v8704_v40 = vld [vmem:[#allocation14 + $0x10c] sm:$0xf0]  ;;  %v8670_v43 = vld [vmem:[#allocation14 + $0x4] sm:$0xf]  ;;  %v5978_v44 = vld [vmem:[#allocation14 + $0x10] sm:$0xf0] }
  0x69   :  { %539 = vmatpush.bf16.msrb.mxu1 %v5941_v54  ;;  %v6189_v54 = vor.u32 %v8722_v47, %v6186_v48  ;;  %v6106_v46 = vld [vmem:[#allocation14 + $0x110] sm:$0xf0]  ;;  %v6096_v47 = vld [vmem:[#allocation14 + $0xe8] sm:$0xf]  ;;  %v8701_v48 = vld [vmem:[#allocation14 + $0xf4] sm:$0xf0] }
  0x6a   :  { %s5862_s24 = sshll.u32 %s10256_s30, 4  ;;  %s5863_s24 = int_to_ptr.hbm [resolvable:$true] %s5862_s24 }
  0x6d   :  { %540 = vmatpush.bf16.msrb.mxu1 %v5933_v60  ;;  %v6041_v60 = vor.u32 %v8688_v52, %v6040_v51  ;;  %v6224_v51 = vld [vmem:[#allocation14 + $0x1e8] sm:$0xf]  ;;  %v8733_v52 = vld [vmem:[#allocation14 + $0x1f4] sm:$0xf0] }
  0xd5   :  { %v281_v6 = vpop.f32.mrf.mxu2 }
  0xd6   :  { %v282_v7 = vadd.f32 %v9359_v5, %v281_v6  ;;  %v8657_v5 = vld [vmem:[#allocation11 + $0x14] sm:$0xf0]  ;;  %v8656_v6 = vld [vmem:[#allocation11 + $0x14] sm:$0xf] }
  0xd8   :  { %vm285_vm2 = vcmp.gt.f32.partialorder %v282_v7, 0.0  ;;  %v286_v8 = vmul.f32 0.01, %v282_v7 }
  0xda   :  { %v287_v9 = vsel %vm285_vm2, %v282_v7, %v286_v8  ;;  %v5921_v7 = vor.u32 %v8657_v5, %v5920_v4  ;;  %v5922_v8 = vld [vmem:[#allocation11 + $0x18] sm:$0xf0]  ;;  %v8682_v4 = vld [vmem:[#allocation14 + $0x64] sm:$0xf]  ;;  %v6026_v5 = vld [vmem:[#allocation14 + $0x70] sm:$0xf0] }
  0xdb   :  { %v291_v10 = vpack.c.bf16 %v287_v9, %v287_v9  ;;  %v5925_v9 = vor.u32 %v8656_v6, %v5922_v8  ;;  %v8714_v6 = vld [vmem:[#allocation14 + $0x164] sm:$0xf] }
  0xdc   :  { %528 = vmatpush.bf16.msra.mxu0 %v5921_v7  ;;  %v6154_v7 = vld [vmem:[#allocation14 + $0x170] sm:$0xf0] }
  0xdd   :  { %v283_v11 = vpop.f32.mrf.mxu2  ;;  %5883 = vmatmul.msk.bf16.vlgmr.msra.gmra.mxu1 %vm301_vm3, %v291_v10  ;;  %v5912_v10 = vld [vmem:[#allocation11] sm:$0xf]  ;;  %v6157_v14 = vor.u32 %v8714_v6, %v6154_v7  ;;  %v8729_v6 = vld [vmem:[#allocation14 + $0x1d4] sm:$0xf0]  ;;  %v8695_v7 = vld [vmem:[#allocation14 + $0xcc] sm:$0xf] }
  0xde   :  { %541 = vmatpush.bf16.msrb.mxu1 %v5925_v9  ;;  %v8655_v11 = vld [vmem:[#allocation11 + $0x4] sm:$0xf0] }
  0xdf   :  { %v5913_v13 = vor.u32 %v8655_v11, %v5912_v10  ;;  %v6029_v10 = vor.u32 %v8682_v4, %v6026_v5  ;;  %v6008_v11 = vld [vmem:[#allocation14 + $0x40] sm:$0xf] }
  0xe1   :  { %529 = vmatpush.bf16.msra.mxu0 %v5913_v13  ;;  %v6136_v13 = vld [vmem:[#allocation14 + $0x140] sm:$0xf] }
  0xe2   :  { %542 = vmatpush.bf16.msrb.mxu1 %v5917_v15  ;;  %v8712_v15 = vld [vmem:[#allocation14 + $0x14c] sm:$0xf0] }
  0xe6   :  { %989 = vmatpush.bf16.msra.mxu1 %v6221_v28  ;;  %v8708_v28 = vld [vmem:[#allocation14 + $0x12c] sm:$0xf0] }
  0xe7   :  { %v6121_v36 = vor.u32 %v8708_v28, %v6120_v26  ;;  %v8689_v28 = vld [vmem:[#allocation14 + $0x94] sm:$0xf0] }
  0xea   :  { %990 = vmatpush.bf16.msra.mxu1 %v6205_v41 }
  0xee   :  { %991 = vmatpush.bf16.msra.mxu1 %v6189_v54  ;;  %v6098_v54 = vld [vmem:[#allocation14 + $0xf8] sm:$0xf0] }
 0x15a   :  { %v314_v17 = vpop.f32.mrf.mxu1 }
 0x15b   :  { %v315_v18 = vadd.f32 %v9360_v16, %v314_v17  ;;  %v6088_v16 = vld [vmem:[#allocation14 + $0xe0] sm:$0xf]  ;;  %v8700_v17 = vld [vmem:[#allocation14 + $0xec] sm:$0xf0] }
 0x15d   :  { %vm318_vm4 = vcmp.gt.f32.partialorder %v315_v18, 0.0  ;;  %v319_v19 = vmul.f32 0.01, %v315_v18 }
 0x15f   :  { %v320_v20 = vsel %vm318_vm4, %v315_v18, %v319_v19  ;;  %v6216_v18 = vld [vmem:[#allocation14 + $0x1e0] sm:$0xf]  ;;  %v6089_v19 = vor.u32 %v8700_v17, %v6088_v16  ;;  %v8678_v16 = vld [vmem:[#allocation14 + $0x44] sm:$0xf]  ;;  %v6010_v17 = vld [vmem:[#allocation14 + $0x50] sm:$0xf0] }
 0x160   :  { %v326_v21 = vpack.c.bf16 %v320_v20, %v320_v20  ;;  %v8732_v20 = vld [vmem:[#allocation14 + $0x1ec] sm:$0xf0] }
 0x161   :  { %v6217_v23 = vor.u32 %v8732_v20, %v6216_v18  ;;  %950 = vmatpush.bf16.msra.mxu2 %v6089_v19  ;;  %v8710_v18 = vld [vmem:[#allocation14 + $0x144] sm:$0xf]  ;;  %v6138_v19 = vld [vmem:[#allocation14 + $0x150] sm:$0xf0]  ;;  %v9362_v20 = vld [vmem:[#allocation10] ss:$0 sm:$0xff] }
 0x162   :  { %v316_v22 = vpop.f32.mrf.mxu1  ;;  %5892 = vmatmul.msk.bf16.vlgmr.msrb.gmra.mxu2 %vm342_vm5, %v326_v21  ;;  %v8698_v21 = vld [vmem:[#allocation14 + $0xe4] sm:$0xf]  ;;  %v6141_v27 = vor.u32 %v8710_v18, %v6138_v19  ;;  %v8725_v19 = vld [vmem:[#allocation14 + $0x1b4] sm:$0xf0] }
 0x163   :  { %v6090_v22 = vld [vmem:[#allocation14 + $0xf0] sm:$0xf0]  ;;  %963 = vmatpush.bf16.msrb.mxu3 %v6217_v23  ;;  %v6013_v23 = vor.u32 %v8678_v16, %v6010_v17  ;;  %v8693_v16 = vld [vmem:[#allocation14 + $0xb4] sm:$0xf0]  ;;  %v6192_v17 = vld [vmem:[#allocation14 + $0x1a8] sm:$0xf] }
 0x164   :  { %v6093_v24 = vor.u32 %v8698_v21, %v6090_v22  ;;  %v6009_v21 = vor.u32 %v8680_v12, %v6008_v11  ;;  %v6137_v22 = vor.u32 %v8712_v15, %v6136_v13  ;;  %v6064_v15 = vld [vmem:[#allocation14 + $0xa8] sm:$0xf] }
 0x165   :  { %951 = vmatpush.bf16.msra.mxu2 %v6073_v32  ;;  %v6122_v32 = vld [vmem:[#allocation14 + $0x130] sm:$0xf0]  ;;  %v6065_v18 = vor.u32 %v8693_v16, %v6064_v15  ;;  %v8671_v15 = vld [vmem:[#allocation14 + $0xc] sm:$0xf]  ;;  %v5986_v16 = vld [vmem:[#allocation14 + $0x18] sm:$0xf0] }
 0x166   :  { %976 = vmatpush.bf16.msrb.mxu0 %v6093_v24  ;;  %v5992_v24 = vld [vmem:[#allocation14 + $0x20] sm:$0xf]  ;;  %v6125_v42 = vor.u32 %v8706_v31, %v6122_v32  ;;  %v8721_v31 = vld [vmem:[#allocation14 + $0x194] sm:$0xf0]  ;;  %v8687_v32 = vld [vmem:[#allocation14 + $0x8c] sm:$0xf] }
 0x167   :  { %964 = vmatpush.bf16.msrb.mxu3 %v6201_v33  ;;  %v5993_v33 = vor.u32 %v8676_v25, %v5992_v24  ;;  %v6194_v24 = vld [vmem:[#allocation14 + $0x1b8] sm:$0xf0] }
 0x169   :  { %952 = vmatpush.bf16.msra.mxu2 %v6057_v45  ;;  %v8702_v45 = vld [vmem:[#allocation14 + $0x104] sm:$0xf] }
 0x16a   :  { %977 = vmatpush.bf16.msrb.mxu0 %v6077_v37  ;;  %v5997_v37 = vor.u32 %v8674_v29, %v5994_v30  ;;  %v6176_v29 = vld [vmem:[#allocation14 + $0x188] sm:$0xf] }
 0x16b   :  { %965 = vmatpush.bf16.msrb.mxu3 %v6185_v49 }
 0x16d   :  { %953 = vmatpush.bf16.msra.mxu2 %v6041_v60 }
 0x16e   :  { %978 = vmatpush.bf16.msrb.mxu0 %v6061_v50  ;;  %v5977_v50 = vor.u32 %v8672_v38, %v5976_v34  ;;  %v6177_v34 = vor.u32 %v8721_v31, %v6176_v29  ;;  %v8858_v31 = vld [vmem:[#allocation16 + $0x3dc] sm:$0xf0] }
 0x1e5   :  { %v355_v62 = vpop.f32.mrf.mxu2 }
 0x1e6   :  { %v356_v63 = vadd.f32 %v9361_v61, %v355_v62  ;;  %v6169_v61 = vor.u32 %v8720_v55, %v6168_v53  ;;  %v6045_v62 = vor.u32 %v8686_v56, %v6042_v57  ;;  %v8699_v53 = vld [vmem:[#allocation14 + $0xec] sm:$0xf]  ;;  %v6105_v56 = vor.u32 %v8704_v40, %v6104_v39  ;;  %v6032_v39 = vld [vmem:[#allocation14 + $0x68] sm:$0xf]  ;;  %v8685_v40 = vld [vmem:[#allocation14 + $0x74] sm:$0xf0] }
 0x1e7   :  { %v5981_v57 = vor.u32 %v8670_v43, %v5978_v44  ;;  %v8717_v43 = vld [vmem:[#allocation14 + $0x174] sm:$0xf0]  ;;  %v8683_v44 = vld [vmem:[#allocation14 + $0x6c] sm:$0xf] }
 0x1e8   :  { %vm359_vm6 = vcmp.gt.f32.partialorder %v356_v63, 0.0  ;;  %v360_v0 = vmul.f32 0.01, %v356_v63  ;;  %966 = vmatpush.bf16.msrb.mxu3 %v6169_v61  ;;  %979 = vmatpush.bf16.msrb.mxu0 %v6045_v62  ;;  %v6109_v61 = vor.u32 %v8702_v45, %v6106_v46  ;;  %v6097_v62 = vor.u32 %v8701_v48, %v6096_v47  ;;  %v6034_v45 = vld [vmem:[#allocation14 + $0x78] sm:$0xf0] }
 0x1e9   :  { %v6037_v47 = vor.u32 %v8683_v44, %v6034_v45  ;;  %v8715_v48 = vld [vmem:[#allocation14 + $0x16c] sm:$0xf]  ;;  %v6680_v45 = vld [vmem:[#allocation16 + $0x380] sm:$0xf] }
 0x1ea   :  { %v361_v1 = vsel %vm359_vm6, %v356_v63, %v360_v0  ;;  %v6024_v63 = vld [vmem:[#allocation14 + $0x60] sm:$0xf]  ;;  %v8684_v0 = vld [vmem:[#allocation14 + $0x6c] sm:$0xf0] }
 0x1eb   :  { %v371_v2 = vpack.c.bf16 %v361_v1, %v361_v1  ;;  %v6152_v1 = vld [vmem:[#allocation14 + $0x160] sm:$0xf]  ;;  %v6025_v8 = vor.u32 %v8684_v0, %v6024_v63  ;;  %v6225_v63 = vor.u32 %v8733_v52, %v6224_v51  ;;  %v6101_v0 = vor.u32 %v8699_v53, %v6098_v54  ;;  %v8681_v52 = vld [vmem:[#allocation14 + $0x54] sm:$0xf0]  ;;  %v6144_v53 = vld [vmem:[#allocation14 + $0x148] sm:$0xf] }
 0x1ec   :  { %980 = vmatpush.bf16.msrb.mxu0 %v6029_v10  ;;  %v6210_v10 = vld [vmem:[#allocation14 + $0x1d8] sm:$0xf0]  ;;  %v8713_v54 = vld [vmem:[#allocation14 + $0x154] sm:$0xf0] }
 0x1ed   :  { %v357_v3 = vpop.f32.mrf.mxu2  ;;  %5909 = vmatmul.msk.bf16.vlgmr.msra.gmra.mxu3 %vm399_vm7, %v371_v2  ;;  %v6173_v2 = vor.u32 %v8718_v58, %v6170_v59  ;;  %954 = vmatpush.bf16.msra.mxu2 %v6025_v8  ;;  %v8731_v58 = vld [vmem:[#allocation14 + $0x1ec] sm:$0xf]  ;;  %v6226_v59 = vld [vmem:[#allocation14 + $0x1f8] sm:$0xf0] }
 0x1ee   :  { %v8716_v3 = vld [vmem:[#allocation14 + $0x16c] sm:$0xf0]  ;;  %v6229_v5 = vor.u32 %v8731_v58, %v6226_v59  ;;  %v6082_v8 = vld [vmem:[#allocation14 + $0xd8] sm:$0xf0]  ;;  %v8711_v59 = vld [vmem:[#allocation14 + $0x14c] sm:$0xf] }
 0x1ef   :  { %v6153_v9 = vor.u32 %v8716_v3, %v6152_v1  ;;  %992 = vmatpush.bf16.msra.mxu1 %v6173_v2  ;;  %v6080_v1 = vld [vmem:[#allocation14 + $0xc8] sm:$0xf]  ;;  %v8697_v2 = vld [vmem:[#allocation14 + $0xd4] sm:$0xf0]  ;;  %v6085_v13 = vor.u32 %v8695_v7, %v6082_v8  ;;  %v6018_v58 = vld [vmem:[#allocation14 + $0x58] sm:$0xf0] }
 0x1f0   :  { %981 = vmatpush.bf16.msrb.mxu0 %v6013_v23  ;;  %v6208_v3 = vld [vmem:[#allocation14 + $0x1c8] sm:$0xf]  ;;  %v6081_v11 = vor.u32 %v8697_v2, %v6080_v1  ;;  %v8723_v23 = vld [vmem:[#allocation14 + $0x1ac] sm:$0xf]  ;;  %v8709_v2 = vld [vmem:[#allocation14 + $0x134] sm:$0xf0] }
 0x1f1   :  { %967 = vmatpush.bf16.msrb.mxu3 %v6153_v9  ;;  %955 = vmatpush.bf16.msra.mxu2 %v6009_v21  ;;  %v8727_v9 = vld [vmem:[#allocation14 + $0x1cc] sm:$0xf]  ;;  %v6209_v12 = vor.u32 %v8729_v6, %v6208_v3  ;;  %v6193_v21 = vor.u32 %v8725_v19, %v6192_v17  ;;  %v6197_v26 = vor.u32 %v8723_v23, %v6194_v24  ;;  %v6128_v1 = vld [vmem:[#allocation14 + $0x128] sm:$0xf]  ;;  %v6130_v7 = vld [vmem:[#allocation14 + $0x138] sm:$0xf0] }
 0x1f2   :  { %v8675_v3 = vld [vmem:[#allocation14 + $0x2c] sm:$0xf]  ;;  %v6129_v8 = vor.u32 %v8709_v2, %v6128_v1  ;;  %v435_v23 = vld [vmem:[#allocation13] sm:$0x3]  ;;  %v7160_v1 = vld [vmem:[#allocation16 + $0x740] sm:$0xf] }
 0x1f3   :  { %993 = vmatpush.bf16.msra.mxu1 %v6157_v14  ;;  %v6213_v14 = vor.u32 %v8727_v9, %v6210_v10  ;;  %v8707_v6 = vld [vmem:[#allocation14 + $0x12c] sm:$0xf]  ;;  %v5984_v10 = vld [vmem:[#allocation14 + $0x8] sm:$0xf]  ;;  %v438_v24 = vperm.slane %v435_v23, 0 }
 0x1f4   :  { %982 = vmatpush.bf16.msrb.mxu0 %v5997_v37  ;;  %v6178_v37 = vld [vmem:[#allocation14 + $0x198] sm:$0xf0]  ;;  %v8703_v17 = vld [vmem:[#allocation14 + $0x10c] sm:$0xf] }
 0x1f5   :  { %968 = vmatpush.bf16.msrb.mxu3 %v6137_v22  ;;  %956 = vmatpush.bf16.msra.mxu2 %v5993_v33  ;;  %v6066_v22 = vld [vmem:[#allocation14 + $0xb8] sm:$0xf0] }
 0x1f6   :  { %v6050_v33 = vld [vmem:[#allocation14 + $0x98] sm:$0xf0] }
 0x1f7   :  { %994 = vmatpush.bf16.msra.mxu1 %v6141_v27  ;;  %v6048_v27 = vld [vmem:[#allocation14 + $0x88] sm:$0xf] }
 0x1f8   :  { %983 = vmatpush.bf16.msrb.mxu0 %v5981_v57  ;;  %v6049_v30 = vor.u32 %v8689_v28, %v6048_v27  ;;  %v8679_v57 = vld [vmem:[#allocation14 + $0x4c] sm:$0xf] }
 0x1f9   :  { %969 = vmatpush.bf16.msrb.mxu3 %v6121_v36  ;;  %957 = vmatpush.bf16.msra.mxu2 %v5977_v50  ;;  %v8719_v36 = vld [vmem:[#allocation14 + $0x18c] sm:$0xf]  ;;  %v6016_v50 = vld [vmem:[#allocation14 + $0x48] sm:$0xf] }
 0x1fa   :  { %v6181_v38 = vor.u32 %v8719_v36, %v6178_v37  ;;  %v8986_v37 = vld [vmem:[#allocation16 + $0x7dc] sm:$0xf0] }
 0x1fb   :  { %995 = vmatpush.bf16.msra.mxu1 %v6125_v42  ;;  %v6033_v42 = vor.u32 %v8685_v40, %v6032_v39  ;;  %v8922_v39 = vld [vmem:[#allocation16 + $0x5dc] sm:$0xf0] }
 0x1fd   :  { %970 = vmatpush.bf16.msrb.mxu3 %v6105_v56  ;;  %1002 = vmatpush.bf16.msrb.mxu2 %v6097_v62  ;;  %v6145_v56 = vor.u32 %v8713_v54, %v6144_v53  ;;  %v6000_v62 = vld [vmem:[#allocation14 + $0x28] sm:$0xf] }
 0x1ff   :  { %996 = vmatpush.bf16.msra.mxu1 %v6109_v61  ;;  %v6146_v61 = vld [vmem:[#allocation14 + $0x158] sm:$0xf0] }
 0x201   :  { %1015 = vmatpush.bf16.msra.mxu3 %v6225_v63  ;;  %1003 = vmatpush.bf16.msrb.mxu2 %v6081_v11  ;;  %v8677_v63 = vld [vmem:[#allocation14 + $0x34] sm:$0xf0] }
 0x202   :  { %v8673_v11 = vld [vmem:[#allocation14 + $0x14] sm:$0xf0] }
 0x203   :  { %v5985_v19 = vor.u32 %v8673_v11, %v5984_v10  ;;  %v6360_v10 = vld [vmem:[#allocation16 + $0x100] sm:$0xf] }
 0x204   :  { %v8770_v11 = vld [vmem:[#allocation16 + $0x11c] sm:$0xf0] }
 0x205   :  { %1016 = vmatpush.bf16.msra.mxu3 %v6209_v12  ;;  %1004 = vmatpush.bf16.msrb.mxu2 %v6065_v18  ;;  %v6112_v12 = vld [vmem:[#allocation14 + $0x108] sm:$0xf]  ;;  %v6114_v18 = vld [vmem:[#allocation14 + $0x118] sm:$0xf0] }
 0x209   :  { %1017 = vmatpush.bf16.msra.mxu3 %v6193_v21  ;;  %1005 = vmatpush.bf16.msrb.mxu2 %v6049_v30  ;;  %v5989_v21 = vor.u32 %v8671_v15, %v5986_v16  ;;  %v6712_v30 = vld [vmem:[#allocation16 + $0x3c0] sm:$0xf] }
 0x20a   :  { %v6713_v44 = vor.u32 %v8858_v31, %v6712_v30  ;;  %v8962_v15 = vld [vmem:[#allocation16 + $0x71c] sm:$0xf0] }
 0x20b   :  { %v6872_v16 = vld [vmem:[#allocation16 + $0x500] sm:$0xf] }
 0x20c   :  { %v6552_v31 = vld [vmem:[#allocation16 + $0x280] sm:$0xf] }
 0x20d   :  { %1018 = vmatpush.bf16.msra.mxu3 %v6177_v34  ;;  %1006 = vmatpush.bf16.msrb.mxu2 %v6033_v42  ;;  %v7224_v34 = vld [vmem:[#allocation16 + $0x7c0] sm:$0xf] }
 0x270   :  { %v412_v35 = vpop.f32.mrf.mxu3 }
 0x271   :  { %v413_v41 = vadd.f32 %v9362_v20, %v412_v35  ;;  %v8691_v20 = vld [vmem:[#allocation14 + $0xac] sm:$0xf]  ;;  %v6053_v35 = vor.u32 %v8687_v32, %v6050_v33  ;;  %v6456_v32 = vld [vmem:[#allocation16 + $0x1c0] sm:$0xf] }
 0x272   :  { %v6069_v25 = vor.u32 %v8691_v20, %v6066_v22  ;;  %v6117_v22 = vor.u32 %v8703_v17, %v6114_v18  ;;  %v8794_v33 = vld [vmem:[#allocation16 + $0x1dc] sm:$0xf0] }
 0x273   :  { %v417_v49 = vmul.f32 0.01, %v413_v41  ;;  %vm416_vm8 = vcmp.gt.f32.partialorder %v413_v41, 0.0  ;;  %v8898_v17 = vld [vmem:[#allocation16 + $0x51c] sm:$0xf0] }
 0x275   :  { %v418_v55 = vsel %vm416_vm8, %v413_v41, %v417_v49  ;;  %v6160_v41 = vld [vmem:[#allocation14 + $0x168] sm:$0xf]  ;;  %v6162_v49 = vld [vmem:[#allocation14 + $0x178] sm:$0xf0] }
 0x276   :  { %v436_v60 = vpack.c.bf16 %v418_v55, %v418_v55  ;;  %v6161_v46 = vor.u32 %v8717_v43, %v6160_v41  ;;  %v6165_v51 = vor.u32 %v8715_v48, %v6162_v49  ;;  %v6017_v55 = vor.u32 %v8681_v52, %v6016_v50  ;;  %v6424_v48 = vld [vmem:[#allocation16 + $0x180] sm:$0xf] }
 0x277   :  { %v8786_v49 = vld [vmem:[#allocation16 + $0x19c] sm:$0xf0]  ;;  %v7225_v50 = vor.u32 %v8986_v37, %v7224_v34 }
 0x278   :  { %v414_v4 = vpop.f32.mrf.mxu3  ;;  %530 = vmatmul.bf16.vlgmr.msra.gmra.mxu0 %v436_v60  ;;  %543 = vmatmul.bf16.vlgmr.msrb.gmra.mxu1 %v436_v60  ;;  %v6021_v60 = vor.u32 %v8679_v57, %v6018_v58  ;;  %v8914_v57 = vld [vmem:[#allocation16 + $0x59c] sm:$0xf0] }
 0x279   :  { %1028 = vmatpush.bf16.msra.mxu0 %v6101_v0  ;;  %1041 = vmatpush.bf16.msrb.mxu1 %v6229_v5  ;;  %v6149_v0 = vor.u32 %v8711_v59, %v6146_v61  ;;  %v6001_v4 = vor.u32 %v8677_v63, %v6000_v62  ;;  %v6002_v5 = vld [vmem:[#allocation14 + $0x38] sm:$0xf0]  ;;  %v6648_v59 = vld [vmem:[#allocation16 + $0x340] sm:$0xf]  ;;  %v6425_v61 = vor.u32 %v8786_v49, %v6424_v48 }
 0x27a   :  { %1019 = vmatpush.bf16.msra.mxu3 %v6161_v46  ;;  %1007 = vmatpush.bf16.msrb.mxu2 %v6017_v55  ;;  %v6005_v9 = vor.u32 %v8675_v3, %v6002_v5  ;;  %v8850_v46 = vld [vmem:[#allocation16 + $0x39c] sm:$0xf0] }
 0x27b   :  { %v8978_v55 = vld [vmem:[#allocation16 + $0x79c] sm:$0xf0]  ;;  %v6681_v58 = vor.u32 %v8850_v46, %v6680_v45 }
 0x27c   :  { %v6392_v62 = vld [vmem:[#allocation16 + $0x140] sm:$0xf] }
 0x27d   :  { %1029 = vmatpush.bf16.msra.mxu0 %v6085_v13  ;;  %1042 = vmatpush.bf16.msrb.mxu1 %v6213_v14  ;;  %v6133_v13 = vor.u32 %v8707_v6, %v6130_v7  ;;  %v8705_v14 = vld [vmem:[#allocation14 + $0x114] sm:$0xf0]  ;;  %v8778_v63 = vld [vmem:[#allocation16 + $0x15c] sm:$0xf0] }
 0x27e   :  { %1020 = vmatpush.bf16.msra.mxu3 %v6145_v56  ;;  %1008 = vmatpush.bf16.msrb.mxu2 %v6001_v4  ;;  %v6113_v20 = vor.u32 %v8705_v14, %v6112_v12  ;;  %v6936_v56 = vld [vmem:[#allocation16 + $0x580] sm:$0xf] }
 0x27f   :  { %v6937_v2 = vor.u32 %v8914_v57, %v6936_v56  ;;  %v8970_v3 = vld [vmem:[#allocation16 + $0x75c] sm:$0xf0] }
 0x280   :  { %v6904_v4 = vld [vmem:[#allocation16 + $0x540] sm:$0xf]  ;;  %v7161_v12 = vor.u32 %v8970_v3, %v7160_v1  ;;  %v6458_v1 = vld [vmem:[#allocation16 + $0x1e0] sm:$0xf0] }
 0x281   :  { %1030 = vmatpush.bf16.msra.mxu0 %v6069_v25  ;;  %1043 = vmatpush.bf16.msrb.mxu1 %v6197_v26  ;;  %v439_v25 = vperm.slane %v435_v23, 1  ;;  %v8906_v5 = vld [vmem:[#allocation16 + $0x55c] sm:$0xf0] }
 0x282   :  { %1021 = vmatpush.bf16.msra.mxu3 %v6129_v8  ;;  %1009 = vmatpush.bf16.msrb.mxu2 %v5985_v19  ;;  %v6616_v7 = vld [vmem:[#allocation16 + $0x300] sm:$0xf]  ;;  %v6905_v14 = vor.u32 %v8906_v5, %v6904_v4 }
 0x283   :  { %v8834_v8 = vld [vmem:[#allocation16 + $0x31c] sm:$0xf0] }
 0x284   :  { %v6617_v18 = vor.u32 %v8834_v8, %v6616_v7  ;;  %v6584_v19 = vld [vmem:[#allocation16 + $0x2c0] sm:$0xf]  ;;  %v7226_v7 = vld [vmem:[#allocation16 + $0x7e0] sm:$0xf0] }
 0x285   :  { %1031 = vmatpush.bf16.msra.mxu0 %v6053_v35  ;;  %1044 = vmatpush.bf16.msrb.mxu1 %v6181_v38  ;;  %v6968_v38 = vld [vmem:[#allocation16 + $0x5c0] sm:$0xf] }
 0x286   :  { %1022 = vmatpush.bf16.msra.mxu3 %v6113_v20  ;;  %v6969_v52 = vor.u32 %v8922_v39, %v6968_v38  ;;  %v8826_v20 = vld [vmem:[#allocation16 + $0x2dc] sm:$0xf0] }
 0x287   :  { %v8762_v23 = vld [vmem:[#allocation16 + $0xdc] sm:$0xf0]  ;;  %v6585_v30 = vor.u32 %v8826_v20, %v6584_v19  ;;  %v6650_v19 = vld [vmem:[#allocation16 + $0x360] sm:$0xf0] }
 0x288   :  { %v6296_v34 = vld [vmem:[#allocation16 + $0x80] sm:$0xf]  ;;  %v8774_v20 = vld [vmem:[#allocation16 + $0x144] sm:$0xf] }
 0x289   :  { %1032 = vmatpush.bf16.msra.mxu0 %v6037_v47  ;;  %1045 = vmatpush.bf16.msrb.mxu1 %v6165_v51  ;;  %v6457_v47 = vor.u32 %v8794_v33, %v6456_v32  ;;  %v7192_v51 = vld [vmem:[#allocation16 + $0x780] sm:$0xf] }
 0x28a   :  { %v8818_v32 = vld [vmem:[#allocation16 + $0x29c] sm:$0xf0] }
 0x28b   :  { %v7064_v37 = vld [vmem:[#allocation16 + $0x680] sm:$0xf] }
 0x28c   :  { %v8946_v39 = vld [vmem:[#allocation16 + $0x69c] sm:$0xf0] }
 0x28d   :  { %1033 = vmatpush.bf16.msra.mxu0 %v6021_v60  ;;  %1046 = vmatpush.bf16.msrb.mxu1 %v6149_v0  ;;  %v8842_v60 = vld [vmem:[#allocation16 + $0x35c] sm:$0xf0]  ;;  %v7193_v0 = vor.u32 %v8978_v55, %v7192_v51 }
 0x28e   :  { %v6649_v6 = vor.u32 %v8842_v60, %v6648_v59  ;;  %v6520_v45 = vld [vmem:[#allocation16 + $0x240] sm:$0xf] }
 0x28f   :  { %v8810_v46 = vld [vmem:[#allocation16 + $0x25c] sm:$0xf0] }
 0x290   :  { %v6264_v48 = vld [vmem:[#allocation16 + $0x40] sm:$0xf] }
 0x291   :  { %1034 = vmatpush.bf16.msra.mxu0 %v6005_v9  ;;  %1047 = vmatpush.bf16.msrb.mxu1 %v6133_v13  ;;  %v6393_v9 = vor.u32 %v8778_v63, %v6392_v62  ;;  %v7128_v13 = vld [vmem:[#allocation16 + $0x700] sm:$0xf]  ;;  %v6714_v63 = vld [vmem:[#allocation16 + $0x3e0] sm:$0xf0] }
 0x292   :  { %v8746_v49 = vld [vmem:[#allocation16 + $0x5c] sm:$0xf0] }
 0x293   :  { %v7032_v51 = vld [vmem:[#allocation16 + $0x640] sm:$0xf]  ;;  %v6265_v57 = vor.u32 %v8746_v49, %v6264_v48  ;;  %v6970_v48 = vld [vmem:[#allocation16 + $0x5e0] sm:$0xf0] }
 0x294   :  { %v8874_v55 = vld [vmem:[#allocation16 + $0x45c] sm:$0xf0] }
 0x295   :  { %1035 = vmatpush.bf16.msra.mxu0 %v5989_v21  ;;  %1048 = vmatpush.bf16.msrb.mxu1 %v6117_v22  ;;  %v6361_v21 = vor.u32 %v8770_v11, %v6360_v10  ;;  %v6328_v22 = vld [vmem:[#allocation16 + $0xc0] sm:$0xf]  ;;  %v6682_v11 = vld [vmem:[#allocation16 + $0x3a0] sm:$0xf0] }
 0x296   :  { %v6329_v33 = vor.u32 %v8762_v23, %v6328_v22  ;;  %v8802_v56 = vld [vmem:[#allocation16 + $0x21c] sm:$0xf0]  ;;  %v8830_v23 = vld [vmem:[#allocation16 + $0x304] sm:$0xf] }
 0x297   :  { %v6232_v59 = vld [vmem:[#allocation16] sm:$0xf] }
 0x298   :  { %v8738_v60 = vld [vmem:[#allocation16 + $0x1c] sm:$0xf0] }
 0x299   :  { %v8930_v3 = vld [vmem:[#allocation16 + $0x61c] sm:$0xf0]  ;;  %v6233_v5 = vor.u32 %v8738_v60, %v6232_v59  ;;  %v8798_v60 = vld [vmem:[#allocation16 + $0x204] sm:$0xf] }
 0x2f5   :  { %v531_v26 = vpop.f32.mrf.mxu0  ;;  %v544_v27 = vpop.f32.mrf.mxu1 }
 0x2f6   :  { %v532_v28 = vadd.f32 %v531_v26, %v438_v24  ;;  %v545_v29 = vadd.f32 %v544_v27, %v439_v25  ;;  %v7129_v24 = vor.u32 %v8962_v15, %v7128_v13  ;;  %v7096_v25 = vld [vmem:[#allocation16 + $0x6c0] sm:$0xf]  ;;  %v6873_v26 = vor.u32 %v8898_v17, %v6872_v16  ;;  %v6426_v13 = vld [vmem:[#allocation16 + $0x1a0] sm:$0xf0] }
 0x2f7   :  { %v8954_v27 = vld [vmem:[#allocation16 + $0x6dc] sm:$0xf0]  ;;  %v8838_v17 = vld [vmem:[#allocation16 + $0x344] sm:$0xf] }
 0x2f8   :  { %vm548_vm9 = vcmp.gt.f32.partialorder %v532_v28, 0.0  ;;  %v550_v35 = vmul.f32 0.01, %v532_v28  ;;  %vm549_vm10 = vcmp.gt.f32.partialorder %v545_v29, 0.0  ;;  %v551_v36 = vmul.f32 0.01, %v545_v29 }
 0x2f9   :  { %v6653_v22 = vor.u32 %v8838_v17, %v6650_v19  ;;  %v8942_v17 = vld [vmem:[#allocation16 + $0x684] sm:$0xf] }
 0x2fa   :  { %v552_v40 = vsel %vm548_vm9, %v532_v28, %v550_v35  ;;  %v553_v41 = vsel %vm549_vm10, %v545_v29, %v551_v36  ;;  %v6840_v28 = vld [vmem:[#allocation16 + $0x4c0] sm:$0xf]  ;;  %v7097_v36 = vor.u32 %v8954_v27, %v7096_v25  ;;  %v6618_v25 = vld [vmem:[#allocation16 + $0x320] sm:$0xf0] }
 0x2fb   :  { %v9914_v42 = vpack.c.bf16 %v552_v40, %v552_v40  ;;  %v9916_v43 = vpack.c.bf16 %v553_v41, %v553_v41  ;;  %v8890_v29 = vld [vmem:[#allocation16 + $0x4dc] sm:$0xf0]  ;;  %v6362_v27 = vld [vmem:[#allocation16 + $0x120] sm:$0xf0] }
 0x2fc   :  { %v8754_v35 = vld [vmem:[#allocation16 + $0x9c] sm:$0xf0]  ;;  %v6841_v38 = vor.u32 %v8890_v29, %v6840_v28  ;;  %v6621_v28 = vor.u32 %v8830_v23, %v6618_v25  ;;  %v8934_v23 = vld [vmem:[#allocation16 + $0x644] sm:$0xf] }
 0x2fd   :  { %v533_v53 = vpop.f32.mrf.mxu0  ;;  %v546_v54 = vpop.f32.mrf.mxu1  ;;  %958 = vmatmul.bf16.vlgmr.msra.gmra.mxu2 %v9914_v42  ;;  %971 = vmatmul.bf16.vlgmr.msrb.gmra.mxu3 %v9916_v43  ;;  %v6808_v40 = vld [vmem:[#allocation16 + $0x480] sm:$0xf] }
 0x2fe   :  { %984 = vmatmul.bf16.vlgmr.msrb.gmra.mxu0 %v9914_v42  ;;  %997 = vmatmul.bf16.vlgmr.msra.gmra.mxu1 %v9916_v43  ;;  %v8882_v41 = vld [vmem:[#allocation16 + $0x49c] sm:$0xf0] }
 0x2ff   :  { %2637 = vmatpush.bf16.msrb.mxu3 %v6713_v44  ;;  %2624 = vmatpush.bf16.msra.mxu2 %v6457_v47  ;;  %v6553_v44 = vor.u32 %v8818_v32, %v6552_v31  ;;  %v6297_v47 = vor.u32 %v8754_v35, %v6296_v34  ;;  %v8938_v53 = vld [vmem:[#allocation16 + $0x65c] sm:$0xf0]  ;;  %v6586_v31 = vld [vmem:[#allocation16 + $0x2e0] sm:$0xf0] }
 0x300   :  { %2663 = vmatpush.bf16.msra.mxu1 %v7225_v50  ;;  %2650 = vmatpush.bf16.msrb.mxu0 %v6969_v52  ;;  %v7065_v50 = vor.u32 %v8946_v39, %v7064_v37  ;;  %v6809_v52 = vor.u32 %v8882_v41, %v6808_v40  ;;  %v6776_v54 = vld [vmem:[#allocation16 + $0x440] sm:$0xf]  ;;  %v6554_v34 = vld [vmem:[#allocation16 + $0x2a0] sm:$0xf0] }
 0x301   :  { %v6777_v62 = vor.u32 %v8874_v55, %v6776_v54  ;;  %v8974_v35 = vld [vmem:[#allocation16 + $0x784] sm:$0xf]  ;;  %v8866_v39 = vld [vmem:[#allocation16 + $0x41c] sm:$0xf0] }
 0x302   :  { %v7194_v37 = vld [vmem:[#allocation16 + $0x7a0] sm:$0xf0] }
 0x303   :  { %2638 = vmatpush.bf16.msrb.mxu3 %v6681_v58  ;;  %2625 = vmatpush.bf16.msra.mxu2 %v6425_v61  ;;  %v8854_v58 = vld [vmem:[#allocation16 + $0x3c4] sm:$0xf]  ;;  %v7033_v61 = vor.u32 %v8938_v53, %v7032_v51  ;;  %v7197_v40 = vor.u32 %v8974_v35, %v7194_v37 }
 0x304   :  { %2664 = vmatpush.bf16.msra.mxu1 %v7193_v0  ;;  %2651 = vmatpush.bf16.msrb.mxu0 %v6937_v2  ;;  %v8790_v0 = vld [vmem:[#allocation16 + $0x1c4] sm:$0xf]  ;;  %v7000_v2 = vld [vmem:[#allocation16 + $0x600] sm:$0xf]  ;;  %v6717_v8 = vor.u32 %v8854_v58, %v6714_v63 }
 0x305   :  { %v6461_v10 = vor.u32 %v8790_v0, %v6458_v1  ;;  %v6522_v51 = vld [vmem:[#allocation16 + $0x260] sm:$0xf0] }
 0x306   :  { %v7162_v54 = vld [vmem:[#allocation16 + $0x760] sm:$0xf0] }
 0x307   :  { %2639 = vmatpush.bf16.msrb.mxu3 %v6649_v6  ;;  %2626 = vmatpush.bf16.msra.mxu2 %v6393_v9  ;;  %v8982_v6 = vld [vmem:[#allocation16 + $0x7c4] sm:$0xf] }
 0x308   :  { %2665 = vmatpush.bf16.msra.mxu1 %v7161_v12  ;;  %2652 = vmatpush.bf16.msrb.mxu0 %v6905_v14  ;;  %v8846_v9 = vld [vmem:[#allocation16 + $0x384] sm:$0xf]  ;;  %v7001_v14 = vor.u32 %v8930_v3, %v7000_v2  ;;  %v7229_v15 = vor.u32 %v8982_v6, %v7226_v7 }
 0x309   :  { %v8782_v12 = vld [vmem:[#allocation16 + $0x184] sm:$0xf]  ;;  %v6685_v16 = vor.u32 %v8846_v9, %v6682_v11 }
 0x30a   :  { %v6938_v58 = vld [vmem:[#allocation16 + $0x5a0] sm:$0xf0] }
 0x30b   :  { %2640 = vmatpush.bf16.msrb.mxu3 %v6617_v18  ;;  %2627 = vmatpush.bf16.msra.mxu2 %v6361_v21  ;;  %v6429_v18 = vor.u32 %v8782_v12, %v6426_v13  ;;  %v6394_v21 = vld [vmem:[#allocation16 + $0x160] sm:$0xf0] }
 0x30c   :  { %2666 = vmatpush.bf16.msra.mxu1 %v7129_v24  ;;  %2653 = vmatpush.bf16.msrb.mxu0 %v6873_v26  ;;  %v6397_v24 = vor.u32 %v8774_v20, %v6394_v21  ;;  %v8766_v26 = vld [vmem:[#allocation16 + $0x104] sm:$0xf] }
 0x30d   :  { %1010 = vmatmul.bf16.vlgmr.msrb.gmra.mxu2 %v9914_v42  ;;  %1023 = vmatmul.bf16.vlgmr.msra.gmra.mxu3 %v9916_v43  ;;  %v6365_v29 = vor.u32 %v8766_v26, %v6362_v27  ;;  %v7130_v0 = vld [vmem:[#allocation16 + $0x720] sm:$0xf0] }
 0x30e   :  { %1036 = vmatmul.bf16.vlgmr.msra.gmra.mxu0 %v9914_v42  ;;  %1049 = vmatmul.bf16.vlgmr.msrb.gmra.mxu1 %v9916_v43  ;;  %v6521_v42 = vor.u32 %v8810_v46, %v6520_v45  ;;  %v6488_v43 = vld [vmem:[#allocation16 + $0x200] sm:$0xf]  ;;  %v6330_v45 = vld [vmem:[#allocation16 + $0xe0] sm:$0xf0] }
 0x30f   :  { %2641 = vmatpush.bf16.msrb.mxu3 %v6585_v30  ;;  %2628 = vmatpush.bf16.msra.mxu2 %v6329_v33  ;;  %v6489_v4 = vor.u32 %v8802_v56, %v6488_v43  ;;  %v8822_v30 = vld [vmem:[#allocation16 + $0x2c4] sm:$0xf] }
 0x310   :  { %2667 = vmatpush.bf16.msra.mxu1 %v7097_v36  ;;  %2654 = vmatpush.bf16.msrb.mxu0 %v6841_v38  ;;  %v6589_v32 = vor.u32 %v8822_v30, %v6586_v31  ;;  %v8814_v33 = vld [vmem:[#allocation16 + $0x284] sm:$0xf]  ;;  %v6744_v38 = vld [vmem:[#allocation16 + $0x400] sm:$0xf] }
 0x311   :  { %v6557_v36 = vor.u32 %v8814_v33, %v6554_v34  ;;  %v6745_v41 = vor.u32 %v8866_v39, %v6744_v38  ;;  %v8918_v46 = vld [vmem:[#allocation16 + $0x5c4] sm:$0xf]  ;;  %v9929_v34 = vld [vmem:[%s10211_s12] sm:$0xf] }
 0x312   :  { %v6973_v49 = vor.u32 %v8918_v46, %v6970_v48  ;;  %v6298_v43 = vld [vmem:[#allocation16 + $0xa0] sm:$0xf0]  ;;  %v8859_v48 = vld [vmem:[#allocation16 + $0x3e4] sm:$0xf0] }
 0x313   :  { %2642 = vmatpush.bf16.msrb.mxu3 %v6553_v44  ;;  %2629 = vmatpush.bf16.msra.mxu2 %v6297_v47  ;;  %v8758_v44 = vld [vmem:[#allocation16 + $0xc4] sm:$0xf] }
 0x314   :  { %2668 = vmatpush.bf16.msra.mxu1 %v7065_v50  ;;  %2655 = vmatpush.bf16.msrb.mxu0 %v6809_v52  ;;  %v6333_v47 = vor.u32 %v8758_v44, %v6330_v45  ;;  %v8806_v50 = vld [vmem:[#allocation16 + $0x244] sm:$0xf]  ;;  %v622_v45 = vperm.slane %v9929_v34, 0 }
 0x315   :  { %v8966_v52 = vld [vmem:[#allocation16 + $0x744] sm:$0xf]  ;;  %v6525_v53 = vor.u32 %v8806_v50, %v6522_v51 }
 0x316   :  { %v7165_v55 = vor.u32 %v8966_v52, %v7162_v54  ;;  %v8910_v56 = vld [vmem:[#allocation16 + $0x584] sm:$0xf] }
 0x317   :  { %2643 = vmatpush.bf16.msrb.mxu3 %v6521_v42  ;;  %2630 = vmatpush.bf16.msra.mxu2 %v6265_v57  ;;  %v8750_v42 = vld [vmem:[#allocation16 + $0x84] sm:$0xf]  ;;  %v6941_v59 = vor.u32 %v8910_v56, %v6938_v58  ;;  %v8851_v58 = vld [vmem:[#allocation16 + $0x3a4] sm:$0xf0] }
 0x318   :  { %2669 = vmatpush.bf16.msra.mxu1 %v7033_v61  ;;  %2656 = vmatpush.bf16.msrb.mxu0 %v6777_v62  ;;  %v6301_v57 = vor.u32 %v8750_v42, %v6298_v43  ;;  %v6490_v61 = vld [vmem:[#allocation16 + $0x220] sm:$0xf0] }
 0x319   :  { %v8958_v62 = vld [vmem:[#allocation16 + $0x704] sm:$0xf]  ;;  %v6493_v63 = vor.u32 %v8798_v60, %v6490_v61  ;;  %v8795_v60 = vld [vmem:[#allocation16 + $0x1e4] sm:$0xf0] }
 0x31a   :  { %v7133_v1 = vor.u32 %v8958_v62, %v7130_v0  ;;  %v8742_v2 = vld [vmem:[#allocation16 + $0x44] sm:$0xf] }
 0x31b   :  { %2644 = vmatpush.bf16.msrb.mxu3 %v6489_v4  ;;  %2631 = vmatpush.bf16.msra.mxu2 %v6233_v5  ;;  %v6266_v3 = vld [vmem:[#allocation16 + $0x60] sm:$0xf0] }
 0x31c   :  { %2670 = vmatpush.bf16.msra.mxu1 %v7001_v14  ;;  %2657 = vmatpush.bf16.msrb.mxu0 %v6745_v41  ;;  %v8902_v4 = vld [vmem:[#allocation16 + $0x544] sm:$0xf]  ;;  %v6269_v5 = vor.u32 %v8742_v2, %v6266_v3  ;;  %v8843_v2 = vld [vmem:[#allocation16 + $0x364] sm:$0xf0] }
 0x31d   :  { %v6906_v6 = vld [vmem:[#allocation16 + $0x560] sm:$0xf0] }
 0x31e   :  { %v6909_v7 = vor.u32 %v8902_v4, %v6906_v6  ;;  %v7098_v9 = vld [vmem:[#allocation16 + $0x6e0] sm:$0xf0]  ;;  %v625_v6 = vperm.slane %v9929_v34, 3 }
 0x31f   :  { %2689 = vmatpush.bf16.msra.mxu3 %v6717_v8  ;;  %2676 = vmatpush.bf16.msrb.mxu2 %v6461_v10  ;;  %v8950_v8 = vld [vmem:[#allocation16 + $0x6c4] sm:$0xf] }
 0x320   :  { %2715 = vmatpush.bf16.msrb.mxu1 %v7229_v15  ;;  %2702 = vmatpush.bf16.msra.mxu0 %v6973_v49  ;;  %v7101_v10 = vor.u32 %v8950_v8, %v7098_v9  ;;  %v8734_v11 = vld [vmem:[#allocation16 + $0x4] sm:$0xf]  ;;  %v8787_v8 = vld [vmem:[#allocation16 + $0x1a4] sm:$0xf0] }
 0x321   :  { %v6234_v12 = vld [vmem:[#allocation16 + $0x20] sm:$0xf0] }
 0x322   :  { %v8894_v13 = vld [vmem:[#allocation16 + $0x504] sm:$0xf]  ;;  %v6237_v14 = vor.u32 %v8734_v11, %v6234_v12 }
 0x323   :  { %2690 = vmatpush.bf16.msra.mxu3 %v6685_v16  ;;  %2677 = vmatpush.bf16.msrb.mxu2 %v6429_v18  ;;  %v6874_v15 = vld [vmem:[#allocation16 + $0x520] sm:$0xf0] }
 0x324   :  { %2716 = vmatpush.bf16.msrb.mxu1 %v7197_v40  ;;  %2703 = vmatpush.bf16.msra.mxu0 %v6941_v59  ;;  %v6877_v16 = vor.u32 %v8894_v13, %v6874_v15  ;;  %v7066_v18 = vld [vmem:[#allocation16 + $0x6a0] sm:$0xf0]  ;;  %v6464_v59 = vld [vmem:[#allocation16 + $0x1c8] sm:$0xf] }
 0x325   :  { %v7069_v19 = vor.u32 %v8942_v17, %v7066_v18  ;;  %v8886_v20 = vld [vmem:[#allocation16 + $0x4c4] sm:$0xf]  ;;  %v6465_v0 = vor.u32 %v8795_v60, %v6464_v59  ;;  %v6624_v13 = vld [vmem:[#allocation16 + $0x308] sm:$0xf]  ;;  %v624_v18 = vperm.slane %v9929_v34, 2 }
 0x326   :  { %v6842_v21 = vld [vmem:[#allocation16 + $0x4e0] sm:$0xf0]  ;;  %v8779_v17 = vld [vmem:[#allocation16 + $0x164] sm:$0xf0] }
 0x327   :  { %2691 = vmatpush.bf16.msra.mxu3 %v6653_v22  ;;  %2678 = vmatpush.bf16.msrb.mxu2 %v6397_v24  ;;  %v6845_v22 = vor.u32 %v8886_v20, %v6842_v21  ;;  %v7034_v24 = vld [vmem:[#allocation16 + $0x660] sm:$0xf0]  ;;  %v6592_v21 = vld [vmem:[#allocation16 + $0x2c8] sm:$0xf] }
 0x328   :  { %2717 = vmatpush.bf16.msrb.mxu1 %v7165_v55  ;;  %2704 = vmatpush.bf16.msra.mxu0 %v6909_v7  ;;  %v7037_v25 = vor.u32 %v8934_v23, %v7034_v24  ;;  %v8878_v26 = vld [vmem:[#allocation16 + $0x484] sm:$0xf]  ;;  %v6432_v7 = vld [vmem:[#allocation16 + $0x188] sm:$0xf] }
 0x329   :  { %v6810_v27 = vld [vmem:[#allocation16 + $0x4a0] sm:$0xf0]  ;;  %v6433_v12 = vor.u32 %v8787_v8, %v6432_v7  ;;  %v7232_v24 = vld [vmem:[#allocation16 + $0x7c8] sm:$0xf] }
 0x32a   :  { %v7002_v30 = vld [vmem:[#allocation16 + $0x620] sm:$0xf0]  ;;  %v7136_v7 = vld [vmem:[#allocation16 + $0x708] sm:$0xf] }
 0x32b   :  { %2692 = vmatpush.bf16.msra.mxu3 %v6621_v28  ;;  %2679 = vmatpush.bf16.msrb.mxu2 %v6365_v29  ;;  %v6813_v28 = vor.u32 %v8878_v26, %v6810_v27  ;;  %v8926_v29 = vld [vmem:[#allocation16 + $0x604] sm:$0xf]  ;;  %v6368_v26 = vld [vmem:[#allocation16 + $0x108] sm:$0xf] }
 0x32c   :  { %2718 = vmatpush.bf16.msrb.mxu1 %v7133_v1  ;;  %2705 = vmatpush.bf16.msra.mxu0 %v6877_v16  ;;  %v7005_v31 = vor.u32 %v8926_v29, %v7002_v30  ;;  %v6778_v33 = vld [vmem:[#allocation16 + $0x460] sm:$0xf0]  ;;  %v6656_v1 = vld [vmem:[#allocation16 + $0x348] sm:$0xf] }
 0x32d   :  { %v8862_v37 = vld [vmem:[#allocation16 + $0x404] sm:$0xf]  ;;  %v6657_v9 = vor.u32 %v8843_v2, %v6656_v1  ;;  %v6400_v16 = vld [vmem:[#allocation16 + $0x148] sm:$0xf] }
 0x32e   :  { %v6746_v38 = vld [vmem:[#allocation16 + $0x420] sm:$0xf0]  ;;  %v6401_v23 = vor.u32 %v8779_v17, %v6400_v16  ;;  %v8771_v30 = vld [vmem:[#allocation16 + $0x124] sm:$0xf0] }
 0x32f   :  { %2693 = vmatpush.bf16.msra.mxu3 %v6589_v32  ;;  %2680 = vmatpush.bf16.msrb.mxu2 %v6333_v47  ;;  %v8870_v32 = vld [vmem:[#allocation16 + $0x444] sm:$0xf]  ;;  %v6749_v39 = vor.u32 %v8862_v37, %v6746_v38  ;;  %v6720_v47 = vld [vmem:[#allocation16 + $0x3c8] sm:$0xf] }
 0x330   :  { %2719 = vmatpush.bf16.msrb.mxu1 %v7101_v10  ;;  %2706 = vmatpush.bf16.msra.mxu0 %v6845_v22  ;;  %v6781_v35 = vor.u32 %v8870_v32, %v6778_v33  ;;  %v6721_v54 = vor.u32 %v8859_v48, %v6720_v47  ;;  %v8827_v22 = vld [vmem:[#allocation16 + $0x2e4] sm:$0xf0] }
 0x331   :  { %v6593_v33 = vor.u32 %v8827_v22, %v6592_v21  ;;  %v8763_v47 = vld [vmem:[#allocation16 + $0xe4] sm:$0xf0] }
 0x332   :  { %v6976_v48 = vld [vmem:[#allocation16 + $0x5c8] sm:$0xf] }
 0x333   :  { %2694 = vmatpush.bf16.msra.mxu3 %v6557_v36  ;;  %2681 = vmatpush.bf16.msrb.mxu2 %v6301_v57  ;;  %v623_v36 = vperm.slane %v9929_v34, 1  ;;  %v6688_v57 = vld [vmem:[#allocation16 + $0x388] sm:$0xf] }
 0x334   :  { %2720 = vmatpush.bf16.msrb.mxu1 %v7069_v19  ;;  %2707 = vmatpush.bf16.msra.mxu0 %v6813_v28  ;;  %v6689_v62 = vor.u32 %v8851_v58, %v6688_v57  ;;  %v8915_v1 = vld [vmem:[#allocation16 + $0x5a4] sm:$0xf0] }
 0x335   :  { %v8963_v8 = vld [vmem:[#allocation16 + $0x724] sm:$0xf0] }
 0x336   :  { %v8907_v16 = vld [vmem:[#allocation16 + $0x564] sm:$0xf0] }
 0x337   :  { %2695 = vmatpush.bf16.msra.mxu3 %v6525_v53  ;;  %2682 = vmatpush.bf16.msrb.mxu2 %v6269_v5  ;;  %v8955_v21 = vld [vmem:[#allocation16 + $0x6e4] sm:$0xf0] }
 0x338   :  { %2721 = vmatpush.bf16.msrb.mxu1 %v7037_v25  ;;  %2708 = vmatpush.bf16.msra.mxu0 %v6781_v35  ;;  %v8987_v25 = vld [vmem:[#allocation16 + $0x7e4] sm:$0xf0] }
 0x339   :  { %v7233_v34 = vor.u32 %v8987_v25, %v7232_v24  ;;  %v6560_v35 = vld [vmem:[#allocation16 + $0x288] sm:$0xf]  ;;  %v8847_v24 = vld [vmem:[#allocation16 + $0x38c] sm:$0xf] }
 0x33a   :  { %v6690_v25 = vld [vmem:[#allocation16 + $0x3a8] sm:$0xf0] }
 0x33b   :  { %2696 = vmatpush.bf16.msra.mxu3 %v6493_v63  ;;  %2683 = vmatpush.bf16.msrb.mxu2 %v6237_v14  ;;  %v8835_v14 = vld [vmem:[#allocation16 + $0x324] sm:$0xf0] }
 0x33c   :  { %2722 = vmatpush.bf16.msrb.mxu1 %v7005_v31  ;;  %2709 = vmatpush.bf16.msra.mxu0 %v6749_v39  ;;  %v6625_v20 = vor.u32 %v8835_v14, %v6624_v13  ;;  %v6272_v13 = vld [vmem:[#allocation16 + $0x48] sm:$0xf] }
 0x33d   :  { %v8747_v14 = vld [vmem:[#allocation16 + $0x64] sm:$0xf0] }
 0x33e   :  { %v6273_v22 = vor.u32 %v8747_v14, %v6272_v13  ;;  %v8815_v14 = vld [vmem:[#allocation16 + $0x28c] sm:$0xf] }
 0x37b   :  { %v985_v40 = vpop.f32.mrf.mxu0  ;;  %v998_v41 = vpop.f32.mrf.mxu1 }
 0x37c   :  { %v986_v44 = vadd.f32 %v985_v40, %v623_v36  ;;  %v6369_v40 = vor.u32 %v8771_v30, %v6368_v26  ;;  %v6240_v26 = vld [vmem:[#allocation16 + $0x8] sm:$0xf] }
 0x37e   :  { %v999_v46 = vadd.f32 %v998_v41, %v986_v44  ;;  %v8819_v41 = vld [vmem:[#allocation16 + $0x2a4] sm:$0xf0] }
 0x37f   :  { %v7200_v44 = vld [vmem:[#allocation16 + $0x788] sm:$0xf] }
 0x380   :  { %vm1055_vm11 = vcmp.gt.f32.partialorder %v999_v46, 0.0  ;;  %v1059_v49 = vmul.f32 0.01, %v999_v46  ;;  %v959_v50 = vpop.f32.mrf.mxu2  ;;  %v972_v51 = vpop.f32.mrf.mxu3 }
 0x381   :  { %v960_v52 = vadd.f32 %v959_v50, %v622_v45  ;;  %v8979_v45 = vld [vmem:[#allocation16 + $0x7a4] sm:$0xf0] }
 0x382   :  { %v1063_v53 = vsel %vm1055_vm11, %v999_v46, %v1059_v49  ;;  %v6336_v46 = vld [vmem:[#allocation16 + $0xc8] sm:$0xf] }
 0x383   :  { %v9933_v55 = vpack.c.bf16 %v1063_v53, %v1063_v53  ;;  %v973_v42 = vadd.f32 %v972_v51, %v960_v52  ;;  %v987_v43 = vpop.f32.mrf.mxu0  ;;  %v1000_v56 = vpop.f32.mrf.mxu1  ;;  %v8923_v50 = vld [vmem:[#allocation16 + $0x5e4] sm:$0xf0]  ;;  %v6561_v51 = vor.u32 %v8819_v41, %v6560_v35  ;;  %v7201_v52 = vor.u32 %v8979_v45, %v7200_v44 }
 0x384   :  { %v6528_v53 = vld [vmem:[#allocation16 + $0x248] sm:$0xf]  ;;  %v6337_v60 = vor.u32 %v8763_v47, %v6336_v46  ;;  %v8783_v47 = vld [vmem:[#allocation16 + $0x18c] sm:$0xf] }
 0x385   :  { %vm1054_vm12 = vcmp.gt.f32.partialorder %v973_v42, 0.0  ;;  %v1058_v61 = vmul.f32 0.01, %v973_v42  ;;  %2645 = vmatmul.bf16.vlgmr.msrb.gmra.mxu3 %v9933_v55  ;;  %v7168_v43 = vld [vmem:[#allocation16 + $0x748] sm:$0xf] }
 0x386   :  { %2741 = vmatpush.bf16.msrb.mxu3 %v6721_v54  ;;  %v8971_v56 = vld [vmem:[#allocation16 + $0x764] sm:$0xf0] }
 0x387   :  { %v1062_v63 = vsel %vm1054_vm12, %v973_v42, %v1058_v61  ;;  %v8811_v42 = vld [vmem:[#allocation16 + $0x264] sm:$0xf0]  ;;  %v6977_v61 = vor.u32 %v8923_v50, %v6976_v48  ;;  %v6434_v48 = vld [vmem:[#allocation16 + $0x1a8] sm:$0xf0] }
 0x388   :  { %v9936_v3 = vpack.c.bf16 %v1062_v63, %v1062_v63  ;;  %v961_v4 = vpop.f32.mrf.mxu2  ;;  %v974_v5 = vpop.f32.mrf.mxu3  ;;  %v8755_v63 = vld [vmem:[#allocation16 + $0xa4] sm:$0xf0]  ;;  %v6529_v2 = vor.u32 %v8811_v42, %v6528_v53  ;;  %v8831_v53 = vld [vmem:[#allocation16 + $0x30c] sm:$0xf]  ;;  %v6437_v42 = vor.u32 %v8783_v47, %v6434_v48 }
 0x389   :  { %v7169_v4 = vor.u32 %v8971_v56, %v7168_v43  ;;  %v6496_v5 = vld [vmem:[#allocation16 + $0x208] sm:$0xf]  ;;  %v7138_v47 = vld [vmem:[#allocation16 + $0x728] sm:$0xf0] }
 0x38a   :  { %2742 = vmatpush.bf16.msrb.mxu3 %v6689_v62  ;;  %2632 = vmatmul.bf16.vlgmr.msra.gmra.mxu2 %v9936_v3  ;;  %v6304_v62 = vld [vmem:[#allocation16 + $0x88] sm:$0xf] }
 0x38b   :  { %v1037_v10 = vpop.f32.mrf.mxu0  ;;  %v1050_v11 = vpop.f32.mrf.mxu1  ;;  %2728 = vmatpush.bf16.msra.mxu2 %v6465_v0  ;;  %v6944_v0 = vld [vmem:[#allocation16 + $0x588] sm:$0xf] }
 0x38c   :  { %v1038_v15 = vadd.f32 %v1037_v10, %v625_v6  ;;  %v8803_v6 = vld [vmem:[#allocation16 + $0x224] sm:$0xf0]  ;;  %v6945_v10 = vor.u32 %v8915_v1, %v6944_v0  ;;  %v8823_v0 = vld [vmem:[#allocation16 + $0x2cc] sm:$0xf] }
 0x38d   :  { %v6497_v17 = vor.u32 %v8803_v6, %v6496_v5  ;;  %v8947_v35 = vld [vmem:[#allocation16 + $0x6a4] sm:$0xf0]  ;;  %v7234_v5 = vld [vmem:[#allocation16 + $0x7e8] sm:$0xf0] }
 0x38e   :  { %v1051_v19 = vadd.f32 %v1050_v11, %v1038_v15  ;;  %2743 = vmatpush.bf16.msrb.mxu3 %v6657_v9  ;;  %v6305_v9 = vor.u32 %v8755_v63, %v6304_v62  ;;  %v8855_v11 = vld [vmem:[#allocation16 + $0x3cc] sm:$0xf]  ;;  %v6912_v15 = vld [vmem:[#allocation16 + $0x548] sm:$0xf] }
 0x38f   :  { %2729 = vmatpush.bf16.msra.mxu2 %v6433_v12  ;;  %v6722_v12 = vld [vmem:[#allocation16 + $0x3e8] sm:$0xf0]  ;;  %v6848_v44 = vld [vmem:[#allocation16 + $0x4c8] sm:$0xf] }
 0x390   :  { %vm1057_vm13 = vcmp.gt.f32.partialorder %v1051_v19, 0.0  ;;  %v1061_v27 = vmul.f32 0.01, %v1051_v19  ;;  %v1011_v28 = vpop.f32.mrf.mxu2  ;;  %v1024_v29 = vpop.f32.mrf.mxu3  ;;  %v8891_v45 = vld [vmem:[#allocation16 + $0x4e4] sm:$0xf0] }
 0x391   :  { %v1012_v31 = vadd.f32 %v1011_v28, %v624_v18  ;;  %v7137_v18 = vor.u32 %v8963_v8, %v7136_v7  ;;  %v6880_v28 = vld [vmem:[#allocation16 + $0x508] sm:$0xf] }
 0x392   :  { %v1065_v32 = vsel %vm1057_vm13, %v1051_v19, %v1061_v27  ;;  %2744 = vmatpush.bf16.msrb.mxu3 %v6625_v20  ;;  %v6725_v19 = vor.u32 %v8855_v11, %v6722_v12  ;;  %v7104_v20 = vld [vmem:[#allocation16 + $0x6c8] sm:$0xf]  ;;  %v6370_v11 = vld [vmem:[#allocation16 + $0x128] sm:$0xf0] }
 0x393   :  { %v9941_v36 = vpack.c.bf16 %v1065_v32, %v1065_v32  ;;  %v1025_v37 = vadd.f32 %v1024_v29, %v1012_v31  ;;  %v1039_v38 = vpop.f32.mrf.mxu0  ;;  %v1052_v39 = vpop.f32.mrf.mxu1  ;;  %2730 = vmatpush.bf16.msra.mxu2 %v6401_v23  ;;  %v6913_v23 = vor.u32 %v8907_v16, %v6912_v15  ;;  %v8739_v27 = vld [vmem:[#allocation16 + $0x24] sm:$0xf0]  ;;  %v7105_v30 = vor.u32 %v8955_v21, %v7104_v20  ;;  %v8791_v31 = vld [vmem:[#allocation16 + $0x1cc] sm:$0xf] }
 0x394   :  { %v8899_v29 = vld [vmem:[#allocation16 + $0x524] sm:$0xf0]  ;;  %v6466_v32 = vld [vmem:[#allocation16 + $0x1e8] sm:$0xf0] }
 0x395   :  { %vm1056_vm14 = vcmp.gt.f32.partialorder %v1025_v37, 0.0  ;;  %v1060_v49 = vmul.f32 0.01, %v1025_v37  ;;  %2671 = vmatmul.bf16.vlgmr.msra.gmra.mxu1 %v9941_v36  ;;  %2697 = vmatmul.bf16.vlgmr.msra.gmra.mxu3 %v9933_v55  ;;  %v6881_v38 = vor.u32 %v8899_v29, %v6880_v28  ;;  %v8839_v39 = vld [vmem:[#allocation16 + $0x34c] sm:$0xf]  ;;  %v6469_v41 = vor.u32 %v8791_v31, %v6466_v32 }
 0x396   :  { %2745 = vmatpush.bf16.msrb.mxu3 %v6593_v33  ;;  %2767 = vmatpush.bf16.msra.mxu1 %v7233_v34  ;;  %v6693_v33 = vor.u32 %v8847_v24, %v6690_v25  ;;  %v7072_v34 = vld [vmem:[#allocation16 + $0x688] sm:$0xf]  ;;  %v6562_v16 = vld [vmem:[#allocation16 + $0x2a8] sm:$0xf0] }
 0x397   :  { %v1064_v54 = vsel %vm1056_vm14, %v1025_v37, %v1060_v49  ;;  %2731 = vmatpush.bf16.msra.mxu2 %v6369_v40  ;;  %v6241_v37 = vor.u32 %v8739_v27, %v6240_v26  ;;  %v6658_v40 = vld [vmem:[#allocation16 + $0x368] sm:$0xf0]  ;;  %v7073_v46 = vor.u32 %v8947_v35, %v7072_v34  ;;  %v7040_v50 = vld [vmem:[#allocation16 + $0x648] sm:$0xf]  ;;  %v6565_v26 = vor.u32 %v8815_v14, %v6562_v16  ;;  %v6664_v14 = vld [vmem:[#allocation16 + $0x350] sm:$0xf] }
 0x398   :  { %v9945_v57 = vpack.c.bf16 %v1064_v54, %v1064_v54  ;;  %v1013_v58 = vpop.f32.mrf.mxu2  ;;  %v1026_v59 = vpop.f32.mrf.mxu3  ;;  %v6661_v49 = vor.u32 %v8839_v39, %v6658_v40  ;;  %v6626_v54 = vld [vmem:[#allocation16 + $0x328] sm:$0xf0]  ;;  %v6816_v43 = vld [vmem:[#allocation16 + $0x488] sm:$0xf] }
 0x399   :  { %v8883_v56 = vld [vmem:[#allocation16 + $0x4a4] sm:$0xf0]  ;;  %v8775_v59 = vld [vmem:[#allocation16 + $0x14c] sm:$0xf] }
 0x39a   :  { %2746 = vmatpush.bf16.msrb.mxu3 %v6561_v51  ;;  %2768 = vmatpush.bf16.msra.mxu1 %v7201_v52  ;;  %v8939_v51 = vld [vmem:[#allocation16 + $0x664] sm:$0xf0]  ;;  %v6849_v52 = vor.u32 %v8891_v45, %v6848_v44  ;;  %v6817_v1 = vor.u32 %v8883_v56, %v6816_v43  ;;  %v8919_v24 = vld [vmem:[#allocation16 + $0x5cc] sm:$0xf] }
 0x39b   :  { %2658 = vmatmul.bf16.vlgmr.msrb.gmra.mxu0 %v9945_v57  ;;  %2684 = vmatmul.bf16.vlgmr.msrb.gmra.mxu2 %v9936_v3  ;;  %v7041_v58 = vor.u32 %v8939_v51, %v7040_v50  ;;  %v7008_v62 = vld [vmem:[#allocation16 + $0x608] sm:$0xf]  ;;  %v6978_v25 = vld [vmem:[#allocation16 + $0x5e8] sm:$0xf0]  ;;  %v6728_v50 = vld [vmem:[#allocation16 + $0x3d0] sm:$0xf] }
 0x39c   :  { %2732 = vmatpush.bf16.msra.mxu2 %v6337_v60  ;;  %2754 = vmatpush.bf16.msrb.mxu0 %v6977_v61  ;;  %v6402_v60 = vld [vmem:[#allocation16 + $0x168] sm:$0xf0]  ;;  %v6629_v61 = vor.u32 %v8831_v53, %v6626_v54  ;;  %v8931_v63 = vld [vmem:[#allocation16 + $0x624] sm:$0xf0]  ;;  %v6981_v34 = vor.u32 %v8919_v24, %v6978_v25  ;;  %v8860_v51 = vld [vmem:[#allocation16 + $0x3ec] sm:$0xf0] }
 0x39d   :  { %v6405_v6 = vor.u32 %v8775_v59, %v6402_v60  ;;  %v6784_v7 = vld [vmem:[#allocation16 + $0x448] sm:$0xf]  ;;  %v8807_v28 = vld [vmem:[#allocation16 + $0x24c] sm:$0xf] }
 0x39e   :  { %2747 = vmatpush.bf16.msrb.mxu3 %v6529_v2  ;;  %2769 = vmatpush.bf16.msra.mxu1 %v7169_v4  ;;  %v6594_v2 = vld [vmem:[#allocation16 + $0x2e8] sm:$0xf0]  ;;  %v8875_v8 = vld [vmem:[#allocation16 + $0x464] sm:$0xf0] }
 0x39f   :  { %v8983_v4 = vld [vmem:[#allocation16 + $0x7cc] sm:$0xf]  ;;  %v6597_v12 = vor.u32 %v8823_v0, %v6594_v2  ;;  %v6785_v15 = vor.u32 %v8875_v8, %v6784_v7  ;;  %v6752_v20 = vld [vmem:[#allocation16 + $0x408] sm:$0xf]  ;;  %v8852_v0 = vld [vmem:[#allocation16 + $0x3ac] sm:$0xf0] }
 0x3a0   :  { %2733 = vmatpush.bf16.msra.mxu2 %v6305_v9  ;;  %2755 = vmatpush.bf16.msrb.mxu0 %v6945_v10  ;;  %v7009_v9 = vor.u32 %v8931_v63, %v7008_v62  ;;  %v8767_v10 = vld [vmem:[#allocation16 + $0x10c] sm:$0xf]  ;;  %v7237_v13 = vor.u32 %v8983_v4, %v7234_v5  ;;  %v8867_v21 = vld [vmem:[#allocation16 + $0x424] sm:$0xf0]  ;;  %v6696_v63 = vld [vmem:[#allocation16 + $0x390] sm:$0xf] }
 0x3a1   :  { %v6753_v29 = vor.u32 %v8867_v21, %v6752_v20  ;;  %v8967_v31 = vld [vmem:[#allocation16 + $0x74c] sm:$0xf]  ;;  %v6472_v7 = vld [vmem:[#allocation16 + $0x1d0] sm:$0xf] }
 0x3a2   :  { %2748 = vmatpush.bf16.msrb.mxu3 %v6497_v17  ;;  %2770 = vmatpush.bf16.msra.mxu1 %v7137_v18  ;;  %v8975_v17 = vld [vmem:[#allocation16 + $0x78c] sm:$0xf]  ;;  %v8796_v8 = vld [vmem:[#allocation16 + $0x1ec] sm:$0xf0] }
 0x3a3   :  { %v7202_v18 = vld [vmem:[#allocation16 + $0x7a8] sm:$0xf0]  ;;  %v6473_v16 = vor.u32 %v8796_v8, %v6472_v7  ;;  %v6440_v20 = vld [vmem:[#allocation16 + $0x190] sm:$0xf] }
 0x3a4   :  { %2734 = vmatpush.bf16.msra.mxu2 %v6273_v22  ;;  %2756 = vmatpush.bf16.msrb.mxu0 %v6913_v23  ;;  %v8759_v22 = vld [vmem:[#allocation16 + $0xcc] sm:$0xf]  ;;  %v7205_v27 = vor.u32 %v8975_v17, %v7202_v18  ;;  %v8788_v21 = vld [vmem:[#allocation16 + $0x1ac] sm:$0xf0] }
 0x3a5   :  { %2723 = vmatmul.bf16.vlgmr.msrb.gmra.mxu1 %v9941_v36  ;;  %2749 = vmatmul.bf16.vlgmr.msrb.gmra.mxu3 %v9933_v55  ;;  %v6338_v23 = vld [vmem:[#allocation16 + $0xe8] sm:$0xf0] }
 0x3a6   :  { %2793 = vmatpush.bf16.msra.mxu3 %v6725_v19  ;;  %2771 = vmatpush.bf16.msra.mxu1 %v7105_v30  ;;  %v6373_v19 = vor.u32 %v8767_v10, %v6370_v11  ;;  %v6530_v30 = vld [vmem:[#allocation16 + $0x268] sm:$0xf0] }
 0x3a7   :  { %v7170_v32 = vld [vmem:[#allocation16 + $0x768] sm:$0xf0]  ;;  %v6533_v40 = vor.u32 %v8807_v28, %v6530_v30  ;;  %v6441_v28 = vor.u32 %v8788_v21, %v6440_v20  ;;  %v8964_v20 = vld [vmem:[#allocation16 + $0x72c] sm:$0xf0] }
 0x3a8   :  { %2735 = vmatpush.bf16.msra.mxu2 %v6241_v37  ;;  %2757 = vmatpush.bf16.msrb.mxu0 %v6881_v38  ;;  %v8751_v35 = vld [vmem:[#allocation16 + $0x8c] sm:$0xf] }
 0x3a9   :  { %v6306_v37 = vld [vmem:[#allocation16 + $0xa8] sm:$0xf0] }
 0x3aa   :  { %2794 = vmatpush.bf16.msra.mxu3 %v6693_v33  ;;  %2772 = vmatpush.bf16.msra.mxu1 %v7073_v46  ;;  %v6341_v33 = vor.u32 %v8759_v22, %v6338_v23  ;;  %v8911_v38 = vld [vmem:[#allocation16 + $0x58c] sm:$0xf]  ;;  %v6309_v48 = vor.u32 %v8751_v35, %v6306_v37 }
 0x3ab   :  { %2710 = vmatmul.bf16.vlgmr.msra.gmra.mxu0 %v9945_v57  ;;  %2736 = vmatmul.bf16.vlgmr.msra.gmra.mxu2 %v9936_v3  ;;  %v6946_v39 = vld [vmem:[#allocation16 + $0x5a8] sm:$0xf0] }
 0x3ac   :  { %2780 = vmatpush.bf16.msrb.mxu2 %v6469_v41  ;;  %2758 = vmatpush.bf16.msrb.mxu0 %v6849_v52  ;;  %v7173_v41 = vor.u32 %v8967_v31, %v7170_v32  ;;  %v8799_v44 = vld [vmem:[#allocation16 + $0x20c] sm:$0xf]  ;;  %v6408_v32 = vld [vmem:[#allocation16 + $0x150] sm:$0xf] }
 0x3ad   :  { %v6498_v45 = vld [vmem:[#allocation16 + $0x228] sm:$0xf0] }
 0x3ae   :  { %2795 = vmatpush.bf16.msra.mxu3 %v6661_v49  ;;  %2773 = vmatpush.bf16.msra.mxu1 %v7041_v58  ;;  %v8959_v46 = vld [vmem:[#allocation16 + $0x70c] sm:$0xf]  ;;  %v6949_v49 = vor.u32 %v8911_v38, %v6946_v39  ;;  %v6501_v43 = vor.u32 %v8799_v44, %v6498_v45  ;;  %v6729_v58 = vor.u32 %v8860_v51, %v6728_v50  ;;  %v6600_v38 = vld [vmem:[#allocation16 + $0x2d0] sm:$0xf] }
 0x3af   :  { %v8743_v52 = vld [vmem:[#allocation16 + $0x4c] sm:$0xf]  ;;  %v7141_v56 = vor.u32 %v8959_v46, %v7138_v47  ;;  %v8988_v44 = vld [vmem:[#allocation16 + $0x7ec] sm:$0xf0] }
 0x3b0   :  { %2781 = vmatpush.bf16.msrb.mxu2 %v6437_v42  ;;  %2759 = vmatpush.bf16.msrb.mxu0 %v6817_v1  ;;  %v6274_v53 = vld [vmem:[#allocation16 + $0x68] sm:$0xf0]  ;;  %v8772_v50 = vld [vmem:[#allocation16 + $0x12c] sm:$0xf0] }
 0x3b1   :  { %v8903_v54 = vld [vmem:[#allocation16 + $0x54c] sm:$0xf] }
 0x3b2   :  { %2796 = vmatpush.bf16.msra.mxu3 %v6629_v61  ;;  %2774 = vmatpush.bf16.msra.mxu1 %v7009_v9  ;;  %v6914_v42 = vld [vmem:[#allocation16 + $0x568] sm:$0xf0]  ;;  %v6277_v61 = vor.u32 %v8743_v52, %v6274_v53  ;;  %v6697_v9 = vor.u32 %v8852_v0, %v6696_v63  ;;  %v6568_v53 = vld [vmem:[#allocation16 + $0x290] sm:$0xf] }
 0x3b3   :  { %v8951_v59 = vld [vmem:[#allocation16 + $0x6cc] sm:$0xf]  ;;  %v6917_v62 = vor.u32 %v8903_v54, %v6914_v42  ;;  %v8820_v42 = vld [vmem:[#allocation16 + $0x2ac] sm:$0xf0] }
 0x3b4   :  { %2782 = vmatpush.bf16.msrb.mxu2 %v6405_v6  ;;  %2760 = vmatpush.bf16.msrb.mxu0 %v6785_v15  ;;  %v7106_v60 = vld [vmem:[#allocation16 + $0x6e8] sm:$0xf0]  ;;  %v8844_v15 = vld [vmem:[#allocation16 + $0x36c] sm:$0xf0] }
 0x3b5   :  { %2775 = vmatmul.bf16.vlgmr.msra.gmra.mxu1 %v9941_v36  ;;  %v8735_v1 = vld [vmem:[#allocation16 + $0xc] sm:$0xf]  ;;  %v7109_v6 = vor.u32 %v8951_v59, %v7106_v60  ;;  %v6665_v22 = vor.u32 %v8844_v15, %v6664_v14  ;;  %v6984_v63 = vld [vmem:[#allocation16 + $0x5d0] sm:$0xf] }
 0x3b6   :  { %2797 = vmatpush.bf16.msra.mxu3 %v6597_v12  ;;  %2819 = vmatpush.bf16.msrb.mxu1 %v7237_v13  ;;  %v6242_v2 = vld [vmem:[#allocation16 + $0x28] sm:$0xf0]  ;;  %v8924_v0 = vld [vmem:[#allocation16 + $0x5ec] sm:$0xf0] }
 0x3b7   :  { %v8895_v4 = vld [vmem:[#allocation16 + $0x50c] sm:$0xf]  ;;  %v6245_v12 = vor.u32 %v8735_v1, %v6242_v2  ;;  %v6569_v1 = vor.u32 %v8820_v42, %v6568_v53  ;;  %v6985_v8 = vor.u32 %v8924_v0, %v6984_v63  ;;  %v8916_v14 = vld [vmem:[#allocation16 + $0x5ac] sm:$0xf0]  ;;  %v8840_v53 = vld [vmem:[#allocation16 + $0x354] sm:$0xf] }
 0x3b8   :  { %2783 = vmatpush.bf16.msrb.mxu2 %v6373_v19  ;;  %2761 = vmatpush.bf16.msrb.mxu0 %v6753_v29  ;;  %v6882_v5 = vld [vmem:[#allocation16 + $0x528] sm:$0xf0]  ;;  %v6666_v42 = vld [vmem:[#allocation16 + $0x370] sm:$0xf0]  ;;  %v7048_v63 = vld [vmem:[#allocation16 + $0x650] sm:$0xf] }
 0x3b9   :  { %v8943_v10 = vld [vmem:[#allocation16 + $0x68c] sm:$0xf]  ;;  %v6885_v13 = vor.u32 %v8895_v4, %v6882_v5  ;;  %v6536_v5 = vld [vmem:[#allocation16 + $0x250] sm:$0xf] }
 0x3ba   :  { %2798 = vmatpush.bf16.msra.mxu3 %v6565_v26  ;;  %2820 = vmatpush.bf16.msrb.mxu1 %v7205_v27  ;;  %v7074_v11 = vld [vmem:[#allocation16 + $0x6a8] sm:$0xf0]  ;;  %v6632_v26 = vld [vmem:[#allocation16 + $0x310] sm:$0xf] }
 0x3bb   :  { %2762 = vmatmul.bf16.vlgmr.msrb.gmra.mxu0 %v9945_v57  ;;  %v8887_v17 = vld [vmem:[#allocation16 + $0x4cc] sm:$0xf]  ;;  %v7077_v19 = vor.u32 %v8943_v10, %v7074_v11  ;;  %v8836_v27 = vld [vmem:[#allocation16 + $0x32c] sm:$0xf0] }
 0x3bc   :  { %2784 = vmatpush.bf16.msrb.mxu2 %v6341_v33  ;;  %2806 = vmatpush.bf16.msra.mxu0 %v6981_v34  ;;  %v6850_v18 = vld [vmem:[#allocation16 + $0x4e8] sm:$0xf0]  ;;  %v8780_v33 = vld [vmem:[#allocation16 + $0x16c] sm:$0xf0]  ;;  %v6633_v34 = vor.u32 %v8836_v27, %v6632_v26 }
 0x3bd   :  { %v8935_v23 = vld [vmem:[#allocation16 + $0x64c] sm:$0xf]  ;;  %v6853_v25 = vor.u32 %v8887_v17, %v6850_v18  ;;  %v6409_v45 = vor.u32 %v8780_v33, %v6408_v32  ;;  %v8972_v10 = vld [vmem:[#allocation16 + $0x76c] sm:$0xf0] }
 0x3be   :  { %2799 = vmatpush.bf16.msra.mxu3 %v6533_v40  ;;  %2821 = vmatpush.bf16.msrb.mxu1 %v7173_v41  ;;  %v7042_v24 = vld [vmem:[#allocation16 + $0x668] sm:$0xf0]  ;;  %v8828_v40 = vld [vmem:[#allocation16 + $0x2ec] sm:$0xf0] }
 0x3bf   :  { %v8879_v29 = vld [vmem:[#allocation16 + $0x48c] sm:$0xf]  ;;  %v7045_v31 = vor.u32 %v8935_v23, %v7042_v24  ;;  %v7240_v41 = vld [vmem:[#allocation16 + $0x7d0] sm:$0xf]  ;;  %v6601_v51 = vor.u32 %v8828_v40, %v6600_v38  ;;  %v8856_v23 = vld [vmem:[#allocation16 + $0x3d4] sm:$0xf] }
 0x3c0   :  { %2785 = vmatpush.bf16.msrb.mxu2 %v6309_v48  ;;  %2807 = vmatpush.bf16.msra.mxu0 %v6949_v49  ;;  %v6818_v30 = vld [vmem:[#allocation16 + $0x4a8] sm:$0xf0]  ;;  %v6376_v49 = vld [vmem:[#allocation16 + $0x110] sm:$0xf]  ;;  %v7241_v52 = vor.u32 %v8988_v44, %v7240_v41  ;;  %v6730_v24 = vld [vmem:[#allocation16 + $0x3f0] sm:$0xf0] }
 0x3c1   :  { %v8927_v35 = vld [vmem:[#allocation16 + $0x60c] sm:$0xf]  ;;  %v6821_v39 = vor.u32 %v8879_v29, %v6818_v30  ;;  %v6312_v11 = vld [vmem:[#allocation16 + $0x90] sm:$0xf]  ;;  %v6698_v38 = vld [vmem:[#allocation16 + $0x3b0] sm:$0xf0] }
 0x3c2   :  { %2800 = vmatpush.bf16.msra.mxu3 %v6501_v43  ;;  %2822 = vmatpush.bf16.msrb.mxu1 %v7141_v56  ;;  %v7010_v37 = vld [vmem:[#allocation16 + $0x628] sm:$0xf0]  ;;  %v7208_v43 = vld [vmem:[#allocation16 + $0x790] sm:$0xf] }
 0x3c3   :  { %v8871_v46 = vld [vmem:[#allocation16 + $0x44c] sm:$0xf]  ;;  %v7013_v48 = vor.u32 %v8927_v35, %v7010_v37  ;;  %v8980_v56 = vld [vmem:[#allocation16 + $0x7ac] sm:$0xf0]  ;;  %v8848_v37 = vld [vmem:[#allocation16 + $0x394] sm:$0xf] }
 0x3c4   :  { %2786 = vmatpush.bf16.msrb.mxu2 %v6277_v61  ;;  %2808 = vmatpush.bf16.msra.mxu0 %v6917_v62  ;;  %v6786_v47 = vld [vmem:[#allocation16 + $0x468] sm:$0xf0]  ;;  %v6344_v61 = vld [vmem:[#allocation16 + $0xd0] sm:$0xf]  ;;  %v7209_v2 = vor.u32 %v8980_v56, %v7208_v43 }
 0x3c5   :  { %2801 = vmatmul.bf16.vlgmr.msra.gmra.mxu3 %v9933_v55  ;;  %v6789_v54 = vor.u32 %v8871_v46, %v6786_v47  ;;  %v8863_v59 = vld [vmem:[#allocation16 + $0x40c] sm:$0xf]  ;;  %v8764_v62 = vld [vmem:[#allocation16 + $0xec] sm:$0xf0]  ;;  %v6474_v46 = vld [vmem:[#allocation16 + $0x1f0] sm:$0xf0] }
 0x3c6   :  { %2845 = vmatpush.bf16.msrb.mxu3 %v6729_v58  ;;  %2823 = vmatpush.bf16.msrb.mxu1 %v7109_v6  ;;  %v6377_v58 = vor.u32 %v8772_v50, %v6376_v49  ;;  %v6754_v60 = vld [vmem:[#allocation16 + $0x428] sm:$0xf0]  ;;  %v8812_v6 = vld [vmem:[#allocation16 + $0x26c] sm:$0xf0]  ;;  %v6345_v7 = vor.u32 %v8764_v62, %v6344_v61  ;;  %v6669_v61 = vor.u32 %v8840_v53, %v6666_v42  ;;  %v6954_v53 = vld [vmem:[#allocation16 + $0x5b0] sm:$0xf0] }
 0x3c7   :  { %v6757_v4 = vor.u32 %v8863_v59, %v6754_v60  ;;  %v6537_v15 = vor.u32 %v8812_v6, %v6536_v5  ;;  %v8804_v18 = vld [vmem:[#allocation16 + $0x22c] sm:$0xf0]  ;;  %v6442_v59 = vld [vmem:[#allocation16 + $0x1b0] sm:$0xf0] }
 0x3c8   :  { %2787 = vmatpush.bf16.msrb.mxu2 %v6245_v12  ;;  %2809 = vmatpush.bf16.msra.mxu0 %v6885_v13  ;;  %v8756_v12 = vld [vmem:[#allocation16 + $0xac] sm:$0xf0]  ;;  %v8800_v42 = vld [vmem:[#allocation16 + $0x214] sm:$0xf] }
 0x3c9   :  { %v6952_v13 = vld [vmem:[#allocation16 + $0x590] sm:$0xf]  ;;  %v6313_v21 = vor.u32 %v8756_v12, %v6312_v11 }
 0x3ca   :  { %2846 = vmatpush.bf16.msrb.mxu3 %v6697_v9  ;;  %2824 = vmatpush.bf16.msrb.mxu1 %v7077_v19  ;;  %v7176_v9 = vld [vmem:[#allocation16 + $0x750] sm:$0xf] }
 0x3cb   :  { %2788 = vmatmul.bf16.vlgmr.msrb.gmra.mxu2 %v9936_v3  ;;  %v7177_v17 = vor.u32 %v8972_v10, %v7176_v9  ;;  %v7144_v19 = vld [vmem:[#allocation16 + $0x710] sm:$0xf] }
 0x3cc   :  { %2832 = vmatpush.bf16.msra.mxu2 %v6473_v16  ;;  %2810 = vmatpush.bf16.msra.mxu0 %v6853_v25  ;;  %v6504_v16 = vld [vmem:[#allocation16 + $0x210] sm:$0xf]  ;;  %v7145_v30 = vor.u32 %v8964_v20, %v7144_v19 }
 0x3cd   :  { %v6280_v25 = vld [vmem:[#allocation16 + $0x50] sm:$0xf]  ;;  %v6505_v29 = vor.u32 %v8804_v18, %v6504_v16  ;;  %v7242_v18 = vld [vmem:[#allocation16 + $0x7f0] sm:$0xf0] }
 0x3ce   :  { %2847 = vmatpush.bf16.msrb.mxu3 %v6665_v22  ;;  %2825 = vmatpush.bf16.msrb.mxu1 %v7045_v31  ;;  %v6953_v22 = vor.u32 %v8916_v14, %v6952_v13  ;;  %v8748_v26 = vld [vmem:[#allocation16 + $0x6c] sm:$0xf0]  ;;  %v6733_v31 = vor.u32 %v8856_v23, %v6730_v24  ;;  %v8824_v14 = vld [vmem:[#allocation16 + $0x2d4] sm:$0xf] }
 0x3cf   :  { %v6920_v27 = vld [vmem:[#allocation16 + $0x550] sm:$0xf] }
 0x3d0   :  { %2833 = vmatpush.bf16.msra.mxu2 %v6441_v28  ;;  %2811 = vmatpush.bf16.msra.mxu0 %v6821_v39  ;;  %v8908_v28 = vld [vmem:[#allocation16 + $0x56c] sm:$0xf0] }
 0x3d1   :  { %v7112_v32 = vld [vmem:[#allocation16 + $0x6d0] sm:$0xf]  ;;  %v6921_v35 = vor.u32 %v8908_v28, %v6920_v27  ;;  %v6570_v27 = vld [vmem:[#allocation16 + $0x2b0] sm:$0xf0] }
 0x3d2   :  { %2848 = vmatpush.bf16.msrb.mxu3 %v6633_v34  ;;  %2826 = vmatpush.bf16.msrb.mxu1 %v7013_v48  ;;  %v8956_v33 = vld [vmem:[#allocation16 + $0x6ec] sm:$0xf0]  ;;  %v6281_v34 = vor.u32 %v8748_v26, %v6280_v25  ;;  %v6701_v48 = vor.u32 %v8848_v37, %v6698_v38  ;;  %v8816_v26 = vld [vmem:[#allocation16 + $0x294] sm:$0xf] }
 0x3d3   :  { %v6248_v39 = vld [vmem:[#allocation16 + $0x10] sm:$0xf]  ;;  %v7113_v47 = vor.u32 %v8956_v33, %v7112_v32  ;;  %v8920_v37 = vld [vmem:[#allocation16 + $0x5d4] sm:$0xf] }
 0x3d4   :  { %2834 = vmatpush.bf16.msra.mxu2 %v6409_v45  ;;  %2812 = vmatpush.bf16.msra.mxu0 %v6789_v54  ;;  %v8740_v40 = vld [vmem:[#allocation16 + $0x2c] sm:$0xf0]  ;;  %v8792_v45 = vld [vmem:[#allocation16 + $0x1d4] sm:$0xf] }
 0x3d5   :  { %2827 = vmatmul.bf16.vlgmr.msrb.gmra.mxu1 %v9941_v36  ;;  %v6888_v41 = vld [vmem:[#allocation16 + $0x510] sm:$0xf]  ;;  %v6249_v49 = vor.u32 %v8740_v40, %v6248_v39  ;;  %v6477_v54 = vor.u32 %v8792_v45, %v6474_v46  ;;  %v6986_v38 = vld [vmem:[#allocation16 + $0x5f0] sm:$0xf0]  ;;  %v6573_v39 = vor.u32 %v8816_v26, %v6570_v27  ;;  %v6672_v26 = vld [vmem:[#allocation16 + $0x358] sm:$0xf] }
 0x3d6   :  { %2849 = vmatpush.bf16.msrb.mxu3 %v6601_v51  ;;  %2871 = vmatpush.bf16.msra.mxu1 %v7241_v52  ;;  %v8900_v44 = vld [vmem:[#allocation16 + $0x52c] sm:$0xf0]  ;;  %v8808_v45 = vld [vmem:[#allocation16 + $0x254] sm:$0xf] }
 0x3d7   :  { %v6889_v50 = vor.u32 %v8900_v44, %v6888_v41  ;;  %v7080_v51 = vld [vmem:[#allocation16 + $0x690] sm:$0xf]  ;;  %v6538_v46 = vld [vmem:[#allocation16 + $0x270] sm:$0xf0] }
 0x3d8   :  { %2835 = vmatpush.bf16.msra.mxu2 %v6377_v58  ;;  %2813 = vmatpush.bf16.msra.mxu0 %v6757_v4  ;;  %v8948_v52 = vld [vmem:[#allocation16 + $0x6ac] sm:$0xf0]  ;;  %v8784_v58 = vld [vmem:[#allocation16 + $0x194] sm:$0xf] }
 0x3d9   :  { %v6856_v43 = vld [vmem:[#allocation16 + $0x4d0] sm:$0xf]  ;;  %v7081_v60 = vor.u32 %v8948_v52, %v7080_v51  ;;  %v6634_v4 = vld [vmem:[#allocation16 + $0x330] sm:$0xf0] }
 0x3da   :  { %2850 = vmatpush.bf16.msrb.mxu3 %v6569_v1  ;;  %2872 = vmatpush.bf16.msra.mxu1 %v7209_v2  ;;  %v8892_v56 = vld [vmem:[#allocation16 + $0x4ec] sm:$0xf0]  ;;  %v8832_v1 = vld [vmem:[#allocation16 + $0x314] sm:$0xf]  ;;  %v6445_v2 = vor.u32 %v8784_v58, %v6442_v59 }
 0x3db   :  { %2814 = vmatmul.bf16.vlgmr.msra.gmra.mxu0 %v9945_v57  ;;  %v6857_v62 = vor.u32 %v8892_v56, %v6856_v43  ;;  %v8940_v0 = vld [vmem:[#allocation16 + $0x66c] sm:$0xf0]  ;;  %v6637_v11 = vor.u32 %v8832_v1, %v6634_v4  ;;  %v6314_v51 = vld [vmem:[#allocation16 + $0xb0] sm:$0xf0] }
 0x3dc   :  { %2836 = vmatpush.bf16.msra.mxu2 %v6345_v7  ;;  %2858 = vmatpush.bf16.msrb.mxu0 %v6985_v8  ;;  %v6824_v5 = vld [vmem:[#allocation16 + $0x490] sm:$0xf]  ;;  %v8776_v7 = vld [vmem:[#allocation16 + $0x154] sm:$0xf]  ;;  %v7049_v9 = vor.u32 %v8940_v0, %v7048_v63  ;;  %v8861_v63 = vld [vmem:[#allocation16 + $0x3f4] sm:$0xf0] }
 0x3dd   :  { %v8884_v6 = vld [vmem:[#allocation16 + $0x4ac] sm:$0xf0]  ;;  %v6410_v8 = vld [vmem:[#allocation16 + $0x170] sm:$0xf0] }
 0x3de   :  { %2851 = vmatpush.bf16.msrb.mxu3 %v6537_v15  ;;  %2873 = vmatpush.bf16.msra.mxu1 %v7177_v17  ;;  %v7016_v10 = vld [vmem:[#allocation16 + $0x610] sm:$0xf]  ;;  %v6825_v12 = vor.u32 %v8884_v6, %v6824_v5  ;;  %v6602_v15 = vld [vmem:[#allocation16 + $0x2f0] sm:$0xf0]  ;;  %v6413_v16 = vor.u32 %v8776_v7, %v6410_v8 }
 0x3df   :  { %v8932_v13 = vld [vmem:[#allocation16 + $0x62c] sm:$0xf0]  ;;  %v8984_v17 = vld [vmem:[#allocation16 + $0x7d4] sm:$0xf]  ;;  %v6605_v24 = vor.u32 %v8824_v14, %v6602_v15 }
 0x3e0   :  { %2837 = vmatpush.bf16.msra.mxu2 %v6313_v21  ;;  %2859 = vmatpush.bf16.msrb.mxu0 %v6953_v22  ;;  %v6792_v19 = vld [vmem:[#allocation16 + $0x450] sm:$0xf]  ;;  %v8768_v21 = vld [vmem:[#allocation16 + $0x114] sm:$0xf]  ;;  %v7017_v23 = vor.u32 %v8932_v13, %v7016_v10  ;;  %v7245_v25 = vor.u32 %v8984_v17, %v7242_v18  ;;  %v8853_v13 = vld [vmem:[#allocation16 + $0x3b4] sm:$0xf0] }
 0x3e1   :  { %v8876_v20 = vld [vmem:[#allocation16 + $0x46c] sm:$0xf0]  ;;  %v6378_v22 = vld [vmem:[#allocation16 + $0x130] sm:$0xf0]  ;;  %v6480_v18 = vld [vmem:[#allocation16 + $0x1d8] sm:$0xf] }
 0x3e2   :  { %2852 = vmatpush.bf16.msrb.mxu3 %v6505_v29  ;;  %2874 = vmatpush.bf16.msra.mxu1 %v7145_v30  ;;  %v6793_v28 = vor.u32 %v8876_v20, %v6792_v19  ;;  %v6381_v29 = vor.u32 %v8768_v21, %v6378_v22  ;;  %v8976_v30 = vld [vmem:[#allocation16 + $0x794] sm:$0xf]  ;;  %v6760_v32 = vld [vmem:[#allocation16 + $0x410] sm:$0xf]  ;;  %v8797_v19 = vld [vmem:[#allocation16 + $0x1f4] sm:$0xf0] }
 0x3e3   :  { %v8868_v33 = vld [vmem:[#allocation16 + $0x42c] sm:$0xf0]  ;;  %v8912_v52 = vld [vmem:[#allocation16 + $0x594] sm:$0xf]  ;;  %v6481_v27 = vor.u32 %v8797_v19, %v6480_v18 }
 0x3e4   :  { %2838 = vmatpush.bf16.msra.mxu2 %v6281_v34  ;;  %2860 = vmatpush.bf16.msrb.mxu0 %v6921_v35  ;;  %v8760_v34 = vld [vmem:[#allocation16 + $0xd4] sm:$0xf]  ;;  %v6761_v41 = vor.u32 %v8868_v33, %v6760_v32  ;;  %v8789_v32 = vld [vmem:[#allocation16 + $0x1b4] sm:$0xf0] }
 0x3e5   :  { %2853 = vmatmul.bf16.vlgmr.msrb.gmra.mxu3 %v9933_v55  ;;  %v6346_v35 = vld [vmem:[#allocation16 + $0xf0] sm:$0xf0] }
 0x3e6   :  { %2897 = vmatpush.bf16.msra.mxu3 %v6733_v31  ;;  %2875 = vmatpush.bf16.msra.mxu1 %v7113_v47  ;;  %v7210_v31 = vld [vmem:[#allocation16 + $0x7b0] sm:$0xf0]  ;;  %v6349_v44 = vor.u32 %v8760_v34, %v6346_v35 }
 0x3e7   :  { %v7213_v40 = vor.u32 %v8976_v30, %v7210_v31  ;;  %v8968_v47 = vld [vmem:[#allocation16 + $0x754] sm:$0xf]  ;;  %v6448_v31 = vld [vmem:[#allocation16 + $0x198] sm:$0xf] }
 0x3e8   :  { %2839 = vmatpush.bf16.msra.mxu2 %v6249_v49  ;;  %2861 = vmatpush.bf16.msrb.mxu0 %v6889_v50  ;;  %v7178_v49 = vld [vmem:[#allocation16 + $0x770] sm:$0xf0] }
 0x3e9   :  { %v8752_v50 = vld [vmem:[#allocation16 + $0x94] sm:$0xf]  ;;  %v7181_v43 = vor.u32 %v8968_v47, %v7178_v49  ;;  %v8781_v47 = vld [vmem:[#allocation16 + $0x174] sm:$0xf0] }
 0x3ea   :  { %2898 = vmatpush.bf16.msra.mxu3 %v6701_v48  ;;  %2876 = vmatpush.bf16.msra.mxu1 %v7081_v60  ;;  %v6989_v48 = vor.u32 %v8920_v37, %v6986_v38  ;;  %v6317_v56 = vor.u32 %v8752_v50, %v6314_v51  ;;  %v6506_v58 = vld [vmem:[#allocation16 + $0x230] sm:$0xf0] }
 0x3eb   :  { %2840 = vmatmul.bf16.vlgmr.msra.gmra.mxu2 %v9936_v3  ;;  %v8960_v59 = vld [vmem:[#allocation16 + $0x714] sm:$0xf]  ;;  %v6509_v5 = vor.u32 %v8800_v42, %v6506_v58 }
 0x3ec   :  { %2884 = vmatpush.bf16.msrb.mxu2 %v6477_v54  ;;  %2862 = vmatpush.bf16.msrb.mxu0 %v6857_v62  ;;  %v6541_v54 = vor.u32 %v8808_v45, %v6538_v46  ;;  %v7146_v60 = vld [vmem:[#allocation16 + $0x730] sm:$0xf0]  ;;  %v6736_v62 = vld [vmem:[#allocation16 + $0x3d8] sm:$0xf] }
 0x3ed   :  { %v8744_v0 = vld [vmem:[#allocation16 + $0x54] sm:$0xf]  ;;  %v7149_v6 = vor.u32 %v8960_v59, %v7146_v60  ;;  %v6737_v7 = vor.u32 %v8861_v63, %v6736_v62  ;;  %v6416_v46 = vld [vmem:[#allocation16 + $0x158] sm:$0xf] }
 0x3ee   :  { %2899 = vmatpush.bf16.msra.mxu3 %v6669_v61  ;;  %2877 = vmatpush.bf16.msra.mxu1 %v7049_v9  ;;  %v6957_v61 = vor.u32 %v8912_v52, %v6954_v53  ;;  %v6282_v1 = vld [vmem:[#allocation16 + $0x70] sm:$0xf0]  ;;  %v6608_v53 = vld [vmem:[#allocation16 + $0x2d8] sm:$0xf]  ;;  %v6417_v42 = vor.u32 %v8781_v47, %v6416_v46  ;;  %v8857_v46 = vld [vmem:[#allocation16 + $0x3dc] sm:$0xf] }
 0x3ef   :  { %v6922_v4 = vld [vmem:[#allocation16 + $0x570] sm:$0xf0]  ;;  %v6285_v10 = vor.u32 %v8744_v0, %v6282_v1  ;;  %v6384_v60 = vld [vmem:[#allocation16 + $0x118] sm:$0xf]  ;;  %v6738_v47 = vld [vmem:[#allocation16 + $0x3f8] sm:$0xf0] }
 0x3f0   :  { %2885 = vmatpush.bf16.msrb.mxu2 %v6445_v2  ;;  %2863 = vmatpush.bf16.msrb.mxu0 %v6825_v12  ;;  %v8904_v2 = vld [vmem:[#allocation16 + $0x554] sm:$0xf]  ;;  %v6704_v12 = vld [vmem:[#allocation16 + $0x398] sm:$0xf] }
 0x3f1   :  { %v8952_v8 = vld [vmem:[#allocation16 + $0x6d4] sm:$0xf]  ;;  %v6705_v21 = vor.u32 %v8853_v13, %v6704_v12  ;;  %v6352_v13 = vld [vmem:[#allocation16 + $0xd8] sm:$0xf] }
 0x3f2   :  { %2900 = vmatpush.bf16.msra.mxu3 %v6637_v11  ;;  %2878 = vmatpush.bf16.msra.mxu1 %v7017_v23  ;;  %v7114_v9 = vld [vmem:[#allocation16 + $0x6f0] sm:$0xf0]  ;;  %v6925_v11 = vor.u32 %v8904_v2, %v6922_v4  ;;  %v6576_v4 = vld [vmem:[#allocation16 + $0x298] sm:$0xf] }
 0x3f3   :  { %v8736_v14 = vld [vmem:[#allocation16 + $0x14] sm:$0xf]  ;;  %v7117_v20 = vor.u32 %v8952_v8, %v7114_v9  ;;  %v8981_v9 = vld [vmem:[#allocation16 + $0x7b4] sm:$0xf0] }
 0x3f4   :  { %2886 = vmatpush.bf16.msrb.mxu2 %v6413_v16  ;;  %2864 = vmatpush.bf16.msrb.mxu0 %v6793_v28  ;;  %v6250_v15 = vld [vmem:[#allocation16 + $0x30] sm:$0xf0]  ;;  %v8845_v28 = vld [vmem:[#allocation16 + $0x374] sm:$0xf0] }
 0x3f5   :  { %2879 = vmatmul.bf16.vlgmr.msra.gmra.mxu1 %v9941_v36  ;;  %v8896_v16 = vld [vmem:[#allocation16 + $0x514] sm:$0xf]  ;;  %v6253_v22 = vor.u32 %v8736_v14, %v6250_v15  ;;  %v6673_v34 = vor.u32 %v8845_v28, %v6672_v26  ;;  %v8765_v14 = vld [vmem:[#allocation16 + $0xf4] sm:$0xf0] }
 0x3f6   :  { %2901 = vmatpush.bf16.msra.mxu3 %v6605_v24  ;;  %2923 = vmatpush.bf16.msrb.mxu1 %v7245_v25  ;;  %v6890_v17 = vld [vmem:[#allocation16 + $0x530] sm:$0xf0]  ;;  %v6992_v15 = vld [vmem:[#allocation16 + $0x5d8] sm:$0xf] }
 0x3f7   :  { %v6893_v23 = vor.u32 %v8896_v16, %v6890_v17  ;;  %v8944_v24 = vld [vmem:[#allocation16 + $0x694] sm:$0xf]  ;;  %v8925_v16 = vld [vmem:[#allocation16 + $0x5f4] sm:$0xf0] }
 0x3f8   :  { %2887 = vmatpush.bf16.msrb.mxu2 %v6381_v29  ;;  %2865 = vmatpush.bf16.msrb.mxu0 %v6761_v41  ;;  %v7082_v25 = vld [vmem:[#allocation16 + $0x6b0] sm:$0xf0]  ;;  %v8837_v41 = vld [vmem:[#allocation16 + $0x334] sm:$0xf0]  ;;  %v6993_v26 = vor.u32 %v8925_v16, %v6992_v15  ;;  %v8841_v16 = vld [vmem:[#allocation16 + $0x35c] sm:$0xf] }
 0x3f9   :  { %v8888_v29 = vld [vmem:[#allocation16 + $0x4d4] sm:$0xf]  ;;  %v7085_v33 = vor.u32 %v8944_v24, %v7082_v25  ;;  %v7184_v24 = vld [vmem:[#allocation16 + $0x758] sm:$0xf] }
 0x3fa   :  { %2902 = vmatpush.bf16.msra.mxu3 %v6573_v39  ;;  %2924 = vmatpush.bf16.msrb.mxu1 %v7213_v40  ;;  %v6858_v30 = vld [vmem:[#allocation16 + $0x4f0] sm:$0xf0]  ;;  %v6640_v39 = vld [vmem:[#allocation16 + $0x318] sm:$0xf]  ;;  %v6449_v40 = vor.u32 %v8789_v32, %v6448_v31 }
 0x3fb   :  { %2866 = vmatmul.bf16.vlgmr.msrb.gmra.mxu0 %v9945_v57  ;;  %v6861_v35 = vor.u32 %v8888_v29, %v6858_v30  ;;  %v8936_v37 = vld [vmem:[#allocation16 + $0x654] sm:$0xf]  ;;  %v6641_v50 = vor.u32 %v8837_v41, %v6640_v39  ;;  %v6320_v28 = vld [vmem:[#allocation16 + $0x98] sm:$0xf] }
 0x3fc   :  { %2888 = vmatpush.bf16.msrb.mxu2 %v6349_v44  ;;  %2910 = vmatpush.bf16.msra.mxu0 %v6989_v48  ;;  %v7050_v38 = vld [vmem:[#allocation16 + $0x670] sm:$0xf0]  ;;  %v8757_v29 = vld [vmem:[#allocation16 + $0xb4] sm:$0xf0] }
 0x3fd   :  { %v8880_v44 = vld [vmem:[#allocation16 + $0x494] sm:$0xf]  ;;  %v7053_v48 = vor.u32 %v8936_v37, %v7050_v38  ;;  %v6960_v30 = vld [vmem:[#allocation16 + $0x598] sm:$0xf]  ;;  %v6321_v38 = vor.u32 %v8757_v29, %v6320_v28 }
 0x3fe   :  { %2903 = vmatpush.bf16.msra.mxu3 %v6541_v54  ;;  %2925 = vmatpush.bf16.msrb.mxu1 %v7181_v43  ;;  %v6826_v45 = vld [vmem:[#allocation16 + $0x4b0] sm:$0xf0]  ;;  %v8829_v54 = vld [vmem:[#allocation16 + $0x2f4] sm:$0xf0] }
 0x3ff   :  { %v8928_v49 = vld [vmem:[#allocation16 + $0x614] sm:$0xf]  ;;  %v6829_v51 = vor.u32 %v8880_v44, %v6826_v45  ;;  %v7248_v43 = vld [vmem:[#allocation16 + $0x7d8] sm:$0xf]  ;;  %v6609_v1 = vor.u32 %v8829_v54, %v6608_v53 }
 0x400   :  { %2889 = vmatpush.bf16.msrb.mxu2 %v6317_v56  ;;  %2911 = vmatpush.bf16.msra.mxu0 %v6957_v61  ;;  %v7018_v52 = vld [vmem:[#allocation16 + $0x630] sm:$0xf0]  ;;  %v8989_v56 = vld [vmem:[#allocation16 + $0x7f4] sm:$0xf0] }
 0x401   :  { %v8872_v58 = vld [vmem:[#allocation16 + $0x454] sm:$0xf]  ;;  %v8773_v61 = vld [vmem:[#allocation16 + $0x134] sm:$0xf0]  ;;  %v7021_v62 = vor.u32 %v8928_v49, %v7018_v52  ;;  %v7249_v2 = vor.u32 %v8989_v56, %v7248_v43 }
 0x402   :  { %2904 = vmatpush.bf16.msra.mxu3 %v6509_v5  ;;  %2926 = vmatpush.bf16.msrb.mxu1 %v7149_v6  ;;  %v6794_v59 = vld [vmem:[#allocation16 + $0x470] sm:$0xf0]  ;;  %v8821_v5 = vld [vmem:[#allocation16 + $0x2b4] sm:$0xf0]  ;;  %v6385_v8 = vor.u32 %v8773_v61, %v6384_v60  ;;  %v8849_v60 = vld [vmem:[#allocation16 + $0x39c] sm:$0xf] }
 0x403   :  { %v9968_v63 = vld [vmem:[%s10213_s14] sm:$0xff]  ;;  %v6577_v17 = vor.u32 %v8821_v5, %v6576_v4  ;;  %v6706_v61 = vld [vmem:[#allocation16 + $0x3b8] sm:$0xf0] }
 0x404   :  { %2890 = vmatpush.bf16.msrb.mxu2 %v6285_v10  ;;  %2912 = vmatpush.bf16.msra.mxu0 %v6925_v11  ;;  %v7216_v6 = vld [vmem:[#allocation16 + $0x798] sm:$0xf]  ;;  %v8864_v10 = vld [vmem:[#allocation16 + $0x414] sm:$0xf]  ;;  %v1328_v12 = vperm.slane %v9968_v63, 0 }
 0x405   :  { %2905 = vmatmul.bf16.vlgmr.msra.gmra.mxu3 %v9933_v55  ;;  %v6762_v11 = vld [vmem:[#allocation16 + $0x430] sm:$0xf0]  ;;  %v7217_v18 = vor.u32 %v8981_v9, %v7216_v6  ;;  %v8917_v31 = vld [vmem:[#allocation16 + $0x5b4] sm:$0xf0]  ;;  %v8793_v6 = vld [vmem:[#allocation16 + $0x1dc] sm:$0xf] }
 0x406   :  { %2949 = vmatpush.bf16.msrb.mxu3 %v6737_v7  ;;  %2927 = vmatpush.bf16.msrb.mxu1 %v7117_v20  ;;  %v6797_v7 = vor.u32 %v8872_v58, %v6794_v59  ;;  %v6765_v20 = vor.u32 %v8864_v10, %v6762_v11  ;;  %v8805_v39 = vld [vmem:[#allocation16 + $0x234] sm:$0xf0]  ;;  %v6961_v45 = vor.u32 %v8917_v31, %v6960_v30  ;;  %v8833_v30 = vld [vmem:[#allocation16 + $0x31c] sm:$0xf] }
 0x407   :  { %v8965_v41 = vld [vmem:[#allocation16 + $0x734] sm:$0xf0]  ;;  %v6709_v10 = vor.u32 %v8849_v60, %v6706_v61  ;;  %v8817_v61 = vld [vmem:[#allocation16 + $0x29c] sm:$0xf] }
 0x408   :  { %2891 = vmatpush.bf16.msrb.mxu2 %v6253_v22  ;;  %2913 = vmatpush.bf16.msra.mxu0 %v6893_v23  ;;  %v2646_v0 = vpop.f32.mrf.mxu3  ;;  %v6544_v22 = vld [vmem:[#allocation16 + $0x258] sm:$0xf] }
 0x409   :  { %v8813_v23 = vld [vmem:[#allocation16 + $0x274] sm:$0xf0] }
 0x40a   :  { %2950 = vmatpush.bf16.msrb.mxu3 %v6705_v21  ;;  %2928 = vmatpush.bf16.msrb.mxu1 %v7085_v33  ;;  %v6353_v21 = vor.u32 %v8765_v14, %v6352_v13  ;;  %v6545_v33 = vor.u32 %v8813_v23, %v6544_v22  ;;  %v8749_v49 = vld [vmem:[#allocation16 + $0x74] sm:$0xf0]  ;;  %v8785_v22 = vld [vmem:[#allocation16 + $0x19c] sm:$0xf] }
 0x40b   :  { %2892 = vmatmul.bf16.vlgmr.msrb.gmra.mxu2 %v9936_v3  ;;  %v7120_v43 = vld [vmem:[#allocation16 + $0x6d8] sm:$0xf]  ;;  %v6450_v23 = vld [vmem:[#allocation16 + $0x1b8] sm:$0xf0] }
 0x40c   :  { %2936 = vmatpush.bf16.msra.mxu2 %v6481_v27  ;;  %2914 = vmatpush.bf16.msra.mxu0 %v6861_v35  ;;  %v8973_v27 = vld [vmem:[#allocation16 + $0x774] sm:$0xf0]  ;;  %v6453_v31 = vor.u32 %v8785_v22, %v6450_v23  ;;  %v8969_v22 = vld [vmem:[#allocation16 + $0x75c] sm:$0xf] }
 0x40d   :  { %v2633_v19 = vpop.f32.mrf.mxu2  ;;  %v7185_v37 = vor.u32 %v8973_v27, %v7184_v24  ;;  %v8957_v56 = vld [vmem:[#allocation16 + $0x6f4] sm:$0xf0] }
 0x40e   :  { %2951 = vmatpush.bf16.msrb.mxu3 %v6673_v34  ;;  %2929 = vmatpush.bf16.msrb.mxu1 %v7053_v48  ;;  %v2634_v25 = vadd.f32 %v2633_v19, %v1328_v12  ;;  %v6512_v34 = vld [vmem:[#allocation16 + $0x218] sm:$0xf]  ;;  %v7121_v9 = vor.u32 %v8957_v56, %v7120_v43  ;;  %v6674_v19 = vld [vmem:[#allocation16 + $0x378] sm:$0xf0] }
 0x40f   :  { %v6288_v48 = vld [vmem:[#allocation16 + $0x58] sm:$0xf]  ;;  %v6513_v52 = vor.u32 %v8805_v39, %v6512_v34  ;;  %v6418_v39 = vld [vmem:[#allocation16 + $0x178] sm:$0xf0] }
 0x410   :  { %2937 = vmatpush.bf16.msra.mxu2 %v6449_v40  ;;  %2915 = vmatpush.bf16.msra.mxu0 %v6829_v51  ;;  %v2648_v32 = vpop.f32.mrf.mxu3  ;;  %v2647_v35 = vadd.f32 %v2646_v0, %v2634_v25  ;;  %v7152_v40 = vld [vmem:[#allocation16 + $0x718] sm:$0xf]  ;;  %v6289_v58 = vor.u32 %v8749_v49, %v6288_v48  ;;  %v8825_v48 = vld [vmem:[#allocation16 + $0x2dc] sm:$0xf] }
 0x411   :  { %v8909_v51 = vld [vmem:[#allocation16 + $0x574] sm:$0xf0]  ;;  %v7153_v53 = vor.u32 %v8965_v41, %v7152_v40  ;;  %v6642_v32 = vld [vmem:[#allocation16 + $0x338] sm:$0xf0] }
 0x412   :  { %2952 = vmatpush.bf16.msrb.mxu3 %v6641_v50  ;;  %2930 = vmatpush.bf16.msrb.mxu1 %v7021_v62  ;;  %v2672_v44 = vpop.f32.mrf.mxu1  ;;  %v6928_v50 = vld [vmem:[#allocation16 + $0x558] sm:$0xf]  ;;  %v6610_v49 = vld [vmem:[#allocation16 + $0x2f8] sm:$0xf0] }
 0x413   :  { %v6929_v59 = vor.u32 %v8909_v51, %v6928_v50  ;;  %v6256_v62 = vld [vmem:[#allocation16 + $0x18] sm:$0xf]  ;;  %v8985_v51 = vld [vmem:[#allocation16 + $0x7dc] sm:$0xf] }
 0x414   :  { %2938 = vmatpush.bf16.msra.mxu2 %v6417_v42  ;;  %2916 = vmatpush.bf16.msra.mxu0 %v6797_v7  ;;  %v6741_v42 = vor.u32 %v8857_v46, %v6738_v47  ;;  %v8741_v0 = vld [vmem:[#allocation16 + $0x34] sm:$0xf0]  ;;  %v6482_v7 = vld [vmem:[#allocation16 + $0x1f8] sm:$0xf0] }
 0x415   :  { %2931 = vmatmul.bf16.vlgmr.msrb.gmra.mxu1 %v9941_v36  ;;  %v2635_v54 = vpop.f32.mrf.mxu2  ;;  %v6257_v12 = vor.u32 %v8741_v0, %v6256_v62  ;;  %v7088_v14 = vld [vmem:[#allocation16 + $0x698] sm:$0xf]  ;;  %v6386_v43 = vld [vmem:[#allocation16 + $0x138] sm:$0xf0] }
 0x416   :  { %2953 = vmatpush.bf16.msrb.mxu3 %v6609_v1  ;;  %2975 = vmatpush.bf16.msra.mxu1 %v7249_v2  ;;  %v6896_v1 = vld [vmem:[#allocation16 + $0x518] sm:$0xf]  ;;  %v6578_v62 = vld [vmem:[#allocation16 + $0x2b8] sm:$0xf0] }
 0x417   :  { %v8901_v2 = vld [vmem:[#allocation16 + $0x534] sm:$0xf0] }
 0x418   :  { %2939 = vmatpush.bf16.msra.mxu2 %v6385_v8  ;;  %2917 = vmatpush.bf16.msra.mxu0 %v6765_v20  ;;  %v2659_v4 = vpop.f32.mrf.mxu0  ;;  %v9973_v5 = vpop.f32.mrf.mxu3  ;;  %v6897_v13 = vor.u32 %v8901_v2, %v6896_v1  ;;  %v8949_v15 = vld [vmem:[#allocation16 + $0x6b4] sm:$0xf0]  ;;  %v8977_v2 = vld [vmem:[#allocation16 + $0x79c] sm:$0xf] }
 0x419   :  { %v2660_v8 = vadd.f32 %v2659_v4, %v2647_v35  ;;  %v6864_v20 = vld [vmem:[#allocation16 + $0x4d8] sm:$0xf]  ;;  %v7089_v24 = vor.u32 %v8949_v15, %v7088_v14  ;;  %v7218_v4 = vld [vmem:[#allocation16 + $0x7b8] sm:$0xf0]  ;;  %v6581_v15 = vor.u32 %v8817_v61, %v6578_v62 }
 0x41a   :  { %2954 = vmatpush.bf16.msrb.mxu3 %v6577_v17  ;;  %2976 = vmatpush.bf16.msra.mxu1 %v7217_v18  ;;  %v2674_v11 = vpop.f32.mrf.mxu1  ;;  %v6485_v18 = vor.u32 %v8793_v6, %v6482_v7  ;;  %v7056_v28 = vld [vmem:[#allocation16 + $0x658] sm:$0xf]  ;;  %v8737_v61 = vld [vmem:[#allocation16 + $0x1c] sm:$0xf] }
 0x41b   :  { %2918 = vmatmul.bf16.vlgmr.msra.gmra.mxu0 %v9945_v57  ;;  %v9975_v17 = vadd.f32 %v2672_v44, %v2660_v8  ;;  %v8941_v29 = vld [vmem:[#allocation16 + $0x674] sm:$0xf0]  ;;  %v6354_v11 = vld [vmem:[#allocation16 + $0xf8] sm:$0xf0] }
 0x41c   :  { %2940 = vmatpush.bf16.msra.mxu2 %v6353_v21  ;;  %2962 = vmatpush.bf16.msrb.mxu0 %v6993_v26  ;;  %v8893_v21 = vld [vmem:[#allocation16 + $0x4f4] sm:$0xf0]  ;;  %v6677_v26 = vor.u32 %v8841_v16, %v6674_v19  ;;  %v7057_v40 = vor.u32 %v8941_v29, %v7056_v28  ;;  %v7221_v16 = vor.u32 %v8977_v2, %v7218_v4  ;;  %v8913_v28 = vld [vmem:[#allocation16 + $0x59c] sm:$0xf]  ;;  %v7368_v2 = vld [vmem:[#allocation17 + $0xe0] sm:$0xf] }
 0x41d   :  { %v6865_v27 = vor.u32 %v8893_v21, %v6864_v20  ;;  %v8885_v34 = vld [vmem:[#allocation16 + $0x4b4] sm:$0xf0]  ;;  %v8809_v20 = vld [vmem:[#allocation16 + $0x25c] sm:$0xf]  ;;  %v9020_v4 = vld [vmem:[#allocation17 + $0xec] sm:$0xf0] }
 0x41e   :  { %2955 = vmatpush.bf16.msrb.mxu3 %v6545_v33  ;;  %2977 = vmatpush.bf16.msra.mxu1 %v7185_v37  ;;  %v9978_v25 = vpop.f32.mrf.mxu2  ;;  %v6832_v33 = vld [vmem:[#allocation16 + $0x498] sm:$0xf]  ;;  %v6546_v21 = vld [vmem:[#allocation16 + $0x278] sm:$0xf0]  ;;  %vm3040_vm0 = vcmp.gt.f32.partialorder %v9975_v17, 0.0 }
 0x41f   :  { %v7024_v41 = vld [vmem:[#allocation16 + $0x618] sm:$0xf]  ;;  %v6833_v46 = vor.u32 %v8885_v34, %v6832_v33  ;;  %v6962_v29 = vld [vmem:[#allocation16 + $0x5b8] sm:$0xf0] }
 0x420   :  { %2941 = vmatpush.bf16.msra.mxu2 %v6321_v38  ;;  %2963 = vmatpush.bf16.msrb.mxu0 %v6961_v45  ;;  %v2661_v35 = vpop.f32.mrf.mxu0  ;;  %v2700_v37 = vpop.f32.mrf.mxu3  ;;  %v8777_v38 = vld [vmem:[#allocation16 + $0x15c] sm:$0xf]  ;;  %v6645_v45 = vor.u32 %v8833_v30, %v6642_v32  ;;  %v8933_v47 = vld [vmem:[#allocation16 + $0x634] sm:$0xf0]  ;;  %v6549_v30 = vor.u32 %v8809_v20, %v6546_v21 }
 0x421   :  { %v6421_v50 = vor.u32 %v8777_v38, %v6418_v39  ;;  %v8877_v54 = vld [vmem:[#allocation16 + $0x474] sm:$0xf0]  ;;  %v7025_v56 = vor.u32 %v8933_v47, %v7024_v41  ;;  %v6514_v35 = vld [vmem:[#allocation16 + $0x238] sm:$0xf0]  ;;  %v6965_v41 = vor.u32 %v8913_v28, %v6962_v29 }
 0x422   :  { %2956 = vmatpush.bf16.msrb.mxu3 %v6513_v52  ;;  %2978 = vmatpush.bf16.msra.mxu1 %v7153_v53  ;;  %v9981_v44 = vpop.f32.mrf.mxu1  ;;  %v7250_v52 = vld [vmem:[#allocation16 + $0x7f8] sm:$0xf0]  ;;  %v6800_v53 = vld [vmem:[#allocation16 + $0x458] sm:$0xf] }
 0x423   :  { %v7253_v60 = vor.u32 %v8985_v51, %v7250_v52  ;;  %v6801_v0 = vor.u32 %v8877_v54, %v6800_v53  ;;  %v6768_v6 = vld [vmem:[#allocation16 + $0x418] sm:$0xf]  ;;  %v8961_v37 = vld [vmem:[#allocation16 + $0x71c] sm:$0xf] }
 0x424   :  { %2942 = vmatpush.bf16.msra.mxu2 %v6289_v58  ;;  %2964 = vmatpush.bf16.msrb.mxu0 %v6929_v59  ;;  %v6613_v59 = vor.u32 %v8825_v48, %v6610_v49  ;;  %v7154_v38 = vld [vmem:[#allocation16 + $0x738] sm:$0xf0] }
 0x425   :  { %2957 = vmatmul.bf16.vlgmr.msrb.gmra.mxu3 %v9933_v55  ;;  %v8745_v47 = vld [vmem:[#allocation16 + $0x5c] sm:$0xf]  ;;  %v7157_v53 = vor.u32 %v8961_v37, %v7154_v38 }
 0x426   :  { %3001 = vmatpush.bf16.msra.mxu3 %v6741_v42  ;;  %2979 = vmatpush.bf16.msra.mxu1 %v7121_v9  ;;  %v8769_v42 = vld [vmem:[#allocation16 + $0x11c] sm:$0xf]  ;;  %v2687_v58 = vpop.f32.mrf.mxu2  ;;  %v8869_v9 = vld [vmem:[#allocation16 + $0x434] sm:$0xf0] }
 0x427   :  { %v6389_v1 = vor.u32 %v8769_v42, %v6386_v43  ;;  %v6290_v48 = vld [vmem:[#allocation16 + $0x78] sm:$0xf0] }
 0x428   :  { %2943 = vmatpush.bf16.msra.mxu2 %v6257_v12  ;;  %2965 = vmatpush.bf16.msrb.mxu0 %v6897_v13  ;;  %v9983_v7 = vpop.f32.mrf.mxu0  ;;  %v9985_v8 = vpop.f32.mrf.mxu3  ;;  %v8921_v12 = vld [vmem:[#allocation16 + $0x5dc] sm:$0xf] }
 0x429   :  { %v6994_v13 = vld [vmem:[#allocation16 + $0x5f8] sm:$0xf0] }
 0x42a   :  { %3002 = vmatpush.bf16.msra.mxu3 %v6709_v10  ;;  %2980 = vmatpush.bf16.msra.mxu1 %v7089_v24  ;;  %v8761_v10 = vld [vmem:[#allocation16 + $0xdc] sm:$0xf]  ;;  %v2726_v14 = vpop.f32.mrf.mxu1  ;;  %v6997_v23 = vor.u32 %v8921_v12, %v6994_v13 }
 0x42b   :  { %2944 = vmatmul.bf16.vlgmr.msra.gmra.mxu2 %v9936_v3  ;;  %v6357_v19 = vor.u32 %v8761_v10, %v6354_v11  ;;  %v7186_v24 = vld [vmem:[#allocation16 + $0x778] sm:$0xf0] }
 0x42c   :  { %2988 = vmatpush.bf16.msrb.mxu2 %v6485_v18  ;;  %2966 = vmatpush.bf16.msrb.mxu0 %v6865_v27  ;;  %v6769_v18 = vor.u32 %v8869_v9, %v6768_v6  ;;  %v6322_v27 = vld [vmem:[#allocation16 + $0xb8] sm:$0xf0]  ;;  %v7189_v33 = vor.u32 %v8969_v22, %v7186_v24  ;;  %v1329_v22 = vperm.slane %v9968_v63, 1  ;;  %v7352_v24 = vld [vmem:[#allocation17 + $0xc0] sm:$0xf] }
 0x42d   :  { %v8905_v49 = vld [vmem:[#allocation16 + $0x55c] sm:$0xf] }
 0x42e   :  { %3003 = vmatpush.bf16.msra.mxu3 %v6677_v26  ;;  %2981 = vmatpush.bf16.msra.mxu1 %v7057_v40  ;;  %v8753_v26 = vld [vmem:[#allocation16 + $0x9c] sm:$0xf]  ;;  %v9988_v32 = vpop.f32.mrf.mxu2  ;;  %v2686_v38 = vadd.f32 %v9978_v25, %v1329_v22  ;;  %v7400_v22 = vld [vmem:[#allocation17 + $0x120] sm:$0xf] }
 0x42f   :  { %v6325_v34 = vor.u32 %v8753_v26, %v6322_v27  ;;  %v8953_v42 = vld [vmem:[#allocation16 + $0x6dc] sm:$0xf]  ;;  %v9016_v26 = vld [vmem:[#allocation17 + $0xcc] sm:$0xf0] }
 0x430   :  { %2989 = vmatpush.bf16.msrb.mxu2 %v6453_v31  ;;  %2967 = vmatpush.bf16.msrb.mxu0 %v6833_v46  ;;  %v8801_v31 = vld [vmem:[#allocation16 + $0x21c] sm:$0xf]  ;;  %v2713_v39 = vpop.f32.mrf.mxu0  ;;  %v2752_v40 = vpop.f32.mrf.mxu3  ;;  %v9052_v46 = vld [vmem:[#allocation17 + $0x1ec] sm:$0xf0] }
 0x431   :  { %v6517_v52 = vor.u32 %v8801_v31, %v6514_v35  ;;  %v7122_v43 = vld [vmem:[#allocation16 + $0x6f8] sm:$0xf0]  ;;  %v7448_v31 = vld [vmem:[#allocation17 + $0x180] sm:$0xf]  ;;  %v9012_v40 = vld [vmem:[#allocation17 + $0xac] sm:$0xf0] }
 0x432   :  { %3004 = vmatpush.bf16.msra.mxu3 %v6645_v45  ;;  %2982 = vmatpush.bf16.msra.mxu1 %v7025_v56  ;;  %v7496_v45 = vld [vmem:[#allocation17 + $0x1e0] sm:$0xf]  ;;  %v9991_v51 = vpop.f32.mrf.mxu1  ;;  %v6293_v56 = vor.u32 %v8745_v47, %v6290_v48  ;;  %v6258_v62 = vld [vmem:[#allocation16 + $0x38] sm:$0xf0]  ;;  %v7125_v9 = vor.u32 %v8953_v42, %v7122_v43  ;;  %v9116_v42 = vld [vmem:[#allocation17 + $0x3ec] sm:$0xf0]  ;;  %v2699_v43 = vadd.f32 %v9973_v5, %v2686_v38 }
 0x433   :  { %v7497_v54 = vor.u32 %v9052_v46, %v7496_v45  ;;  %v6261_v11 = vor.u32 %v8737_v61, %v6258_v62  ;;  %v8945_v13 = vld [vmem:[#allocation16 + $0x69c] sm:$0xf]  ;;  %v7336_v39 = vld [vmem:[#allocation17 + $0xa0] sm:$0xf]  ;;  %v9112_v5 = vld [vmem:[#allocation17 + $0x3cc] sm:$0xf0] }
 0x434   :  { %2990 = vmatpush.bf16.msrb.mxu2 %v6421_v50  ;;  %2968 = vmatpush.bf16.msrb.mxu0 %v6801_v0  ;;  %v6930_v50 = vld [vmem:[#allocation16 + $0x578] sm:$0xf0] }
 0x435   :  { %2983 = vmatmul.bf16.vlgmr.msra.gmra.mxu1 %v9941_v36  ;;  %v6933_v58 = vor.u32 %v8905_v49, %v6930_v50  ;;  %v8897_v0 = vld [vmem:[#allocation16 + $0x51c] sm:$0xf]  ;;  %v7432_v49 = vld [vmem:[#allocation17 + $0x160] sm:$0xf]  ;;  %v9036_v50 = vld [vmem:[#allocation17 + $0x16c] sm:$0xf0] }
 0x436   :  { %3005 = vmatpush.bf16.msra.mxu3 %v6613_v59  ;;  %3027 = vmatpush.bf16.msrb.mxu1 %v7253_v60  ;;  %v7480_v59 = vld [vmem:[#allocation17 + $0x1c0] sm:$0xf]  ;;  %v9048_v60 = vld [vmem:[#allocation17 + $0x1cc] sm:$0xf0]  ;;  %v2739_v6 = vpop.f32.mrf.mxu2  ;;  %v7090_v14 = vld [vmem:[#allocation16 + $0x6b8] sm:$0xf0]  ;;  %v7433_v61 = vor.u32 %v9036_v50, %v7432_v49 }
 0x437   :  { %v7481_v10 = vor.u32 %v9048_v60, %v7480_v59  ;;  %v8889_v20 = vld [vmem:[#allocation16 + $0x4dc] sm:$0xf]  ;;  %v7093_v27 = vor.u32 %v8945_v13, %v7090_v14  ;;  %v2712_v60 = vadd.f32 %v9983_v7, %v2699_v43  ;;  %v9004_v13 = vld [vmem:[#allocation17 + $0x6c] sm:$0xf0]  ;;  %v7624_v14 = vld [vmem:[#allocation17 + $0x2e0] sm:$0xf] }
 0x438   :  { %2991 = vmatpush.bf16.msrb.mxu2 %v6389_v1  ;;  %2969 = vmatpush.bf16.msrb.mxu0 %v6769_v18  ;;  %v6898_v1 = vld [vmem:[#allocation16 + $0x538] sm:$0xf0]  ;;  %v7369_v18 = vor.u32 %v9020_v4, %v7368_v2  ;;  %v9084_v7 = vld [vmem:[#allocation17 + $0x2ec] sm:$0xf0]  ;;  %v3048_v43 = vmul.f32 0.01, %v9975_v17 }
 0x439   :  { %v6901_v12 = vor.u32 %v8897_v0, %v6898_v1  ;;  %v6866_v21 = vld [vmem:[#allocation16 + $0x4f8] sm:$0xf0]  ;;  %v7416_v0 = vld [vmem:[#allocation17 + $0x140] sm:$0xf]  ;;  %v9032_v1 = vld [vmem:[#allocation17 + $0x14c] sm:$0xf0] }
 0x43a   :  { %3006 = vmatpush.bf16.msra.mxu3 %v6581_v15  ;;  %3028 = vmatpush.bf16.msrb.mxu1 %v7221_v16  ;;  %v7464_v15 = vld [vmem:[#allocation17 + $0x1a0] sm:$0xf]  ;;  %v9994_v16 = vpop.f32.mrf.mxu0  ;;  %v6869_v29 = vor.u32 %v8889_v20, %v6866_v21  ;;  %v8881_v35 = vld [vmem:[#allocation16 + $0x49c] sm:$0xf]  ;;  %v9076_v50 = vld [vmem:[#allocation17 + $0x2ac] sm:$0xf0] }
 0x43b   :  { %2970 = vmatmul.bf16.vlgmr.msrb.gmra.mxu0 %v9945_v57  ;;  %v6834_v37 = vld [vmem:[#allocation16 + $0x4b8] sm:$0xf0] }
 0x43c   :  { %2992 = vmatpush.bf16.msrb.mxu2 %v6357_v19  ;;  %3014 = vmatpush.bf16.msra.mxu0 %v6997_v23  ;;  %v9044_v19 = vld [vmem:[#allocation17 + $0x1ac] sm:$0xf0]  ;;  %v2778_v23 = vpop.f32.mrf.mxu1  ;;  %v8929_v45 = vld [vmem:[#allocation16 + $0x61c] sm:$0xf]  ;;  %v6837_v47 = vor.u32 %v8881_v35, %v6834_v37  ;;  %v7384_v35 = vld [vmem:[#allocation17 + $0x100] sm:$0xf] }
 0x43d   :  { %v7465_v28 = vor.u32 %v9044_v19, %v7464_v15  ;;  %v7026_v48 = vld [vmem:[#allocation16 + $0x638] sm:$0xf0]  ;;  %v2725_v15 = vadd.f32 %v9981_v44, %v2712_v60  ;;  %v9028_v23 = vld [vmem:[#allocation17 + $0x12c] sm:$0xf0] }
 0x43e   :  { %3007 = vmatpush.bf16.msra.mxu3 %v6549_v30  ;;  %3029 = vmatpush.bf16.msrb.mxu1 %v7189_v33  ;;  %v8937_v30 = vld [vmem:[#allocation16 + $0x65c] sm:$0xf]  ;;  %v7353_v33 = vor.u32 %v9016_v26, %v7352_v24  ;;  %v7029_v59 = vor.u32 %v8929_v45, %v7026_v48  ;;  %v7720_v24 = vld [vmem:[#allocation17 + $0x3a0] sm:$0xf]  ;;  %v7625_v26 = vor.u32 %v9084_v7, %v7624_v14  ;;  %v9080_v44 = vld [vmem:[#allocation17 + $0x2cc] sm:$0xf0] }
 0x43f   :  { %v8873_v25 = vld [vmem:[#allocation16 + $0x45c] sm:$0xf]  ;;  %vm3041_vm15 = vcmp.gt.f32.partialorder %v2725_v15, 0.0  ;;  %v7592_v48 = vld [vmem:[#allocation17 + $0x2a0] sm:$0xf] }
 0x440   :  { %2993 = vmatpush.bf16.msrb.mxu2 %v6325_v34  ;;  %3015 = vmatpush.bf16.msra.mxu0 %v6965_v41  ;;  %v9040_v34 = vld [vmem:[#allocation17 + $0x18c] sm:$0xf0] }
 0x441   :  { %v7449_v46 = vor.u32 %v9040_v34, %v7448_v31  ;;  %v3049_v31 = vmul.f32 0.01, %v2725_v15  ;;  %v7401_v34 = vor.u32 %v9028_v23, %v7400_v22  ;;  %v9100_v60 = vld [vmem:[#allocation17 + $0x36c] sm:$0xf0]  ;;  %v7672_v22 = vld [vmem:[#allocation17 + $0x340] sm:$0xf] }
 0x442   :  { %3008 = vmatpush.bf16.msra.mxu3 %v6517_v52  ;;  %3030 = vmatpush.bf16.msrb.mxu1 %v7157_v53  ;;  %v2765_v52 = vpop.f32.mrf.mxu0  ;;  %v7337_v53 = vor.u32 %v9012_v40, %v7336_v39  ;;  %v9024_v39 = vld [vmem:[#allocation17 + $0x10c] sm:$0xf0]  ;;  %v7704_v40 = vld [vmem:[#allocation17 + $0x380] sm:$0xf] }
 0x443   :  { %v8008_v52 = vld [vmem:[#allocation17 + $0x5e0] sm:$0xf]  ;;  %v9096_v23 = vld [vmem:[#allocation17 + $0x34c] sm:$0xf0] }
 0x444   :  { %2994 = vmatpush.bf16.msrb.mxu2 %v6293_v56  ;;  %3016 = vmatpush.bf16.msra.mxu0 %v6933_v58  ;;  %v6802_v56 = vld [vmem:[#allocation16 + $0x478] sm:$0xf0]  ;;  %v7320_v58 = vld [vmem:[#allocation17 + $0x80] sm:$0xf] }
 0x445   :  { %3009 = vmatmul.bf16.vlgmr.msra.gmra.mxu3 %v9933_v55  ;;  %v7058_v55 = vld [vmem:[#allocation16 + $0x678] sm:$0xf0]  ;;  %v6805_v4 = vor.u32 %v8873_v25, %v6802_v56  ;;  %v7385_v25 = vor.u32 %v9024_v39, %v7384_v35 }
 0x446   :  { %4631 = vmatpush.bf16.msrb.mxu3 %v7497_v54  ;;  %3031 = vmatpush.bf16.msrb.mxu1 %v7125_v9  ;;  %v7061_v41 = vor.u32 %v8937_v30, %v7058_v55  ;;  %v7752_v54 = vld [vmem:[#allocation17 + $0x3e0] sm:$0xf] }
 0x447   :  { %v7753_v62 = vor.u32 %v9116_v42, %v7752_v54  ;;  %v7736_v9 = vld [vmem:[#allocation17 + $0x3c0] sm:$0xf]  ;;  %v3057_v54 = vsel %vm3041_vm15, %v2725_v15, %v3049_v31  ;;  %v1330_v42 = vperm.slane %v9968_v63, 2  ;;  %v7673_v31 = vor.u32 %v9096_v23, %v7672_v22 }
 0x448   :  { %2995 = vmatpush.bf16.msrb.mxu2 %v6261_v11  ;;  %3017 = vmatpush.bf16.msra.mxu0 %v6901_v12  ;;  %v10001_v2 = vpop.f32.mrf.mxu3  ;;  %v6770_v11 = vld [vmem:[#allocation16 + $0x438] sm:$0xf0]  ;;  %v7304_v12 = vld [vmem:[#allocation17 + $0x60] sm:$0xf]  ;;  %v7737_v19 = vor.u32 %v9112_v5, %v7736_v9  ;;  %v9072_v9 = vld [vmem:[#allocation17 + $0x28c] sm:$0xf0] }
 0x449   :  { %v7305_v21 = vor.u32 %v9004_v13, %v7304_v12  ;;  %v7608_v55 = vld [vmem:[#allocation17 + $0x2c0] sm:$0xf]  ;;  %v9148_v5 = vld [vmem:[#allocation17 + $0x4ec] sm:$0xf0] }
 0x44a   :  { %4632 = vmatpush.bf16.msrb.mxu3 %v7481_v10  ;;  %3032 = vmatpush.bf16.msrb.mxu1 %v7093_v27  ;;  %v8865_v10 = vld [vmem:[#allocation16 + $0x41c] sm:$0xf]  ;;  %v9108_v27 = vld [vmem:[#allocation17 + $0x3ac] sm:$0xf0]  ;;  %v7609_v45 = vor.u32 %v9080_v44, %v7608_v55  ;;  %v7992_v12 = vld [vmem:[#allocation17 + $0x5c0] sm:$0xf] }
 0x44b   :  { %2996 = vmatmul.bf16.vlgmr.msrb.gmra.mxu2 %v9936_v3  ;;  %v9008_v3 = vld [vmem:[#allocation17 + $0x8c] sm:$0xf0]  ;;  %v6773_v20 = vor.u32 %v8865_v10, %v6770_v11  ;;  %v7721_v37 = vor.u32 %v9108_v27, %v7720_v24  ;;  %v10013_v10 = vpack.c.bf16 %v3057_v54, %v3057_v54  ;;  %v2738_v11 = vadd.f32 %v9988_v32, %v1330_v42  ;;  %v7560_v32 = vld [vmem:[#allocation17 + $0x260] sm:$0xf] }
 0x44c   :  { %4618 = vmatpush.bf16.msra.mxu2 %v7369_v18  ;;  %3018 = vmatpush.bf16.msra.mxu0 %v6869_v29  ;;  %v7321_v6 = vor.u32 %v9008_v3, %v7320_v58  ;;  %v7417_v18 = vor.u32 %v9032_v1, %v7416_v0  ;;  %v9000_v29 = vld [vmem:[#allocation17 + $0x4c] sm:$0xf0]  ;;  %v7576_v1 = vld [vmem:[#allocation17 + $0x280] sm:$0xf] }
 0x44d   :  { %v8992_v0 = vld [vmem:[#allocation17 + $0xc] sm:$0xf0]  ;;  %v7976_v55 = vld [vmem:[#allocation17 + $0x5a0] sm:$0xf] }
 0x44e   :  { %4633 = vmatpush.bf16.msrb.mxu3 %v7465_v28  ;;  %3033 = vmatpush.bf16.msrb.mxu1 %v7061_v41  ;;  %v7288_v28 = vld [vmem:[#allocation17 + $0x40] sm:$0xf]  ;;  %v2789_v30 = vpop.f32.mrf.mxu2  ;;  %v9104_v41 = vld [vmem:[#allocation17 + $0x38c] sm:$0xf0] }
 0x44f   :  { %v7705_v58 = vor.u32 %v9104_v41, %v7704_v40  ;;  %v9176_v13 = vld [vmem:[#allocation17 + $0x5cc] sm:$0xf0]  ;;  %v7528_v42 = vld [vmem:[#allocation17 + $0x220] sm:$0xf] }
 0x450   :  { %4619 = vmatpush.bf16.msra.mxu2 %v7353_v33  ;;  %3019 = vmatpush.bf16.msra.mxu0 %v6837_v47  ;;  %v1331_v33 = vperm.slane %v9968_v63, 3  ;;  %v2804_v38 = vpop.f32.mrf.mxu3  ;;  %v8996_v47 = vld [vmem:[#allocation17 + $0x2c] sm:$0xf0]  ;;  %v7912_v23 = vld [vmem:[#allocation17 + $0x520] sm:$0xf] }
 0x451   :  { %v9068_v27 = vld [vmem:[#allocation17 + $0x26c] sm:$0xf0] }
 0x452   :  { %4634 = vmatpush.bf16.msrb.mxu3 %v7449_v46  ;;  %3034 = vmatpush.bf16.msrb.mxu1 %v7029_v59  ;;  %v7272_v46 = vld [vmem:[#allocation17 + $0x20] sm:$0xf]  ;;  %v10006_v49 = vpop.f32.mrf.mxu1  ;;  %v2790_v56 = vadd.f32 %v2789_v30, %v1331_v33  ;;  %v2751_v30 = vadd.f32 %v9985_v8, %v2738_v11  ;;  %v9172_v44 = vld [vmem:[#allocation17 + $0x5ac] sm:$0xf0] }
 0x453   :  { %v7273_v3 = vor.u32 %v8996_v47, %v7272_v46  ;;  %v7688_v59 = vld [vmem:[#allocation17 + $0x360] sm:$0xf]  ;;  %v9092_v38 = vld [vmem:[#allocation17 + $0x32c] sm:$0xf0] }
 0x454   :  { %4620 = vmatpush.bf16.msra.mxu2 %v7337_v53  ;;  %3020 = vmatpush.bf16.msra.mxu0 %v6805_v4  ;;  %v9180_v53 = vld [vmem:[#allocation17 + $0x5ec] sm:$0xf0]  ;;  %v7689_v14 = vor.u32 %v9100_v60, %v7688_v59  ;;  %v2803_v7 = vadd.f32 %v10001_v2, %v2790_v56  ;;  %v2764_v33 = vadd.f32 %v9994_v16, %v2751_v30  ;;  %v7848_v8 = vld [vmem:[#allocation17 + $0x4a0] sm:$0xf] }
 0x455   :  { %3035 = vmatmul.bf16.vlgmr.msrb.gmra.mxu1 %v9941_v36  ;;  %v7289_v36 = vor.u32 %v9000_v29, %v7288_v28  ;;  %v8009_v4 = vor.u32 %v9180_v53, %v8008_v52  ;;  %v7864_v28 = vld [vmem:[#allocation17 + $0x4c0] sm:$0xf]  ;;  %v9144_v2 = vld [vmem:[#allocation17 + $0x4cc] sm:$0xf0]  ;;  %v7993_v29 = vor.u32 %v9176_v13, %v7992_v12 }
 0x456   :  { %4635 = vmatpush.bf16.msrb.mxu3 %v7433_v61  ;;  %4657 = vmatpush.bf16.msra.mxu1 %v7753_v62  ;;  %v7593_v61 = vor.u32 %v9076_v50, %v7592_v48  ;;  %v7256_v62 = vld [vmem:[#allocation17] sm:$0xf]  ;;  %v7865_v35 = vor.u32 %v9144_v2, %v7864_v28  ;;  %v9064_v40 = vld [vmem:[#allocation17 + $0x24c] sm:$0xf0]  ;;  %v2777_v52 = vadd.f32 %v9991_v51, %v2764_v33 }
 0x457   :  { %v9140_v41 = vld [vmem:[#allocation17 + $0x4ac] sm:$0xf0]  ;;  %v7960_v46 = vld [vmem:[#allocation17 + $0x580] sm:$0xf] }
 0x458   :  { %4621 = vmatpush.bf16.msra.mxu2 %v7321_v6  ;;  %3021 = vmatpush.bf16.msra.mxu0 %v6773_v20  ;;  %v2791_v6 = vpop.f32.mrf.mxu2  ;;  %v2815_v15 = vpop.f32.mrf.mxu0  ;;  %v7577_v20 = vor.u32 %v9072_v9, %v7576_v1  ;;  %v9168_v47 = vld [vmem:[#allocation17 + $0x58c] sm:$0xf0]  ;;  %v7640_v50 = vld [vmem:[#allocation17 + $0x300] sm:$0xf]  ;;  %v7849_v54 = vor.u32 %v9140_v41, %v7848_v8  ;;  %vm3042_vm2 = vcmp.gt.f32.partialorder %v2777_v52, 0.0 }
 0x459   :  { %v2816_v24 = vadd.f32 %v2815_v15, %v2803_v7  ;;  %v7832_v56 = vld [vmem:[#allocation17 + $0x480] sm:$0xf]  ;;  %v9164_v60 = vld [vmem:[#allocation17 + $0x56c] sm:$0xf0]  ;;  %v9050_v8 = vld [vmem:[#allocation17 + $0x1e4] sm:$0xf] }
 0x45a   :  { %4636 = vmatpush.bf16.msrb.mxu3 %v7417_v18  ;;  %4658 = vmatpush.bf16.msra.mxu1 %v7737_v19  ;;  %v7257_v18 = vor.u32 %v8992_v0, %v7256_v62  ;;  %v3056_v19 = vsel %vm3040_vm0, %v9975_v17, %v3048_v43  ;;  %v7944_v59 = vld [vmem:[#allocation17 + $0x560] sm:$0xf]  ;;  %v3050_v62 = vmul.f32 0.01, %v2777_v52  ;;  %v9056_v6 = vld [vmem:[#allocation17 + $0x20c] sm:$0xf0] }
 0x45b   :  { %3022 = vmatmul.bf16.vlgmr.msra.gmra.mxu0 %v9945_v57  ;;  %v7880_v57 = vld [vmem:[#allocation17 + $0x4e0] sm:$0xf]  ;;  %v10022_v17 = vpack.c.bf16 %v3056_v19, %v3056_v19  ;;  %v2829_v39 = vadd.f32 %v10006_v49, %v2816_v24  ;;  %v9088_v49 = vld [vmem:[#allocation17 + $0x30c] sm:$0xf0]  ;;  %v7945_v11 = vor.u32 %v9164_v60, %v7944_v59  ;;  %v7498_v41 = vld [vmem:[#allocation17 + $0x1f0] sm:$0xf0] }
 0x45c   :  { %4622 = vmatpush.bf16.msra.mxu2 %v7305_v21  ;;  %4644 = vmatpush.bf16.msrb.mxu0 %v7625_v26  ;;  %v7881_v21 = vor.u32 %v9148_v5, %v7880_v57  ;;  %v2830_v26 = vpop.f32.mrf.mxu1  ;;  %v7816_v57 = vld [vmem:[#allocation17 + $0x460] sm:$0xf]  ;;  %v9132_v5 = vld [vmem:[#allocation17 + $0x46c] sm:$0xf0]  ;;  %v3058_v24 = vsel %vm3042_vm2, %v2777_v52, %v3050_v62  ;;  %v9014_v60 = vld [vmem:[#allocation17 + $0xc4] sm:$0xf] }
 0x45d   :  { %v3051_v43 = vmul.f32 0.01, %v2829_v39  ;;  %vm3043_vm1 = vcmp.gt.f32.partialorder %v2829_v39, 0.0  ;;  %v7928_v12 = vld [vmem:[#allocation17 + $0x540] sm:$0xf]  ;;  %v7817_v19 = vor.u32 %v9132_v5, %v7816_v57 }
 0x45e   :  { %4637 = vmatpush.bf16.msrb.mxu3 %v7401_v34  ;;  %4659 = vmatpush.bf16.msra.mxu1 %v7721_v37  ;;  %v7561_v34 = vor.u32 %v9068_v27, %v7560_v32  ;;  %v7656_v37 = vld [vmem:[#allocation17 + $0x320] sm:$0xf]  ;;  %v9160_v13 = vld [vmem:[#allocation17 + $0x54c] sm:$0xf0]  ;;  %v9042_v57 = vld [vmem:[#allocation17 + $0x1a4] sm:$0xf] }
 0x45f   :  { %v7657_v16 = vor.u32 %v9092_v38, %v7656_v37  ;;  %v3059_v9 = vsel %vm3043_vm1, %v2829_v39, %v3051_v43  ;;  %v9212_v7 = vld [vmem:[#allocation17 + $0x6ec] sm:$0xf0]  ;;  %v7929_v22 = vor.u32 %v9160_v13, %v7928_v12  ;;  %v8120_v28 = vld [vmem:[#allocation17 + $0x6c0] sm:$0xf]  ;;  %v7482_v43 = vld [vmem:[#allocation17 + $0x1d0] sm:$0xf0] }
 0x460   :  { %4623 = vmatpush.bf16.msra.mxu2 %v7289_v36  ;;  %4645 = vmatpush.bf16.msrb.mxu0 %v7609_v45  ;;  %v7544_v36 = vld [vmem:[#allocation17 + $0x240] sm:$0xf]  ;;  %v7977_v45 = vor.u32 %v9172_v44, %v7976_v55  ;;  %v2817_v48 = vpop.f32.mrf.mxu0  ;;  %v10030_v15 = vpack.c.bf16 %v3059_v9, %v3059_v9  ;;  %v9156_v27 = vld [vmem:[#allocation17 + $0x52c] sm:$0xf0]  ;;  %v10034_v44 = vpack.c.bf16 %v3058_v24, %v3058_v24  ;;  %v7466_v5 = vld [vmem:[#allocation17 + $0x1b0] sm:$0xf0] }
 0x461   :  { %v7545_v53 = vor.u32 %v9064_v40, %v7544_v36  ;;  %v9208_v2 = vld [vmem:[#allocation17 + $0x6cc] sm:$0xf0]  ;;  %v8104_v36 = vld [vmem:[#allocation17 + $0x6a0] sm:$0xf]  ;;  %v9010_v12 = vld [vmem:[#allocation17 + $0xa4] sm:$0xf] }
 0x462   :  { %4638 = vmatpush.bf16.msrb.mxu3 %v7385_v25  ;;  %4660 = vmatpush.bf16.msra.mxu1 %v7705_v58  ;;  %v9060_v25 = vld [vmem:[#allocation17 + $0x22c] sm:$0xf0]  ;;  %v8121_v37 = vor.u32 %v9208_v2, %v8120_v28  ;;  %v7338_v13 = vld [vmem:[#allocation17 + $0xb0] sm:$0xf0]  ;;  %v8264_v2 = vld [vmem:[#allocation17 + $0x7e0] sm:$0xf] }
 0x463   :  { %v9136_v58 = vld [vmem:[#allocation17 + $0x48c] sm:$0xf0]  ;;  %v7529_v0 = vor.u32 %v9060_v25, %v7528_v42  ;;  %v9046_v25 = vld [vmem:[#allocation17 + $0x1c4] sm:$0xf] }
 0x464   :  { %4624 = vmatpush.bf16.msra.mxu2 %v7273_v3  ;;  %4646 = vmatpush.bf16.msrb.mxu0 %v7593_v61  ;;  %v7961_v3 = vor.u32 %v9168_v47, %v7960_v46  ;;  %v7641_v61 = vor.u32 %v9088_v49, %v7640_v50  ;;  %v7833_v1 = vor.u32 %v9136_v58, %v7832_v56  ;;  %v9124_v33 = vld [vmem:[#allocation17 + $0x42c] sm:$0xf0]  ;;  %v7768_v46 = vld [vmem:[#allocation17 + $0x400] sm:$0xf] }
 0x465   :  { %4639 = vmatmul.bf16.vlgmr.msrb.gmra.mxu3 %v10013_v10  ;;  %v9152_v38 = vld [vmem:[#allocation17 + $0x50c] sm:$0xf0]  ;;  %v8088_v49 = vld [vmem:[#allocation17 + $0x680] sm:$0xf] }
 0x466   :  { %4683 = vmatpush.bf16.msra.mxu3 %v8009_v4  ;;  %4661 = vmatpush.bf16.msra.mxu1 %v7689_v14  ;;  %v7512_v4 = vld [vmem:[#allocation17 + $0x200] sm:$0xf]  ;;  %v9204_v39 = vld [vmem:[#allocation17 + $0x6ac] sm:$0xf0] }
 0x467   :  { %v8136_v14 = vld [vmem:[#allocation17 + $0x6e0] sm:$0xf]  ;;  %v9120_v47 = vld [vmem:[#allocation17 + $0x40c] sm:$0xf0]  ;;  %v8105_v50 = vor.u32 %v9204_v39, %v8104_v36 }
 0x468   :  { %4625 = vmatpush.bf16.msra.mxu2 %v7257_v18  ;;  %4647 = vmatpush.bf16.msrb.mxu0 %v7577_v20  ;;  %v10028_v51 = vpop.f32.mrf.mxu3  ;;  %v7513_v18 = vor.u32 %v9056_v6, %v7512_v4  ;;  %v7800_v20 = vld [vmem:[#allocation17 + $0x440] sm:$0xf]  ;;  %v8137_v32 = vor.u32 %v9212_v7, %v8136_v14  ;;  %v9200_v42 = vld [vmem:[#allocation17 + $0x68c] sm:$0xf0]  ;;  %v7769_v58 = vor.u32 %v9120_v47, %v7768_v46 }
 0x469   :  { %v8072_v4 = vld [vmem:[#allocation17 + $0x660] sm:$0xf]  ;;  %v9196_v6 = vld [vmem:[#allocation17 + $0x66c] sm:$0xf0] }
 0x46a   :  { %4684 = vmatpush.bf16.msra.mxu3 %v7993_v29  ;;  %4662 = vmatpush.bf16.msra.mxu1 %v7673_v31  ;;  %v1332_v29 = vperm.slane %v9968_v63, 4  ;;  %v7784_v31 = vld [vmem:[#allocation17 + $0x420] sm:$0xf]  ;;  %v8073_v14 = vor.u32 %v9196_v6, %v8072_v4  ;;  %v9240_v39 = vld [vmem:[#allocation17 + $0x7cc] sm:$0xf0] }
 0x46b   :  { %4626 = vmatmul.bf16.vlgmr.msra.gmra.mxu2 %v10022_v17  ;;  %v8056_v7 = vld [vmem:[#allocation17 + $0x640] sm:$0xf]  ;;  %v9232_v6 = vld [vmem:[#allocation17 + $0x78c] sm:$0xf0] }
 0x46c   :  { %4670 = vmatpush.bf16.msrb.mxu2 %v7881_v21  ;;  %4648 = vmatpush.bf16.msrb.mxu0 %v7561_v34  ;;  %v9128_v21 = vld [vmem:[#allocation17 + $0x44c] sm:$0xf0]  ;;  %v7913_v34 = vor.u32 %v9156_v27, %v7912_v23  ;;  %v9006_v27 = vld [vmem:[#allocation17 + $0x84] sm:$0xf]  ;;  %v8248_v36 = vld [vmem:[#allocation17 + $0x7c0] sm:$0xf] }
 0x46d   :  { %v7801_v55 = vor.u32 %v9128_v21, %v7800_v20  ;;  %v9192_v20 = vld [vmem:[#allocation17 + $0x64c] sm:$0xf0]  ;;  %v9038_v21 = vld [vmem:[#allocation17 + $0x184] sm:$0xf]  ;;  %v8249_v46 = vor.u32 %v9240_v39, %v8248_v36  ;;  %v8216_v4 = vld [vmem:[#allocation17 + $0x780] sm:$0xf] }
 0x46e   :  { %4685 = vmatpush.bf16.msra.mxu3 %v7977_v45  ;;  %4663 = vmatpush.bf16.msra.mxu1 %v7657_v16  ;;  %v2841_v26 = vpop.f32.mrf.mxu2  ;;  %v7785_v45 = vor.u32 %v9124_v33, %v7784_v31  ;;  %v9018_v16 = vld [vmem:[#allocation17 + $0xe4] sm:$0xf]  ;;  %v8057_v28 = vor.u32 %v9192_v20, %v8056_v7  ;;  %v8040_v31 = vld [vmem:[#allocation17 + $0x620] sm:$0xf]  ;;  %v9188_v33 = vld [vmem:[#allocation17 + $0x62c] sm:$0xf0] }
 0x46f   :  { %v2842_v63 = vadd.f32 %v2841_v26, %v1332_v29  ;;  %v7341_v26 = vor.u32 %v9010_v12, %v7338_v13  ;;  %v9244_v29 = vld [vmem:[#allocation17 + $0x7ec] sm:$0xf0]  ;;  %v8217_v12 = vor.u32 %v9232_v6, %v8216_v4  ;;  %v9022_v7 = vld [vmem:[#allocation17 + $0x104] sm:$0xf]  ;;  %v8184_v39 = vld [vmem:[#allocation17 + $0x740] sm:$0xf] }
 0x470   :  { %4671 = vmatpush.bf16.msrb.mxu2 %v7865_v35  ;;  %4649 = vmatpush.bf16.msrb.mxu0 %v7545_v53  ;;  %v2856_v30 = vpop.f32.mrf.mxu3  ;;  %v7896_v35 = vld [vmem:[#allocation17 + $0x500] sm:$0xf]  ;;  %v7370_v53 = vld [vmem:[#allocation17 + $0xf0] sm:$0xf0]  ;;  %v9074_v20 = vld [vmem:[#allocation17 + $0x2a4] sm:$0xf] }
 0x471   :  { %v7897_v48 = vor.u32 %v9152_v38, %v7896_v35  ;;  %v2855_v56 = vadd.f32 %v10028_v51, %v2842_v63  ;;  %v7373_v59 = vor.u32 %v9018_v16, %v7370_v53  ;;  %v7322_v30 = vld [vmem:[#allocation17 + $0x90] sm:$0xf0]  ;;  %v9034_v35 = vld [vmem:[#allocation17 + $0x164] sm:$0xf]  ;;  %v9216_v4 = vld [vmem:[#allocation17 + $0x70c] sm:$0xf0] }
 0x472   :  { %4686 = vmatpush.bf16.msra.mxu3 %v7961_v3  ;;  %4664 = vmatpush.bf16.msra.mxu1 %v7641_v61  ;;  %v2880_v40 = vpop.f32.mrf.mxu1  ;;  %v8089_v61 = vor.u32 %v9200_v42, %v8088_v49  ;;  %v9002_v38 = vld [vmem:[#allocation17 + $0x64] sm:$0xf]  ;;  %v7418_v63 = vld [vmem:[#allocation17 + $0x150] sm:$0xf0]  ;;  %v9236_v49 = vld [vmem:[#allocation17 + $0x7ac] sm:$0xf0] }
 0x473   :  { %v9082_v53 = vld [vmem:[#allocation17 + $0x2e4] sm:$0xf] }
 0x474   :  { %4672 = vmatpush.bf16.msrb.mxu2 %v7849_v54  ;;  %4650 = vmatpush.bf16.msrb.mxu0 %v7529_v0  ;;  %v7501_v54 = vor.u32 %v9050_v8, %v7498_v41  ;;  %v7354_v0 = vld [vmem:[#allocation17 + $0xd0] sm:$0xf0]  ;;  %v9030_v41 = vld [vmem:[#allocation17 + $0x144] sm:$0xf] }
 0x475   :  { %4665 = vmatmul.bf16.vlgmr.msra.gmra.mxu1 %v10030_v15  ;;  %v7357_v51 = vor.u32 %v9014_v60, %v7354_v0  ;;  %v7306_v8 = vld [vmem:[#allocation17 + $0x70] sm:$0xf0] }
 0x476   :  { %4687 = vmatpush.bf16.msra.mxu3 %v7945_v11  ;;  %v2843_v52 = vpop.f32.mrf.mxu2  ;;  %v7610_v0 = vld [vmem:[#allocation17 + $0x2d0] sm:$0xf0] }
 0x477   :  { %v8232_v52 = vld [vmem:[#allocation17 + $0x7a0] sm:$0xf] }
 0x478   :  { %4673 = vmatpush.bf16.msrb.mxu2 %v7833_v1  ;;  %4651 = vmatpush.bf16.msrb.mxu0 %v7513_v18  ;;  %v2867_v3 = vpop.f32.mrf.mxu0  ;;  %v7485_v1 = vor.u32 %v9046_v25, %v7482_v43  ;;  %v8233_v42 = vor.u32 %v9236_v49, %v8232_v52  ;;  %v7309_v25 = vor.u32 %v9002_v38, %v7306_v8  ;;  %v8168_v49 = vld [vmem:[#allocation17 + $0x720] sm:$0xf] }
 0x479   :  { %v2868_v62 = vadd.f32 %v2867_v3, %v2855_v56  ;;  %v8998_v56 = vld [vmem:[#allocation17 + $0x44] sm:$0xf]  ;;  %v7421_v3 = vor.u32 %v9030_v41, %v7418_v63  ;;  %v7866_v63 = vld [vmem:[#allocation17 + $0x4d0] sm:$0xf0] }
 0x47a   :  { %4688 = vmatpush.bf16.msra.mxu3 %v7929_v22  ;;  %v2882_v9 = vpop.f32.mrf.mxu1  ;;  %v7450_v22 = vld [vmem:[#allocation17 + $0x190] sm:$0xf0]  ;;  %v9142_v41 = vld [vmem:[#allocation17 + $0x4c4] sm:$0xf] }
 0x47b   :  { %4652 = vmatmul.bf16.vlgmr.msrb.gmra.mxu0 %v10034_v44  ;;  %v2881_v11 = vadd.f32 %v2880_v40, %v2868_v62  ;;  %v7325_v40 = vor.u32 %v9006_v27, %v7322_v30  ;;  %v9078_v62 = vld [vmem:[#allocation17 + $0x2c4] sm:$0xf]  ;;  %v10046_v9 = vld [vmem:[%s10213_s14] sm:$0xff] }
 0x47c   :  { %4674 = vmatpush.bf16.msrb.mxu2 %v7817_v19  ;;  %4696 = vmatpush.bf16.msra.mxu0 %v8137_v32  ;;  %v7469_v19 = vor.u32 %v9042_v57, %v7466_v5  ;;  %v1333_v57 = vperm.slane %v10046_v9, 5  ;;  %v9146_v30 = vld [vmem:[#allocation17 + $0x4e4] sm:$0xf] }
 0x47d   :  { %vm3044_vm3 = vcmp.gt.f32.partialorder %v2881_v11, 0.0  ;;  %v3052_v18 = vmul.f32 0.01, %v2881_v11 }
 0x47e   :  { %4689 = vmatpush.bf16.msra.mxu3 %v7913_v34  ;;  %v8265_v34 = vor.u32 %v9244_v29, %v8264_v2  ;;  %v7258_v29 = vld [vmem:[#allocation17 + $0x10] sm:$0xf0] }
 0x47f   :  { %v3060_v23 = vsel %vm3044_vm3, %v2881_v11, %v3052_v18  ;;  %v8994_v11 = vld [vmem:[#allocation17 + $0x24] sm:$0xf]  ;;  %v7386_v18 = vld [vmem:[#allocation17 + $0x110] sm:$0xf0] }
 0x480   :  { %4675 = vmatpush.bf16.msrb.mxu2 %v7801_v55  ;;  %4697 = vmatpush.bf16.msra.mxu0 %v8121_v37  ;;  %v10038_v32 = vpack.c.bf16 %v3060_v23, %v3060_v23  ;;  %v2869_v24 = vpop.f32.mrf.mxu0  ;;  %v7453_v55 = vor.u32 %v9038_v21, %v7450_v22  ;;  %v7434_v37 = vld [vmem:[#allocation17 + $0x170] sm:$0xf0]  ;;  %v8200_v22 = vld [vmem:[#allocation17 + $0x760] sm:$0xf]  ;;  %v9228_v23 = vld [vmem:[#allocation17 + $0x76c] sm:$0xf0] }
 0x481   :  { %4709 = vmatpush.bf16.msrb.mxu1 %v8265_v34  ;;  %v7437_v16 = vor.u32 %v9034_v35, %v7434_v37  ;;  %v7594_v21 = vld [vmem:[#allocation17 + $0x2b0] sm:$0xf0]  ;;  %v8201_v24 = vor.u32 %v9228_v23, %v8200_v22  ;;  %v9070_v34 = vld [vmem:[#allocation17 + $0x284] sm:$0xf] }
 0x482   :  { %4690 = vmatpush.bf16.msra.mxu3 %v7897_v48  ;;  %v8024_v48 = vld [vmem:[#allocation17 + $0x600] sm:$0xf]  ;;  %v7578_v35 = vld [vmem:[#allocation17 + $0x290] sm:$0xf0] }
 0x483   :  { %v7530_v22 = vld [vmem:[#allocation17 + $0x230] sm:$0xf0] }
 0x484   :  { %4676 = vmatpush.bf16.msrb.mxu2 %v7785_v45  ;;  %4698 = vmatpush.bf16.msra.mxu0 %v8105_v50  ;;  %v8041_v45 = vor.u32 %v9188_v33, %v8040_v31  ;;  %v9184_v50 = vld [vmem:[#allocation17 + $0x60c] sm:$0xf0]  ;;  %v7389_v31 = vor.u32 %v9022_v7, %v7386_v18  ;;  %v7597_v33 = vor.u32 %v9074_v20, %v7594_v21  ;;  %v7994_v7 = vld [vmem:[#allocation17 + $0x5d0] sm:$0xf0]  ;;  %v9058_v21 = vld [vmem:[#allocation17 + $0x224] sm:$0xf] }
 0x485   :  { %4710 = vmatpush.bf16.msrb.mxu1 %v8249_v46  ;;  %v8025_v43 = vor.u32 %v9184_v50, %v8024_v48  ;;  %v9066_v48 = vld [vmem:[#allocation17 + $0x264] sm:$0xf]  ;;  %v7562_v50 = vld [vmem:[#allocation17 + $0x270] sm:$0xf0] }
 0x486   :  { %4735 = vmatpush.bf16.msrb.mxu3 %v7501_v54  ;;  %v7626_v54 = vld [vmem:[#allocation17 + $0x2f0] sm:$0xf0] }
 0x487   :  { %v7629_v60 = vor.u32 %v9082_v53, %v7626_v54  ;;  %v7869_v54 = vor.u32 %v9142_v41, %v7866_v63  ;;  %v7754_v20 = vld [vmem:[#allocation17 + $0x3f0] sm:$0xf0]  ;;  %v9166_v63 = vld [vmem:[#allocation17 + $0x584] sm:$0xf] }
 0x488   :  { %4677 = vmatpush.bf16.msrb.mxu2 %v7769_v58  ;;  %4699 = vmatpush.bf16.msra.mxu0 %v8089_v61  ;;  %v10041_v47 = vpop.f32.mrf.mxu3  ;;  %v7290_v58 = vld [vmem:[#allocation17 + $0x50] sm:$0xf0] }
 0x489   :  { %v7402_v61 = vld [vmem:[#allocation17 + $0x130] sm:$0xf0]  ;;  %4711 = vmatpush.bf16.msrb.mxu1 %v8233_v42  ;;  %v7293_v5 = vor.u32 %v8998_v56, %v7290_v58  ;;  %v9220_v42 = vld [vmem:[#allocation17 + $0x72c] sm:$0xf0]  ;;  %v7565_v56 = vor.u32 %v9066_v48, %v7562_v50 }
 0x48a   :  { %4736 = vmatpush.bf16.msrb.mxu3 %v7485_v1  ;;  %v8169_v58 = vor.u32 %v9220_v42, %v8168_v49  ;;  %v7802_v41 = vld [vmem:[#allocation17 + $0x450] sm:$0xf0] }
 0x48b   :  { %4678 = vmatmul.bf16.vlgmr.msrb.gmra.mxu2 %v10038_v32  ;;  %v7706_v49 = vld [vmem:[#allocation17 + $0x390] sm:$0xf0] }
 0x48c   :  { %4722 = vmatpush.bf16.msra.mxu2 %v7373_v59  ;;  %4700 = vmatpush.bf16.msra.mxu0 %v8073_v14  ;;  %v9026_v59 = vld [vmem:[#allocation17 + $0x124] sm:$0xf]  ;;  %v7786_v42 = vld [vmem:[#allocation17 + $0x430] sm:$0xf0] }
 0x48d   :  { %v7405_v14 = vor.u32 %v9026_v59, %v7402_v61  ;;  %4712 = vmatpush.bf16.msrb.mxu1 %v8217_v12  ;;  %v8010_v59 = vld [vmem:[#allocation17 + $0x5f0] sm:$0xf0] }
 0x48e   :  { %4737 = vmatpush.bf16.msrb.mxu3 %v7469_v19  ;;  %v2893_v1 = vpop.f32.mrf.mxu2  ;;  %v7613_v19 = vor.u32 %v9078_v62, %v7610_v0  ;;  %v7546_v62 = vld [vmem:[#allocation17 + $0x250] sm:$0xf0] }
 0x48f   :  { %v2894_v2 = vadd.f32 %v2893_v1, %v1333_v57  ;;  %v8152_v1 = vld [vmem:[#allocation17 + $0x700] sm:$0xf] }
 0x490   :  { %4723 = vmatpush.bf16.msra.mxu2 %v7357_v51  ;;  %4701 = vmatpush.bf16.msra.mxu0 %v8057_v28  ;;  %v7274_v51 = vld [vmem:[#allocation17 + $0x30] sm:$0xf0]  ;;  %v2908_v13 = vpop.f32.mrf.mxu3  ;;  %v8990_v28 = vld [vmem:[#allocation17 + $0x4] sm:$0xf]  ;;  %v8153_v12 = vor.u32 %v9216_v4, %v8152_v1 }
 0x491   :  { %v7277_v27 = vor.u32 %v8994_v11, %v7274_v51  ;;  %4713 = vmatpush.bf16.msrb.mxu1 %v8201_v24  ;;  %v7261_v38 = vor.u32 %v8990_v28, %v7258_v29  ;;  %v2907_v8 = vadd.f32 %v10041_v47, %v2894_v2  ;;  %v7850_v47 = vld [vmem:[#allocation17 + $0x4b0] sm:$0xf0]  ;;  %v9174_v51 = vld [vmem:[#allocation17 + $0x5c4] sm:$0xf] }
 0x492   :  { %4738 = vmatpush.bf16.msrb.mxu3 %v7453_v55  ;;  %v7882_v55 = vld [vmem:[#allocation17 + $0x4f0] sm:$0xf0]  ;;  %v9110_v28 = vld [vmem:[#allocation17 + $0x3c4] sm:$0xf] }
 0x493   :  { %v7885_v36 = vor.u32 %v9146_v30, %v7882_v55  ;;  %v7834_v11 = vld [vmem:[#allocation17 + $0x490] sm:$0xf0]  ;;  %v9170_v30 = vld [vmem:[#allocation17 + $0x5a4] sm:$0xf] }
 0x494   :  { %4724 = vmatpush.bf16.msra.mxu2 %v7341_v26  ;;  %4702 = vmatpush.bf16.msra.mxu0 %v8041_v45  ;;  %v2932_v26 = vpop.f32.mrf.mxu1  ;;  %v7581_v45 = vor.u32 %v9070_v34, %v7578_v35  ;;  %v7738_v2 = vld [vmem:[#allocation17 + $0x3d0] sm:$0xf0]  ;;  %v9054_v35 = vld [vmem:[#allocation17 + $0x204] sm:$0xf] }
 0x495   :  { %v7818_v29 = vld [vmem:[#allocation17 + $0x470] sm:$0xf0]  ;;  %v9158_v4 = vld [vmem:[#allocation17 + $0x544] sm:$0xf] }
 0x496   :  { %4739 = vmatpush.bf16.msrb.mxu3 %v7437_v16  ;;  %v2895_v37 = vpop.f32.mrf.mxu2  ;;  %v7978_v55 = vld [vmem:[#allocation17 + $0x5b0] sm:$0xf0] }
 0x497   :  { %v7514_v37 = vld [vmem:[#allocation17 + $0x210] sm:$0xf0] }
 0x498   :  { %4725 = vmatpush.bf16.msra.mxu2 %v7325_v40  ;;  %4703 = vmatpush.bf16.msra.mxu0 %v8025_v43  ;;  %v9224_v40 = vld [vmem:[#allocation17 + $0x74c] sm:$0xf0]  ;;  %v2919_v16 = vpop.f32.mrf.mxu0  ;;  %v9138_v43 = vld [vmem:[#allocation17 + $0x4a4] sm:$0xf]  ;;  %v7770_v1 = vld [vmem:[#allocation17 + $0x410] sm:$0xf0] }
 0x499   :  { %v8185_v46 = vor.u32 %v9224_v40, %v8184_v39  ;;  %v2920_v52 = vadd.f32 %v2919_v16, %v2907_v8  ;;  %v7853_v0 = vor.u32 %v9138_v43, %v7850_v47  ;;  %v7981_v40 = vor.u32 %v9170_v30, %v7978_v55  ;;  %v9126_v8 = vld [vmem:[#allocation17 + $0x444] sm:$0xf]  ;;  %v7946_v43 = vld [vmem:[#allocation17 + $0x570] sm:$0xf0] }
 0x49a   :  { %4740 = vmatpush.bf16.msrb.mxu3 %v7421_v3  ;;  %v9178_v3 = vld [vmem:[#allocation17 + $0x5e4] sm:$0xf]  ;;  %v7805_v50 = vor.u32 %v9126_v8, %v7802_v41  ;;  %v7658_v55 = vld [vmem:[#allocation17 + $0x330] sm:$0xf0]  ;;  %v7504_v41 = vld [vmem:[#allocation17 + $0x1e8] sm:$0xf] }
 0x49b   :  { %4714 = vmatpush.bf16.msrb.mxu1 %v8185_v46  ;;  %v8013_v57 = vor.u32 %v9178_v3, %v8010_v59  ;;  %v7517_v46 = vor.u32 %v9054_v35, %v7514_v37  ;;  %v9090_v30 = vld [vmem:[#allocation17 + $0x324] sm:$0xf]  ;;  %v7898_v37 = vld [vmem:[#allocation17 + $0x510] sm:$0xf0] }
 0x49c   :  { %4726 = vmatpush.bf16.msra.mxu2 %v7309_v25  ;;  %4748 = vmatpush.bf16.msrb.mxu0 %v7629_v60  ;;  %v2934_v53 = vpop.f32.mrf.mxu1  ;;  %v2933_v25 = vadd.f32 %v2932_v26, %v2920_v52  ;;  %v9062_v60 = vld [vmem:[#allocation17 + $0x244] sm:$0xf]  ;;  %v7997_v26 = vor.u32 %v9174_v51, %v7994_v7  ;;  %v9021_v51 = vld [vmem:[#allocation17 + $0xf4] sm:$0xf0]  ;;  %v8138_v8 = vld [vmem:[#allocation17 + $0x6f0] sm:$0xf0] }
 0x49d   :  { %v7549_v18 = vor.u32 %v9062_v60, %v7546_v62  ;;  %v9122_v53 = vld [vmem:[#allocation17 + $0x424] sm:$0xf]  ;;  %v7690_v62 = vld [vmem:[#allocation17 + $0x370] sm:$0xf0] }
 0x49e   :  { %4741 = vmatpush.bf16.msrb.mxu3 %v7405_v14  ;;  %vm3045_vm4 = vcmp.gt.f32.partialorder %v2933_v25, 0.0  ;;  %v3053_v61 = vmul.f32 0.01, %v2933_v25  ;;  %v7789_v3 = vor.u32 %v9122_v53, %v7786_v42  ;;  %v9118_v60 = vld [vmem:[#allocation17 + $0x404] sm:$0xf] }
 0x49f   :  { %4715 = vmatpush.bf16.msrb.mxu1 %v8169_v58  ;;  %v9150_v35 = vld [vmem:[#allocation17 + $0x504] sm:$0xf]  ;;  %v7328_v42 = vld [vmem:[#allocation17 + $0x88] sm:$0xf] }
 0x4a0   :  { %4727 = vmatpush.bf16.msra.mxu2 %v7293_v5  ;;  %4749 = vmatpush.bf16.msrb.mxu0 %v7613_v19  ;;  %v3061_v6 = vsel %vm3045_vm4, %v2933_v25, %v3053_v61  ;;  %v9134_v5 = vld [vmem:[#allocation17 + $0x484] sm:$0xf]  ;;  %v2921_v14 = vpop.f32.mrf.mxu0 }
 0x4a1   :  { %v10051_v13 = vpack.c.bf16 %v3061_v6, %v3061_v6  ;;  %v9114_v19 = vld [vmem:[#allocation17 + $0x3e4] sm:$0xf]  ;;  %v7837_v24 = vor.u32 %v9134_v5, %v7834_v11  ;;  %v7930_v6 = vld [vmem:[#allocation17 + $0x550] sm:$0xf0]  ;;  %v7376_v11 = vld [vmem:[#allocation17 + $0xe8] sm:$0xf]  ;;  %v7773_v14 = vor.u32 %v9118_v60, %v7770_v1 }
 0x4a2   :  { %4742 = vmatpush.bf16.msrb.mxu3 %v7389_v31  ;;  %v7757_v23 = vor.u32 %v9114_v19, %v7754_v20  ;;  %v7533_v31 = vor.u32 %v9058_v21, %v7530_v22  ;;  %v9162_v25 = vld [vmem:[#allocation17 + $0x564] sm:$0xf]  ;;  %v7933_v7 = vor.u32 %v9158_v4, %v7930_v6  ;;  %v7674_v19 = vld [vmem:[#allocation17 + $0x350] sm:$0xf0]  ;;  %v7377_v20 = vor.u32 %v9021_v51, %v7376_v11  ;;  %v7312_v1 = vld [vmem:[#allocation17 + $0x68] sm:$0xf] }
 0x4a3   :  { %4716 = vmatpush.bf16.msrb.mxu1 %v8153_v12  ;;  %4691 = vmatmul.bf16.vlgmr.msra.gmra.mxu3 %v10051_v13  ;;  %v7949_v59 = vor.u32 %v9162_v25, %v7946_v43  ;;  %v9098_v61 = vld [vmem:[#allocation17 + $0x364] sm:$0xf]  ;;  %v7914_v22 = vld [vmem:[#allocation17 + $0x530] sm:$0xf0]  ;;  %v9009_v25 = vld [vmem:[#allocation17 + $0x94] sm:$0xf0] }
 0x4a4   :  { %4728 = vmatpush.bf16.msra.mxu2 %v7277_v27  ;;  %4750 = vmatpush.bf16.msrb.mxu0 %v7597_v33  ;;  %v9130_v27 = vld [vmem:[#allocation17 + $0x464] sm:$0xf]  ;;  %v7741_v33 = vor.u32 %v9110_v28, %v7738_v2  ;;  %v7329_v60 = vor.u32 %v9009_v25, %v7328_v42  ;;  %v9005_v4 = vld [vmem:[#allocation17 + $0x74] sm:$0xf0]  ;;  %v8106_v6 = vld [vmem:[#allocation17 + $0x6b0] sm:$0xf0] }
 0x4a5   :  { %v7821_v39 = vor.u32 %v9130_v27, %v7818_v29  ;;  %v9154_v21 = vld [vmem:[#allocation17 + $0x524] sm:$0xf]  ;;  %v9017_v27 = vld [vmem:[#allocation17 + $0xd4] sm:$0xf0]  ;;  %v7313_v51 = vor.u32 %v9005_v4, %v7312_v1  ;;  %v8042_v42 = vld [vmem:[#allocation17 + $0x630] sm:$0xf0] }
 0x4a6   :  { %4787 = vmatpush.bf16.msra.mxu3 %v8013_v57  ;;  %v7693_v57 = vor.u32 %v9098_v61, %v7690_v62  ;;  %v7917_v29 = vor.u32 %v9154_v21, %v7914_v22  ;;  %v7456_v21 = vld [vmem:[#allocation17 + $0x188] sm:$0xf]  ;;  %v9041_v22 = vld [vmem:[#allocation17 + $0x194] sm:$0xf0]  ;;  %v8026_v1 = vld [vmem:[#allocation17 + $0x610] sm:$0xf0] }
 0x4a7   :  { %4761 = vmatpush.bf16.msra.mxu1 %v7757_v23  ;;  %v7408_v25 = vld [vmem:[#allocation17 + $0x128] sm:$0xf] }
 0x4a8   :  { %4729 = vmatpush.bf16.msra.mxu2 %v7261_v38  ;;  %4751 = vmatpush.bf16.msrb.mxu0 %v7581_v45  ;;  %v2958_v34 = vpop.f32.mrf.mxu3  ;;  %v9106_v38 = vld [vmem:[#allocation17 + $0x3a4] sm:$0xf]  ;;  %v7962_v45 = vld [vmem:[#allocation17 + $0x590] sm:$0xf0] }
 0x4a9   :  { %v7965_v52 = vor.u32 %v9166_v63, %v7962_v45  ;;  %v9053_v63 = vld [vmem:[#allocation17 + $0x1f4] sm:$0xf0] }
 0x4aa   :  { %4788 = vmatpush.bf16.msra.mxu3 %v7997_v26  ;;  %v7360_v26 = vld [vmem:[#allocation17 + $0xc8] sm:$0xf] }
 0x4ab   :  { %4730 = vmatmul.bf16.vlgmr.msra.gmra.mxu2 %v10022_v17  ;;  %4762 = vmatpush.bf16.msra.mxu1 %v7741_v33  ;;  %v7361_v33 = vor.u32 %v9017_v27, %v7360_v26  ;;  %v7457_v27 = vor.u32 %v9041_v22, %v7456_v21 }
 0x4ac   :  { %4774 = vmatpush.bf16.msrb.mxu2 %v7885_v36  ;;  %4752 = vmatpush.bf16.msrb.mxu0 %v7565_v56  ;;  %v7722_v36 = vld [vmem:[#allocation17 + $0x3b0] sm:$0xf0]  ;;  %v1334_v56 = vperm.slane %v10046_v9, 6 }
 0x4ad   :  { %v7725_v16 = vor.u32 %v9106_v38, %v7722_v36  ;;  %v7661_v38 = vor.u32 %v9090_v30, %v7658_v55  ;;  %v8074_v30 = vld [vmem:[#allocation17 + $0x670] sm:$0xf0]  ;;  %v7440_v55 = vld [vmem:[#allocation17 + $0x168] sm:$0xf] }
 0x4ae   :  { %4789 = vmatpush.bf16.msra.mxu3 %v7981_v40  ;;  %v2945_v48 = vpop.f32.mrf.mxu2  ;;  %v7344_v40 = vld [vmem:[#allocation17 + $0xa8] sm:$0xf] }
 0x4af   :  { %4763 = vmatpush.bf16.msra.mxu1 %v7725_v16  ;;  %v2946_v5 = vadd.f32 %v2945_v48, %v1334_v56  ;;  %v9086_v16 = vld [vmem:[#allocation17 + $0x304] sm:$0xf]  ;;  %v8122_v56 = vld [vmem:[#allocation17 + $0x6d0] sm:$0xf0] }
 0x4b0   :  { %4775 = vmatpush.bf16.msrb.mxu2 %v7869_v54  ;;  %4753 = vmatpush.bf16.msrb.mxu0 %v7549_v18  ;;  %v9102_v54 = vld [vmem:[#allocation17 + $0x384] sm:$0xf]  ;;  %v2960_v58 = vpop.f32.mrf.mxu3 }
 0x4b1   :  { %v7709_v47 = vor.u32 %v9102_v54, %v7706_v49  ;;  %v9094_v18 = vld [vmem:[#allocation17 + $0x344] sm:$0xf]  ;;  %v7505_v54 = vor.u32 %v9053_v63, %v7504_v41  ;;  %v7488_v58 = vld [vmem:[#allocation17 + $0x1c8] sm:$0xf]  ;;  %v8058_v41 = vld [vmem:[#allocation17 + $0x650] sm:$0xf0] }
 0x4b2   :  { %4790 = vmatpush.bf16.msra.mxu3 %v7965_v52  ;;  %v7677_v23 = vor.u32 %v9094_v18, %v7674_v19  ;;  %v9206_v49 = vld [vmem:[#allocation17 + $0x6c4] sm:$0xf]  ;;  %v7296_v18 = vld [vmem:[#allocation17 + $0x48] sm:$0xf]  ;;  %v9001_v19 = vld [vmem:[#allocation17 + $0x54] sm:$0xf0] }
 0x4b3   :  { %4764 = vmatpush.bf16.msra.mxu1 %v7709_v47  ;;  %4743 = vmatmul.bf16.vlgmr.msrb.gmra.mxu3 %v10013_v10  ;;  %v8125_v61 = vor.u32 %v9206_v49, %v8122_v56  ;;  %v7424_v63 = vld [vmem:[#allocation17 + $0x148] sm:$0xf] }
 0x4b4   :  { %4776 = vmatpush.bf16.msrb.mxu2 %v7853_v0  ;;  %4754 = vmatpush.bf16.msrb.mxu0 %v7533_v31  ;;  %v2984_v0 = vpop.f32.mrf.mxu1 }
 0x4b6   :  { %4791 = vmatpush.bf16.msra.mxu3 %v7949_v59  ;;  %v2947_v12 = vpop.f32.mrf.mxu2 }
 0x4b7   :  { %4765 = vmatpush.bf16.msra.mxu1 %v7693_v57  ;;  %v7472_v57 = vld [vmem:[#allocation17 + $0x1a8] sm:$0xf] }
 0x4b8   :  { %4777 = vmatpush.bf16.msrb.mxu2 %v7837_v24  ;;  %4755 = vmatpush.bf16.msrb.mxu0 %v7517_v46  ;;  %v2959_v24 = vadd.f32 %v2958_v34, %v2946_v5  ;;  %v2971_v28 = vpop.f32.mrf.mxu0  ;;  %v9013_v34 = vld [vmem:[#allocation17 + $0xb4] sm:$0xf0]  ;;  %v7901_v46 = vor.u32 %v9150_v35, %v7898_v37 }
 0x4b9   :  { %v7345_v48 = vor.u32 %v9013_v34, %v7344_v40  ;;  %v9045_v5 = vld [vmem:[#allocation17 + $0x1b4] sm:$0xf0]  ;;  %v7264_v40 = vld [vmem:[#allocation17 + $0x8] sm:$0xf] }
 0x4ba   :  { %v2972_v2 = vadd.f32 %v2971_v28, %v2959_v24  ;;  %4792 = vmatpush.bf16.msra.mxu3 %v7933_v7  ;;  %v9198_v7 = vld [vmem:[#allocation17 + $0x684] sm:$0xf]  ;;  %v8993_v34 = vld [vmem:[#allocation17 + $0x14] sm:$0xf0] }
 0x4bb   :  { %4766 = vmatpush.bf16.msra.mxu1 %v7677_v23  ;;  %v7297_v23 = vor.u32 %v9001_v19, %v7296_v18  ;;  %v9194_v28 = vld [vmem:[#allocation17 + $0x664] sm:$0xf]  ;;  %v7856_v18 = vld [vmem:[#allocation17 + $0x4a8] sm:$0xf]  ;;  %v9141_v19 = vld [vmem:[#allocation17 + $0x4b4] sm:$0xf0] }
 0x4bc   :  { %4778 = vmatpush.bf16.msrb.mxu2 %v7821_v39  ;;  %v2986_v31 = vpop.f32.mrf.mxu1  ;;  %v2985_v36 = vadd.f32 %v2984_v0, %v2972_v2  ;;  %v9210_v39 = vld [vmem:[#allocation17 + $0x6e4] sm:$0xf]  ;;  %v7280_v2 = vld [vmem:[#allocation17 + $0x28] sm:$0xf] }
 0x4bd   :  { %v8141_v53 = vor.u32 %v9210_v39, %v8138_v8  ;;  %v9202_v0 = vld [vmem:[#allocation17 + $0x6a4] sm:$0xf]  ;;  %v9037_v31 = vld [vmem:[#allocation17 + $0x174] sm:$0xf0] }
 0x4be   :  { %vm3046_vm5 = vcmp.gt.f32.partialorder %v2985_v36, 0.0  ;;  %v3054_v45 = vmul.f32 0.01, %v2985_v36  ;;  %4793 = vmatpush.bf16.msra.mxu3 %v7917_v29  ;;  %v8109_v12 = vor.u32 %v9202_v0, %v8106_v6  ;;  %v8997_v29 = vld [vmem:[#allocation17 + $0x34] sm:$0xf0] }
 0x4bf   :  { %4767 = vmatpush.bf16.msra.mxu1 %v7661_v38  ;;  %v7281_v37 = vor.u32 %v8997_v29, %v7280_v2  ;;  %v8077_v38 = vor.u32 %v9194_v28, %v8074_v30  ;;  %v9190_v39 = vld [vmem:[#allocation17 + $0x644] sm:$0xf]  ;;  %v7857_v2 = vor.u32 %v9141_v19, %v7856_v18  ;;  %v7616_v30 = vld [vmem:[#allocation17 + $0x2c8] sm:$0xf]  ;;  %v8202_v19 = vld [vmem:[#allocation17 + $0x770] sm:$0xf0] }
 0x4c0   :  { %4779 = vmatpush.bf16.msrb.mxu2 %v7805_v50  ;;  %v7642_v50 = vld [vmem:[#allocation17 + $0x310] sm:$0xf0]  ;;  %v3062_v52 = vsel %vm3046_vm5, %v2985_v36, %v3054_v45  ;;  %v2973_v47 = vpop.f32.mrf.mxu0  ;;  %v7441_v36 = vor.u32 %v9037_v31, %v7440_v55  ;;  %v9033_v45 = vld [vmem:[#allocation17 + $0x154] sm:$0xf0]  ;;  %v9182_v0 = vld [vmem:[#allocation17 + $0x604] sm:$0xf] }
 0x4c1   :  { %v10057_v43 = vpack.c.bf16 %v3062_v52, %v3062_v52  ;;  %v7645_v59 = vor.u32 %v9086_v16, %v7642_v50  ;;  %v7888_v16 = vld [vmem:[#allocation17 + $0x4e8] sm:$0xf]  ;;  %v8061_v52 = vor.u32 %v9190_v39, %v8058_v41  ;;  %v9029_v47 = vld [vmem:[#allocation17 + $0x134] sm:$0xf0]  ;;  %v8029_v22 = vor.u32 %v9182_v0, %v8026_v1  ;;  %v9238_v29 = vld [vmem:[#allocation17 + $0x7c4] sm:$0xf] }
 0x4c2   :  { %4794 = vmatpush.bf16.msra.mxu3 %v7901_v46  ;;  %v9081_v55 = vld [vmem:[#allocation17 + $0x2d4] sm:$0xf0]  ;;  %v8000_v39 = vld [vmem:[#allocation17 + $0x5c8] sm:$0xf] }
 0x4c3   :  { %4704 = vmatmul.bf16.vlgmr.msra.gmra.mxu0 %v10057_v43  ;;  %4768 = vmatpush.bf16.msra.mxu1 %v7645_v59  ;;  %v9129_v0 = vld [vmem:[#allocation17 + $0x454] sm:$0xf0]  ;;  %v7968_v1 = vld [vmem:[#allocation17 + $0x588] sm:$0xf] }
 0x4c4   :  { %4780 = vmatpush.bf16.msrb.mxu2 %v7789_v3  ;;  %v9049_v3 = vld [vmem:[#allocation17 + $0x1d4] sm:$0xf0]  ;;  %4800 = vmatpush.bf16.msra.mxu0 %v8141_v53  ;;  %v7425_v53 = vor.u32 %v9033_v45, %v7424_v63  ;;  %v7600_v45 = vld [vmem:[#allocation17 + $0x2a8] sm:$0xf] }
 0x4c5   :  { %v7489_v62 = vor.u32 %v9049_v3, %v7488_v58  ;;  %4795 = vmatmul.bf16.vlgmr.msra.gmra.mxu3 %v10051_v13  ;;  %v7872_v58 = vld [vmem:[#allocation17 + $0x4c8] sm:$0xf]  ;;  %v9145_v3 = vld [vmem:[#allocation17 + $0x4d4] sm:$0xf0] }
 0x4c6   :  { %4839 = vmatpush.bf16.msrb.mxu3 %v7505_v54  ;;  %v9186_v54 = vld [vmem:[#allocation17 + $0x624] sm:$0xf]  ;;  %v7873_v6 = vor.u32 %v9145_v3, %v7872_v58  ;;  %v7584_v3 = vld [vmem:[#allocation17 + $0x288] sm:$0xf] }
 0x4c7   :  { %v9230_v58 = vld [vmem:[#allocation17 + $0x784] sm:$0xf] }
 0x4c8   :  { %4781 = vmatpush.bf16.msrb.mxu2 %v7773_v14  ;;  %v3010_v11 = vpop.f32.mrf.mxu3  ;;  %4801 = vmatpush.bf16.msra.mxu0 %v8125_v61  ;;  %v7473_v14 = vor.u32 %v9045_v5, %v7472_v57  ;;  %v8045_v61 = vor.u32 %v9186_v54, %v8042_v42  ;;  %v7392_v57 = vld [vmem:[#allocation17 + $0x108] sm:$0xf]  ;;  %v9025_v5 = vld [vmem:[#allocation17 + $0x114] sm:$0xf0] }
 0x4c9   :  { %v7984_v54 = vld [vmem:[#allocation17 + $0x5a8] sm:$0xf] }
 0x4ca   :  { %4840 = vmatpush.bf16.msrb.mxu3 %v7489_v62  ;;  %v7409_v62 = vor.u32 %v9029_v47, %v7408_v25 }
 0x4cb   :  { %4782 = vmatmul.bf16.vlgmr.msrb.gmra.mxu2 %v10038_v32 }
 0x4cc   :  { %4826 = vmatpush.bf16.msra.mxu2 %v7377_v20  ;;  %v8090_v20 = vld [vmem:[#allocation17 + $0x690] sm:$0xf0]  ;;  %4802 = vmatpush.bf16.msra.mxu0 %v8109_v12 }
 0x4cd   :  { %v8093_v26 = vor.u32 %v9198_v7, %v8090_v20  ;;  %v9085_v7 = vld [vmem:[#allocation17 + $0x2f4] sm:$0xf0]  ;;  %v8016_v20 = vld [vmem:[#allocation17 + $0x5e8] sm:$0xf] }
 0x4ce   :  { %4841 = vmatpush.bf16.msrb.mxu3 %v7473_v14  ;;  %v2997_v24 = vpop.f32.mrf.mxu2  ;;  %v7632_v14 = vld [vmem:[#allocation17 + $0x2e8] sm:$0xf] }
 0x4d0   :  { %4827 = vmatpush.bf16.msra.mxu2 %v7361_v33  ;;  %v1335_v33 = vperm.slane %v10046_v9, 7  ;;  %v3012_v35 = vpop.f32.mrf.mxu3  ;;  %4803 = vmatpush.bf16.msra.mxu0 %v8093_v26  ;;  %v7265_v9 = vor.u32 %v8993_v34, %v7264_v40  ;;  %v7633_v26 = vor.u32 %v9085_v7, %v7632_v14  ;;  %v9177_v40 = vld [vmem:[#allocation17 + $0x5d4] sm:$0xf0]  ;;  %v7617_v34 = vor.u32 %v9081_v55, %v7616_v30  ;;  %v7568_v14 = vld [vmem:[#allocation17 + $0x268] sm:$0xf] }
 0x4d1   :  { %v9069_v7 = vld [vmem:[#allocation17 + $0x274] sm:$0xf0]  ;;  %v8186_v30 = vld [vmem:[#allocation17 + $0x750] sm:$0xf0]  ;;  %v7552_v55 = vld [vmem:[#allocation17 + $0x248] sm:$0xf] }
 0x4d2   :  { %4842 = vmatpush.bf16.msrb.mxu3 %v7457_v27  ;;  %v3036_v8 = vpop.f32.mrf.mxu1  ;;  %v2998_v46 = vadd.f32 %v2997_v24, %v1335_v33  ;;  %v9181_v24 = vld [vmem:[#allocation17 + $0x5f4] sm:$0xf0] }
 0x4d3   :  { %4756 = vmatmul.bf16.vlgmr.msrb.gmra.mxu0 %v10034_v44  ;;  %v8017_v35 = vor.u32 %v9181_v24, %v8016_v20  ;;  %v7792_v20 = vld [vmem:[#allocation17 + $0x428] sm:$0xf]  ;;  %v9165_v24 = vld [vmem:[#allocation17 + $0x574] sm:$0xf0] }
 0x4d4   :  { %4828 = vmatpush.bf16.msra.mxu2 %v7345_v48  ;;  %v9149_v48 = vld [vmem:[#allocation17 + $0x4f4] sm:$0xf0]  ;;  %4804 = vmatpush.bf16.msra.mxu0 %v8077_v38  ;;  %v3011_v56 = vadd.f32 %v3010_v11, %v2998_v46  ;;  %v8266_v11 = vld [vmem:[#allocation17 + $0x7f0] sm:$0xf0]  ;;  %v7840_v38 = vld [vmem:[#allocation17 + $0x488] sm:$0xf] }
 0x4d5   :  { %v7889_v49 = vor.u32 %v9149_v48, %v7888_v16  ;;  %v9077_v46 = vld [vmem:[#allocation17 + $0x2b4] sm:$0xf0]  ;;  %v3320_v16 = vld [vmem:[%s10215_s16] sm:$0xf]  ;;  %v8001_v48 = vor.u32 %v9177_v40, %v8000_v39  ;;  %v7936_v39 = vld [vmem:[#allocation17 + $0x548] sm:$0xf] }
 0x4d6   :  { %4843 = vmatpush.bf16.msrb.mxu3 %v7441_v36  ;;  %v2999_v50 = vpop.f32.mrf.mxu2  ;;  %v9137_v36 = vld [vmem:[#allocation17 + $0x494] sm:$0xf0]  ;;  %v7601_v42 = vor.u32 %v9077_v46, %v7600_v45  ;;  %v3330_v25 = vperm.slane %v3320_v16, 0  ;;  %v7536_v16 = vld [vmem:[#allocation17 + $0x228] sm:$0xf] }
 0x4d7   :  { %v7841_v63 = vor.u32 %v9137_v36, %v7840_v38  ;;  %v7824_v50 = vld [vmem:[#allocation17 + $0x468] sm:$0xf]  ;;  %v9121_v36 = vld [vmem:[#allocation17 + $0x414] sm:$0xf0] }
 0x4d8   :  { %4829 = vmatpush.bf16.msra.mxu2 %v7329_v60  ;;  %v3023_v59 = vpop.f32.mrf.mxu0  ;;  %4805 = vmatpush.bf16.msra.mxu0 %v8061_v52  ;;  %v9133_v52 = vld [vmem:[#allocation17 + $0x474] sm:$0xf0]  ;;  %v7776_v38 = vld [vmem:[#allocation17 + $0x408] sm:$0xf] }
 0x4d9   :  { %v3024_v60 = vadd.f32 %v3023_v59, %v3011_v56  ;;  %v7825_v56 = vor.u32 %v9133_v52, %v7824_v50  ;;  %v9073_v59 = vld [vmem:[#allocation17 + $0x294] sm:$0xf0]  ;;  %v7777_v46 = vor.u32 %v9121_v36, %v7776_v38  ;;  %v9218_v52 = vld [vmem:[#allocation17 + $0x724] sm:$0xf]  ;;  %v9047_v38 = vld [vmem:[#allocation17 + $0x1cc] sm:$0xf] }
 0x4da   :  { %4844 = vmatpush.bf16.msrb.mxu3 %v7425_v53  ;;  %v3038_v4 = vpop.f32.mrf.mxu1  ;;  %v9161_v40 = vld [vmem:[#allocation17 + $0x554] sm:$0xf0]  ;;  %v7490_v36 = vld [vmem:[#allocation17 + $0x1d8] sm:$0xf0] }
 0x4db   :  { %v3037_v12 = vadd.f32 %v3036_v8, %v3024_v60  ;;  %v9234_v8 = vld [vmem:[#allocation17 + $0x7a4] sm:$0xf]  ;;  %v9169_v4 = vld [vmem:[#allocation17 + $0x594] sm:$0xf0] }
 0x4dc   :  { %4830 = vmatpush.bf16.msra.mxu2 %v7313_v51  ;;  %v9242_v51 = vld [vmem:[#allocation17 + $0x7e4] sm:$0xf]  ;;  %4806 = vmatpush.bf16.msra.mxu0 %v8045_v61  ;;  %v8218_v61 = vld [vmem:[#allocation17 + $0x790] sm:$0xf0]  ;;  %v7969_v18 = vor.u32 %v9169_v4, %v7968_v1 }
 0x4dd   :  { %vm3047_vm6 = vcmp.gt.f32.partialorder %v3037_v12, 0.0  ;;  %v3055_v21 = vmul.f32 0.01, %v3037_v12  ;;  %v8269_v28 = vor.u32 %v9242_v51, %v8266_v11  ;;  %v8221_v51 = vor.u32 %v9230_v58, %v8218_v61  ;;  %v9226_v11 = vld [vmem:[#allocation17 + $0x764] sm:$0xf] }
 0x4de   :  { %4845 = vmatpush.bf16.msrb.mxu3 %v7409_v62  ;;  %v7808_v62 = vld [vmem:[#allocation17 + $0x448] sm:$0xf] }
 0x4df   :  { %v3063_v27 = vsel %vm3047_vm6, %v3037_v12, %v3055_v21  ;;  %v7809_v12 = vor.u32 %v9129_v0, %v7808_v62  ;;  %v9125_v21 = vld [vmem:[#allocation17 + $0x434] sm:$0xf0]  ;;  %v7520_v61 = vld [vmem:[#allocation17 + $0x208] sm:$0xf] }
 0x4e0   :  { %4831 = vmatpush.bf16.msra.mxu2 %v7297_v23  ;;  %v7393_v23 = vor.u32 %v9025_v5, %v7392_v57  ;;  %v10064_v31 = vpack.c.bf16 %v3063_v27, %v3063_v27  ;;  %v3025_v33 = vpop.f32.mrf.mxu0  ;;  %4807 = vmatpush.bf16.msra.mxu0 %v8029_v22  ;;  %v7585_v57 = vor.u32 %v9073_v59, %v7584_v3  ;;  %v9214_v3 = vld [vmem:[#allocation17 + $0x704] sm:$0xf]  ;;  %v8154_v59 = vld [vmem:[#allocation17 + $0x710] sm:$0xf0]  ;;  %v9057_v62 = vld [vmem:[#allocation17 + $0x214] sm:$0xf0] }
 0x4e1   :  { %v7569_v27 = vor.u32 %v9069_v7, %v7568_v14  ;;  %v9065_v33 = vld [vmem:[#allocation17 + $0x254] sm:$0xf0]  ;;  %v7904_v0 = vld [vmem:[#allocation17 + $0x508] sm:$0xf]  ;;  %v9011_v7 = vld [vmem:[#allocation17 + $0xac] sm:$0xf] }
 0x4e2   :  { %4846 = vmatpush.bf16.msrb.mxu3 %v7393_v23  ;;  %4717 = vmatmul.bf16.vlgmr.msrb.gmra.mxu1 %v10064_v31  ;;  %v7952_v23 = vld [vmem:[#allocation17 + $0x568] sm:$0xf]  ;;  %v9117_v14 = vld [vmem:[#allocation17 + $0x3f4] sm:$0xf0] }
 0x4e3   :  { %4813 = vmatpush.bf16.msrb.mxu1 %v8269_v28  ;;  %4808 = vmatmul.bf16.vlgmr.msra.gmra.mxu0 %v10057_v43  ;;  %v9222_v28 = vld [vmem:[#allocation17 + $0x744] sm:$0xf] }
 0x4e4   :  { %4832 = vmatpush.bf16.msra.mxu2 %v7281_v37  ;;  %v8250_v37 = vld [vmem:[#allocation17 + $0x7d0] sm:$0xf0]  ;;  %4852 = vmatpush.bf16.msrb.mxu0 %v7633_v26  ;;  %v8189_v45 = vor.u32 %v9222_v28, %v8186_v30  ;;  %v9209_v28 = vld [vmem:[#allocation17 + $0x6d4] sm:$0xf0] }
 0x4e5   :  { %v8253_v41 = vor.u32 %v9238_v29, %v8250_v37  ;;  %4847 = vmatmul.bf16.vlgmr.msrb.gmra.mxu3 %v10013_v10  ;;  %v7793_v29 = vor.u32 %v9125_v21, %v7792_v20  ;;  %v7953_v37 = vor.u32 %v9165_v24, %v7952_v23  ;;  %v9051_v20 = vld [vmem:[#allocation17 + $0x1ec] sm:$0xf]  ;;  %v7506_v21 = vld [vmem:[#allocation17 + $0x1f8] sm:$0xf0] }
 0x4e6   :  { %4891 = vmatpush.bf16.msra.mxu3 %v8017_v35  ;;  %v7509_v30 = vor.u32 %v9051_v20, %v7506_v21 }
 0x4e7   :  { %4814 = vmatpush.bf16.msrb.mxu1 %v8253_v41 }
 0x4e8   :  { %4833 = vmatpush.bf16.msra.mxu2 %v7265_v9  ;;  %v8234_v9 = vld [vmem:[#allocation17 + $0x7b0] sm:$0xf0]  ;;  %v4640_v53 = vpop.f32.mrf.mxu3  ;;  %4853 = vmatpush.bf16.msrb.mxu0 %v7617_v34  ;;  %v9019_v34 = vld [vmem:[#allocation17 + $0xec] sm:$0xf] }
 0x4e9   :  { %v8237_v47 = vor.u32 %v9234_v8, %v8234_v9  ;;  %v7378_v8 = vld [vmem:[#allocation17 + $0xf8] sm:$0xf0]  ;;  %v7937_v9 = vor.u32 %v9161_v40, %v7936_v39 }
 0x4ea   :  { %4892 = vmatpush.bf16.msra.mxu3 %v8001_v48  ;;  %v9061_v48 = vld [vmem:[#allocation17 + $0x234] sm:$0xf0]  ;;  %v7381_v50 = vor.u32 %v9019_v34, %v7378_v8  ;;  %v8112_v34 = vld [vmem:[#allocation17 + $0x6a8] sm:$0xf] }
 0x4eb   :  { %4834 = vmatmul.bf16.vlgmr.msra.gmra.mxu2 %v10022_v17  ;;  %4815 = vmatpush.bf16.msrb.mxu1 %v8237_v47  ;;  %v7362_v47 = vld [vmem:[#allocation17 + $0xd8] sm:$0xf0]  ;;  %v7537_v58 = vor.u32 %v9061_v48, %v7536_v16  ;;  %v9205_v8 = vld [vmem:[#allocation17 + $0x6b4] sm:$0xf0]  ;;  %v9003_v16 = vld [vmem:[#allocation17 + $0x6c] sm:$0xf] }
 0x4ec   :  { %4878 = vmatpush.bf16.msrb.mxu2 %v7889_v49  ;;  %v9173_v49 = vld [vmem:[#allocation17 + $0x5b4] sm:$0xf0]  ;;  %4854 = vmatpush.bf16.msrb.mxu0 %v7601_v42  ;;  %v7314_v48 = vld [vmem:[#allocation17 + $0x78] sm:$0xf0] }
 0x4ed   :  { %v7985_v60 = vor.u32 %v9173_v49, %v7984_v54  ;;  %v7920_v54 = vld [vmem:[#allocation17 + $0x528] sm:$0xf]  ;;  %v9157_v42 = vld [vmem:[#allocation17 + $0x534] sm:$0xf0] }
 0x4ee   :  { %v7921_v4 = vor.u32 %v9157_v42, %v7920_v54  ;;  %v8096_v54 = vld [vmem:[#allocation17 + $0x688] sm:$0xf]  ;;  %v7317_v42 = vor.u32 %v9003_v16, %v7314_v48 }
 0x4ef   :  { %4893 = vmatpush.bf16.msra.mxu3 %v7985_v60  ;;  %4816 = vmatpush.bf16.msrb.mxu1 %v8221_v51  ;;  %v9213_v51 = vld [vmem:[#allocation17 + $0x6f4] sm:$0xf0] }
 0x4f0   :  { %4879 = vmatpush.bf16.msrb.mxu2 %v7873_v6  ;;  %v4627_v6 = vpop.f32.mrf.mxu2  ;;  %v4642_v22 = vpop.f32.mrf.mxu3  ;;  %4855 = vmatpush.bf16.msrb.mxu0 %v7585_v57  ;;  %v9153_v57 = vld [vmem:[#allocation17 + $0x514] sm:$0xf0] }
 0x4f1   :  { %v4628_v5 = vadd.f32 %v4627_v6, %v3330_v25  ;;  %v9015_v25 = vld [vmem:[#allocation17 + $0xcc] sm:$0xf]  ;;  %v8157_v22 = vor.u32 %v9214_v3, %v8154_v59  ;;  %v7905_v24 = vor.u32 %v9153_v57, %v7904_v0  ;;  %v7298_v3 = vld [vmem:[#allocation17 + $0x58] sm:$0xf0]  ;;  %v8080_v0 = vld [vmem:[#allocation17 + $0x668] sm:$0xf] }
 0x4f2   :  { %v4666_v35 = vpop.f32.mrf.mxu1  ;;  %4769 = vmatmul.bf16.vlgmr.msra.gmra.mxu1 %v10030_v15  ;;  %v7365_v6 = vor.u32 %v9015_v25, %v7362_v47  ;;  %v7712_v47 = vld [vmem:[#allocation17 + $0x388] sm:$0xf]  ;;  %v9039_v59 = vld [vmem:[#allocation17 + $0x18c] sm:$0xf] }
 0x4f3   :  { %v4641_v26 = vadd.f32 %v4640_v53, %v4628_v5  ;;  %4894 = vmatpush.bf16.msra.mxu3 %v7969_v18  ;;  %v8170_v53 = vld [vmem:[#allocation17 + $0x730] sm:$0xf0]  ;;  %v8144_v5 = vld [vmem:[#allocation17 + $0x6e8] sm:$0xf]  ;;  %v7521_v18 = vor.u32 %v9057_v62, %v7520_v61 }
 0x4f4   :  { %4880 = vmatpush.bf16.msrb.mxu2 %v7857_v2  ;;  %v8205_v2 = vor.u32 %v9226_v11, %v8202_v19  ;;  %4856 = vmatpush.bf16.msrb.mxu0 %v7569_v27  ;;  %v8173_v60 = vor.u32 %v9218_v52, %v8170_v53  ;;  %v7760_v11 = vld [vmem:[#allocation17 + $0x3e8] sm:$0xf]  ;;  %v7346_v19 = vld [vmem:[#allocation17 + $0xb8] sm:$0xf0]  ;;  %v8145_v23 = vor.u32 %v9213_v51, %v8144_v5  ;;  %v9101_v5 = vld [vmem:[#allocation17 + $0x374] sm:$0xf0] }
 0x4f5   :  { %v8128_v27 = vld [vmem:[#allocation17 + $0x6c8] sm:$0xf]  ;;  %v8113_v52 = vor.u32 %v9205_v8, %v8112_v34  ;;  %v8995_v51 = vld [vmem:[#allocation17 + $0x2c] sm:$0xf]  ;;  %v9093_v8 = vld [vmem:[#allocation17 + $0x334] sm:$0xf0] }
 0x4f6   :  { %4817 = vmatpush.bf16.msrb.mxu1 %v8205_v2  ;;  %v8129_v39 = vor.u32 %v9209_v28, %v8128_v27  ;;  %v7696_v57 = vld [vmem:[#allocation17 + $0x368] sm:$0xf]  ;;  %v9097_v28 = vld [vmem:[#allocation17 + $0x354] sm:$0xf0] }
 0x4f7   :  { %4895 = vmatpush.bf16.msra.mxu3 %v7953_v37  ;;  %v7330_v37 = vld [vmem:[#allocation17 + $0x98] sm:$0xf0]  ;;  %v7697_v21 = vor.u32 %v9101_v5, %v7696_v57  ;;  %v7680_v27 = vld [vmem:[#allocation17 + $0x348] sm:$0xf] }
 0x4f8   :  { %4881 = vmatpush.bf16.msrb.mxu2 %v7841_v63  ;;  %v4629_v41 = vpop.f32.mrf.mxu2  ;;  %v7553_v63 = vor.u32 %v9065_v33, %v7552_v55  ;;  %v4653_v49 = vpop.f32.mrf.mxu0  ;;  %v7744_v55 = vld [vmem:[#allocation17 + $0x3c8] sm:$0xf]  ;;  %v9113_v33 = vld [vmem:[#allocation17 + $0x3d4] sm:$0xf0] }
 0x4f9   :  { %v7745_v40 = vor.u32 %v9113_v33, %v7744_v55  ;;  %v7426_v55 = vld [vmem:[#allocation17 + $0x158] sm:$0xf0]  ;;  %v7664_v34 = vld [vmem:[#allocation17 + $0x328] sm:$0xf] }
 0x4fa   :  { %4857 = vmatpush.bf16.msrb.mxu0 %v7553_v63  ;;  %4818 = vmatpush.bf16.msrb.mxu1 %v8189_v45  ;;  %v4668_v1 = vpop.f32.mrf.mxu1  ;;  %v7493_v63 = vor.u32 %v9047_v38, %v7490_v36  ;;  %v7728_v45 = vld [vmem:[#allocation17 + $0x3a8] sm:$0xf]  ;;  %v9189_v36 = vld [vmem:[#allocation17 + $0x634] sm:$0xf0] }
 0x4fb   :  { %4896 = vmatpush.bf16.msra.mxu3 %v7937_v9  ;;  %v9043_v9 = vld [vmem:[#allocation17 + $0x1ac] sm:$0xf]  ;;  %v9197_v1 = vld [vmem:[#allocation17 + $0x674] sm:$0xf0]  ;;  %v8048_v38 = vld [vmem:[#allocation17 + $0x628] sm:$0xf] }
 0x4fc   :  { %4882 = vmatpush.bf16.msrb.mxu2 %v7825_v56  ;;  %v4654_v56 = vadd.f32 %v4653_v49, %v4641_v26  ;;  %v7761_v26 = vor.u32 %v9117_v14, %v7760_v11  ;;  %v9201_v49 = vld [vmem:[#allocation17 + $0x694] sm:$0xf0]  ;;  %v7282_v11 = vld [vmem:[#allocation17 + $0x38] sm:$0xf0]  ;;  %v9035_v14 = vld [vmem:[#allocation17 + $0x16c] sm:$0xf]  ;;  %v8049_v48 = vor.u32 %v9189_v36, %v8048_v38 }
 0x4fd   :  { %v8097_v61 = vor.u32 %v9201_v49, %v8096_v54  ;;  %v8032_v54 = vld [vmem:[#allocation17 + $0x608] sm:$0xf]  ;;  %v9185_v49 = vld [vmem:[#allocation17 + $0x614] sm:$0xf0]  ;;  %v7986_v38 = vld [vmem:[#allocation17 + $0x5b8] sm:$0xf0] }
 0x4fe   :  { %4858 = vmatpush.bf16.msrb.mxu0 %v7537_v58  ;;  %4819 = vmatpush.bf16.msrb.mxu1 %v8173_v60  ;;  %v8999_v58 = vld [vmem:[#allocation17 + $0x4c] sm:$0xf]  ;;  %v7458_v60 = vld [vmem:[#allocation17 + $0x198] sm:$0xf0] }
 0x4ff   :  { %4897 = vmatpush.bf16.msra.mxu3 %v7921_v4  ;;  %v7301_v4 = vor.u32 %v8999_v58, %v7298_v3  ;;  %v7634_v58 = vld [vmem:[#allocation17 + $0x2f8] sm:$0xf0] }
 0x500   :  { %4883 = vmatpush.bf16.msrb.mxu2 %v7809_v12  ;;  %v10073_v12 = vadd.f32 %v4666_v35, %v4654_v56  ;;  %v4655_v2 = vpop.f32.mrf.mxu0  ;;  %v9007_v35 = vld [vmem:[#allocation17 + $0x8c] sm:$0xf]  ;;  %v9105_v56 = vld [vmem:[#allocation17 + $0x394] sm:$0xf0] }
 0x501   :  { %v7333_v41 = vor.u32 %v9007_v35, %v7330_v37  ;;  %v7713_v62 = vor.u32 %v9105_v56, %v7712_v47  ;;  %v8991_v2 = vld [vmem:[#allocation17 + $0xc] sm:$0xf]  ;;  %v7890_v37 = vld [vmem:[#allocation17 + $0x4f8] sm:$0xf0] }
 0x502   :  { %4859 = vmatpush.bf16.msrb.mxu0 %v7521_v18  ;;  %4820 = vmatpush.bf16.msrb.mxu1 %v8157_v22  ;;  %v8064_v22 = vld [vmem:[#allocation17 + $0x648] sm:$0xf]  ;;  %v9147_v35 = vld [vmem:[#allocation17 + $0x4ec] sm:$0xf]  ;;  %v7394_v47 = vld [vmem:[#allocation17 + $0x118] sm:$0xf0] }
 0x503   :  { %4898 = vmatpush.bf16.msra.mxu3 %v7905_v24  ;;  %v7285_v24 = vor.u32 %v8995_v51, %v7282_v11  ;;  %v9083_v56 = vld [vmem:[#allocation17 + $0x2ec] sm:$0xf] }
 0x504   :  { %4884 = vmatpush.bf16.msrb.mxu2 %v7793_v29  ;;  %v7349_v29 = vor.u32 %v9011_v7, %v7346_v19  ;;  %v7442_v7 = vld [vmem:[#allocation17 + $0x178] sm:$0xf0]  ;;  %v8081_v19 = vor.u32 %v9197_v1, %v8080_v0  ;;  %v9179_v1 = vld [vmem:[#allocation17 + $0x5ec] sm:$0xf]  ;;  %v7637_v57 = vor.u32 %v9083_v56, %v7634_v58 }
 0x505   :  { %4860 = vmatmul.bf16.vlgmr.msrb.gmra.mxu0 %v10034_v44  ;;  %4821 = vmatmul.bf16.vlgmr.msrb.gmra.mxu1 %v10064_v31  ;;  %v7858_v0 = vld [vmem:[#allocation17 + $0x4b8] sm:$0xf0]  ;;  %v9079_v11 = vld [vmem:[#allocation17 + $0x2cc] sm:$0xf] }
 0x506   :  { %4904 = vmatpush.bf16.msra.mxu0 %v8145_v23  ;;  %4865 = vmatpush.bf16.msra.mxu1 %v7761_v26  ;;  %v9193_v23 = vld [vmem:[#allocation17 + $0x654] sm:$0xf0]  ;;  %v7445_v26 = vor.u32 %v9035_v14, %v7442_v7  ;;  %v7618_v14 = vld [vmem:[#allocation17 + $0x2d8] sm:$0xf0]  ;;  %v9123_v56 = vld [vmem:[#allocation17 + $0x42c] sm:$0xf] }
 0x507   :  { %4943 = vmatpush.bf16.msrb.mxu3 %v7509_v30  ;;  %v9031_v30 = vld [vmem:[#allocation17 + $0x14c] sm:$0xf]  ;;  %v8065_v33 = vor.u32 %v9193_v23, %v8064_v22  ;;  %v7842_v23 = vld [vmem:[#allocation17 + $0x498] sm:$0xf0] }
 0x508   :  { %4885 = vmatpush.bf16.msrb.mxu2 %v7777_v46  ;;  %v9109_v46 = vld [vmem:[#allocation17 + $0x3b4] sm:$0xf0]  ;;  %4899 = vmatmul.bf16.vlgmr.msra.gmra.mxu3 %v10051_v13  ;;  %v9135_v22 = vld [vmem:[#allocation17 + $0x48c] sm:$0xf]  ;;  %v7794_v58 = vld [vmem:[#allocation17 + $0x438] sm:$0xf0] }
 0x509   :  { %v7729_v53 = vor.u32 %v9109_v46, %v7728_v45  ;;  %v7410_v45 = vld [vmem:[#allocation17 + $0x138] sm:$0xf0]  ;;  %v9143_v46 = vld [vmem:[#allocation17 + $0x4cc] sm:$0xf] }
 0x50a   :  { %4905 = vmatpush.bf16.msra.mxu0 %v8129_v39  ;;  %4866 = vmatpush.bf16.msra.mxu1 %v7745_v40  ;;  %v7429_v40 = vor.u32 %v9031_v30, %v7426_v55  ;;  %v8240_v55 = vld [vmem:[#allocation17 + $0x7a8] sm:$0xf] }
 0x50b   :  { %4886 = vmatmul.bf16.vlgmr.msrb.gmra.mxu2 %v10038_v32  ;;  %4944 = vmatpush.bf16.msrb.mxu3 %v7493_v63  ;;  %v9027_v63 = vld [vmem:[#allocation17 + $0x12c] sm:$0xf] }
 0x50c   :  { %4930 = vmatpush.bf16.msra.mxu2 %v7381_v50  ;;  %v7474_v50 = vld [vmem:[#allocation17 + $0x1b8] sm:$0xf0] }
 0x50d   :  { %v7477_v25 = vor.u32 %v9043_v9, %v7474_v50  ;;  %v7874_v9 = vld [vmem:[#allocation17 + $0x4d8] sm:$0xf0]  ;;  %v7648_v50 = vld [vmem:[#allocation17 + $0x308] sm:$0xf] }
 0x50e   :  { %4906 = vmatpush.bf16.msra.mxu0 %v8113_v52  ;;  %4867 = vmatpush.bf16.msra.mxu1 %v7729_v53  ;;  %v4679_v18 = vpop.f32.mrf.mxu2  ;;  %v9089_v52 = vld [vmem:[#allocation17 + $0x314] sm:$0xf0]  ;;  %v7665_v53 = vor.u32 %v9093_v8, %v7664_v34  ;;  %v7877_v3 = vor.u32 %v9143_v46, %v7874_v9  ;;  %v7586_v34 = vld [vmem:[#allocation17 + $0x298] sm:$0xf0]  ;;  %v9127_v46 = vld [vmem:[#allocation17 + $0x44c] sm:$0xf] }
 0x50f   :  { %4945 = vmatpush.bf16.msrb.mxu3 %v7477_v25  ;;  %v10080_v20 = vadd.f32 %v4679_v18, %v10073_v12  ;;  %v7681_v12 = vor.u32 %v9097_v28, %v7680_v27  ;;  %v7413_v25 = vor.u32 %v9027_v63, %v7410_v45  ;;  %v9075_v28 = vld [vmem:[#allocation17 + $0x2ac] sm:$0xf]  ;;  %v8224_v63 = vld [vmem:[#allocation17 + $0x788] sm:$0xf]  ;;  %v9233_v45 = vld [vmem:[#allocation17 + $0x794] sm:$0xf0] }
 0x510   :  { %4931 = vmatpush.bf16.msra.mxu2 %v7365_v6  ;;  %v7461_v6 = vor.u32 %v9039_v59, %v7458_v60  ;;  %v8272_v59 = vld [vmem:[#allocation17 + $0x7e8] sm:$0xf]  ;;  %v9245_v60 = vld [vmem:[#allocation17 + $0x7f4] sm:$0xf0]  ;;  %v7970_v9 = vld [vmem:[#allocation17 + $0x598] sm:$0xf0] }
 0x511   :  { %v8273_v51 = vor.u32 %v9245_v60, %v8272_v59  ;;  %v7954_v59 = vld [vmem:[#allocation17 + $0x578] sm:$0xf0] }
 0x512   :  { %4907 = vmatpush.bf16.msra.mxu0 %v8097_v61  ;;  %4868 = vmatpush.bf16.msra.mxu1 %v7713_v62  ;;  %v9139_v61 = vld [vmem:[#allocation17 + $0x4ac] sm:$0xf]  ;;  %v8033_v62 = vor.u32 %v9185_v49, %v8032_v54  ;;  %v7570_v54 = vld [vmem:[#allocation17 + $0x278] sm:$0xf0] }
 0x513   :  { %4946 = vmatpush.bf16.msrb.mxu3 %v7461_v6  ;;  %v7649_v6 = vor.u32 %v9089_v52, %v7648_v50  ;;  %v7861_v7 = vor.u32 %v9139_v61, %v7858_v0  ;;  %v8225_v52 = vor.u32 %v9233_v45, %v8224_v63  ;;  %v9063_v0 = vld [vmem:[#allocation17 + $0x24c] sm:$0xf]  ;;  %v8146_v45 = vld [vmem:[#allocation17 + $0x6f8] sm:$0xf0] }
 0x514   :  { %4932 = vmatpush.bf16.msra.mxu2 %v7349_v29  ;;  %v7266_v29 = vld [vmem:[#allocation17 + $0x18] sm:$0xf0]  ;;  %v9211_v63 = vld [vmem:[#allocation17 + $0x6ec] sm:$0xf] }
 0x515   :  { %v7269_v39 = vor.u32 %v8991_v2, %v7266_v29  ;;  %v7602_v2 = vld [vmem:[#allocation17 + $0x2b8] sm:$0xf0]  ;;  %v7845_v29 = vor.u32 %v9135_v22, %v7842_v23  ;;  %v9261_v22 = vld [vmem:[#allocation19 + $0x74] sm:$0xf0] }
 0x516   :  { %4908 = vmatpush.bf16.msra.mxu0 %v8081_v19  ;;  %4869 = vmatpush.bf16.msra.mxu1 %v7697_v21  ;;  %v4681_v16 = vpop.f32.mrf.mxu2  ;;  %v8256_v19 = vld [vmem:[#allocation17 + $0x7c8] sm:$0xf]  ;;  %v9241_v21 = vld [vmem:[#allocation17 + $0x7d4] sm:$0xf0]  ;;  %v7605_v36 = vor.u32 %v9075_v28, %v7602_v2 }
 0x517   :  { %4947 = vmatpush.bf16.msrb.mxu3 %v7445_v26  ;;  %v8002_v26 = vld [vmem:[#allocation17 + $0x5d8] sm:$0xf0]  ;;  %v8257_v27 = vor.u32 %v9241_v21, %v8256_v19  ;;  %v8336_v21 = vld [vmem:[#allocation19 + $0x70] sm:$0xf]  ;;  %v8176_v28 = vld [vmem:[#allocation17 + $0x728] sm:$0xf] }
 0x518   :  { %4933 = vmatpush.bf16.msra.mxu2 %v7333_v41  ;;  %v7893_v41 = vor.u32 %v9147_v35, %v7890_v37  ;;  %v9131_v35 = vld [vmem:[#allocation17 + $0x46c] sm:$0xf]  ;;  %v7826_v37 = vld [vmem:[#allocation17 + $0x478] sm:$0xf0]  ;;  %v9221_v2 = vld [vmem:[#allocation17 + $0x734] sm:$0xf0] }
 0x519   :  { %v7829_v8 = vor.u32 %v9131_v35, %v7826_v37  ;;  %v7810_v16 = vld [vmem:[#allocation17 + $0x458] sm:$0xf0]  ;;  %v8160_v35 = vld [vmem:[#allocation17 + $0x708] sm:$0xf]  ;;  %v8328_v37 = vld [vmem:[#allocation19 + $0x60] sm:$0xf] }
 0x51a   :  { %4909 = vmatpush.bf16.msra.mxu0 %v8065_v33  ;;  %4870 = vmatpush.bf16.msra.mxu1 %v7681_v12  ;;  %v9237_v33 = vld [vmem:[#allocation17 + $0x7b4] sm:$0xf0]  ;;  %v9171_v12 = vld [vmem:[#allocation17 + $0x5ac] sm:$0xf]  ;;  %v7813_v49 = vor.u32 %v9127_v46, %v7810_v16  ;;  %v7906_v46 = vld [vmem:[#allocation17 + $0x518] sm:$0xf0] }
 0x51b   :  { %4948 = vmatpush.bf16.msrb.mxu3 %v7429_v40  ;;  %v9071_v40 = vld [vmem:[#allocation17 + $0x28c] sm:$0xf] }
 0x51c   :  { %4934 = vmatpush.bf16.msra.mxu2 %v7317_v42  ;;  %v9023_v42 = vld [vmem:[#allocation17 + $0x10c] sm:$0xf] }
 0x51d   :  { %v7397_v5 = vor.u32 %v9023_v42, %v7394_v47  ;;  %v9229_v47 = vld [vmem:[#allocation17 + $0x774] sm:$0xf0]  ;;  %v9115_v16 = vld [vmem:[#allocation17 + $0x3ec] sm:$0xf] }
 0x51e   :  { %4910 = vmatpush.bf16.msra.mxu0 %v8049_v48  ;;  %4871 = vmatpush.bf16.msra.mxu1 %v7665_v53  ;;  %v9167_v48 = vld [vmem:[#allocation17 + $0x58c] sm:$0xf] }
 0x51f   :  { %4949 = vmatpush.bf16.msrb.mxu3 %v7413_v25  ;;  %v9067_v53 = vld [vmem:[#allocation17 + $0x26c] sm:$0xf]  ;;  %v7973_v42 = vor.u32 %v9167_v48, %v7970_v9  ;;  %v8208_v25 = vld [vmem:[#allocation17 + $0x768] sm:$0xf]  ;;  %v7762_v48 = vld [vmem:[#allocation17 + $0x3f8] sm:$0xf0] }
 0x520   :  { %4935 = vmatpush.bf16.msra.mxu2 %v7301_v4  ;;  %v8018_v4 = vld [vmem:[#allocation17 + $0x5f8] sm:$0xf0]  ;;  %v7573_v60 = vor.u32 %v9067_v53, %v7570_v54  ;;  %v9257_v53 = vld [vmem:[#allocation19 + $0x54] sm:$0xf0] }
 0x521   :  { %v8021_v18 = vor.u32 %v9179_v1, %v8018_v4  ;;  %v7554_v1 = vld [vmem:[#allocation17 + $0x258] sm:$0xf0]  ;;  %v7797_v4 = vor.u32 %v9123_v56, %v7794_v58  ;;  %v9111_v58 = vld [vmem:[#allocation17 + $0x3cc] sm:$0xf] }
 0x522   :  { %4911 = vmatpush.bf16.msra.mxu0 %v8033_v62  ;;  %4872 = vmatpush.bf16.msra.mxu1 %v7649_v6  ;;  %v8209_v62 = vor.u32 %v9229_v47, %v8208_v25  ;;  %v7557_v19 = vor.u32 %v9063_v0, %v7554_v1  ;;  %v7765_v25 = vor.u32 %v9115_v16, %v7762_v48  ;;  %v9207_v47 = vld [vmem:[#allocation17 + $0x6cc] sm:$0xf]  ;;  %v8130_v56 = vld [vmem:[#allocation17 + $0x6d8] sm:$0xf0] }
 0x523   :  { %4950 = vmatpush.bf16.msrb.mxu3 %v7397_v5  ;;  %v9225_v5 = vld [vmem:[#allocation17 + $0x754] sm:$0xf0]  ;;  %v9203_v1 = vld [vmem:[#allocation17 + $0x6ac] sm:$0xf] }
 0x524   :  { %4936 = vmatpush.bf16.msra.mxu2 %v7285_v24  ;;  %v9175_v24 = vld [vmem:[#allocation17 + $0x5cc] sm:$0xf] }
 0x525   :  { %v8005_v30 = vor.u32 %v9175_v24, %v8002_v26  ;;  %4873 = vmatmul.bf16.vlgmr.msra.gmra.mxu1 %v10030_v15  ;;  %4912 = vmatmul.bf16.vlgmr.msra.gmra.mxu0 %v10057_v43  ;;  %v9059_v24 = vld [vmem:[#allocation17 + $0x22c] sm:$0xf]  ;;  %v7538_v26 = vld [vmem:[#allocation17 + $0x238] sm:$0xf0] }
 0x526   :  { %4956 = vmatpush.bf16.msrb.mxu0 %v7637_v57  ;;  %4917 = vmatpush.bf16.msrb.mxu1 %v8273_v51  ;;  %v10088_v61 = vpop.f32.mrf.mxu3  ;;  %v8192_v57 = vld [vmem:[#allocation17 + $0x748] sm:$0xf]  ;;  %v9119_v51 = vld [vmem:[#allocation17 + $0x40c] sm:$0xf] }
 0x527   :  { %4995 = vmatpush.bf16.msra.mxu3 %v8021_v18  ;;  %v8193_v23 = vor.u32 %v9225_v5, %v8192_v57  ;;  %v8400_v57 = vld [vmem:[#allocation19 + $0xf0] sm:$0xf]  ;;  %v9277_v5 = vld [vmem:[#allocation19 + $0xf4] sm:$0xf0]  ;;  %v9191_v16 = vld [vmem:[#allocation17 + $0x64c] sm:$0xf] }
 0x528   :  { %4937 = vmatpush.bf16.msra.mxu2 %v7269_v39  ;;  %4951 = vmatmul.bf16.vlgmr.msrb.gmra.mxu3 %v10013_v10  ;;  %v8241_v39 = vor.u32 %v9237_v33, %v8240_v55  ;;  %v7589_v10 = vor.u32 %v9071_v40, %v7586_v34  ;;  %v8337_v55 = vor.u32 %v9261_v22, %v8336_v21  ;;  %v9055_v40 = vld [vmem:[#allocation17 + $0x20c] sm:$0xf]  ;;  %v7522_v34 = vld [vmem:[#allocation17 + $0x218] sm:$0xf0] }
 0x529   :  { %v7541_v33 = vor.u32 %v9059_v24, %v7538_v26  ;;  %v9199_v22 = vld [vmem:[#allocation17 + $0x68c] sm:$0xf]  ;;  %v8098_v24 = vld [vmem:[#allocation17 + $0x698] sm:$0xf0]  ;;  %v8392_v26 = vld [vmem:[#allocation19 + $0xe0] sm:$0xf] }
 0x52a   :  { %4918 = vmatpush.bf16.msrb.mxu1 %v8257_v27 }
 0x52b   :  { %4938 = vmatmul.bf16.vlgmr.msra.gmra.mxu2 %v10022_v17  ;;  %v7621_v17 = vor.u32 %v9079_v11, %v7618_v14  ;;  %4996 = vmatpush.bf16.msra.mxu3 %v8005_v30  ;;  %v7778_v11 = vld [vmem:[#allocation17 + $0x418] sm:$0xf0]  ;;  %v9159_v14 = vld [vmem:[#allocation17 + $0x54c] sm:$0xf] }
 0x52c   :  { %4982 = vmatpush.bf16.msrb.mxu2 %v7893_v41  ;;  %v7989_v41 = vor.u32 %v9171_v12, %v7986_v38  ;;  %v7922_v30 = vld [vmem:[#allocation17 + $0x538] sm:$0xf0]  ;;  %v9259_v12 = vld [vmem:[#allocation19 + $0x64] sm:$0xf0] }
 0x52d   :  { %4957 = vmatpush.bf16.msrb.mxu0 %v7621_v17  ;;  %v7781_v17 = vor.u32 %v9119_v51, %v7778_v11  ;;  %v8329_v9 = vor.u32 %v9259_v12, %v8328_v37  ;;  %v9107_v51 = vld [vmem:[#allocation17 + $0x3ac] sm:$0xf]  ;;  %v7730_v11 = vld [vmem:[#allocation17 + $0x3b8] sm:$0xf0] }
 0x52e   :  { %v10086_v50 = vpop.f32.mrf.mxu2  ;;  %4919 = vmatpush.bf16.msrb.mxu1 %v8241_v39  ;;  %v4694_v38 = vpop.f32.mrf.mxu3  ;;  %v9217_v39 = vld [vmem:[#allocation17 + $0x714] sm:$0xf0] }
 0x52f   :  { %4997 = vmatpush.bf16.msra.mxu3 %v7989_v41  ;;  %v9151_v41 = vld [vmem:[#allocation17 + $0x50c] sm:$0xf]  ;;  %v8161_v54 = vor.u32 %v9217_v39, %v8160_v35  ;;  %v8082_v38 = vld [vmem:[#allocation17 + $0x678] sm:$0xf0]  ;;  %v9273_v39 = vld [vmem:[#allocation19 + $0xd4] sm:$0xf0] }
 0x530   :  { %4983 = vmatpush.bf16.msrb.mxu2 %v7877_v3  ;;  %v9163_v3 = vld [vmem:[#allocation17 + $0x56c] sm:$0xf] }
 0x531   :  { %4958 = vmatpush.bf16.msrb.mxu0 %v7605_v36  ;;  %v7957_v6 = vor.u32 %v9163_v3, %v7954_v59  ;;  %v8177_v36 = vor.u32 %v9221_v2, %v8176_v28  ;;  %v7746_v3 = vld [vmem:[#allocation17 + $0x3d8] sm:$0xf0]  ;;  %v9195_v35 = vld [vmem:[#allocation17 + $0x66c] sm:$0xf] }
 0x532   :  { %4920 = vmatpush.bf16.msrb.mxu1 %v8225_v52  ;;  %v8320_v52 = vld [vmem:[#allocation19 + $0x50] sm:$0xf] }
 0x533   :  { %4998 = vmatpush.bf16.msra.mxu3 %v7973_v42  ;;  %v7909_v42 = vor.u32 %v9151_v41, %v7906_v46  ;;  %v8321_v59 = vor.u32 %v9257_v53, %v8320_v52  ;;  %v8085_v46 = vor.u32 %v9195_v35, %v8082_v38  ;;  %v9271_v52 = vld [vmem:[#allocation19 + $0xc4] sm:$0xf0]  ;;  %v9095_v53 = vld [vmem:[#allocation17 + $0x34c] sm:$0xf] }
 0x534   :  { %4984 = vmatpush.bf16.msrb.mxu2 %v7861_v7  ;;  %v7938_v7 = vld [vmem:[#allocation17 + $0x558] sm:$0xf0] }
 0x535   :  { %4959 = vmatpush.bf16.msrb.mxu0 %v7589_v10  ;;  %v7941_v27 = vor.u32 %v9159_v14, %v7938_v7  ;;  %v7525_v10 = vor.u32 %v9055_v40, %v7522_v34  ;;  %v8401_v7 = vor.u32 %v9277_v5, %v8400_v57  ;;  %v9099_v40 = vld [vmem:[#allocation17 + $0x36c] sm:$0xf]  ;;  %v7698_v34 = vld [vmem:[#allocation17 + $0x378] sm:$0xf0]  ;;  %v9269_v57 = vld [vmem:[#allocation19 + $0xb4] sm:$0xf0] }
 0x536   :  { %v4733_v18 = vpop.f32.mrf.mxu2  ;;  %4921 = vmatpush.bf16.msrb.mxu1 %v8209_v62  ;;  %v9255_v62 = vld [vmem:[#allocation19 + $0x44] sm:$0xf0]  ;;  %v10091_v0 = vpop.f32.mrf.mxu3  ;;  %v7701_v48 = vor.u32 %v9099_v40, %v7698_v34  ;;  %v9091_v5 = vld [vmem:[#allocation17 + $0x32c] sm:$0xf]  ;;  %v9265_v40 = vld [vmem:[#allocation19 + $0x94] sm:$0xf0] }
 0x537   :  { %4999 = vmatpush.bf16.msra.mxu3 %v7957_v6  ;;  %v8114_v6 = vld [vmem:[#allocation17 + $0x6b8] sm:$0xf0]  ;;  %v8304_v18 = vld [vmem:[#allocation19 + $0x30] sm:$0xf] }
 0x538   :  { %4985 = vmatpush.bf16.msrb.mxu2 %v7845_v29  ;;  %v9155_v29 = vld [vmem:[#allocation17 + $0x52c] sm:$0xf]  ;;  %v8117_v21 = vor.u32 %v9203_v1, %v8114_v6  ;;  %v8368_v6 = vld [vmem:[#allocation19 + $0xb0] sm:$0xf] }
 0x539   :  { %4960 = vmatpush.bf16.msrb.mxu0 %v7573_v60  ;;  %v8312_v60 = vld [vmem:[#allocation19 + $0x40] sm:$0xf] }
 0x53a   :  { %4922 = vmatpush.bf16.msrb.mxu1 %v8193_v23  ;;  %v8313_v14 = vor.u32 %v9255_v62, %v8312_v60  ;;  %v7733_v23 = vor.u32 %v9107_v51, %v7730_v11  ;;  %v9260_v60 = vld [vmem:[#allocation19 + $0x74] sm:$0xf]  ;;  %v8338_v62 = vld [vmem:[#allocation19 + $0x78] sm:$0xf0] }
 0x53b   :  { %5000 = vmatpush.bf16.msra.mxu3 %v7941_v27  ;;  %v7714_v27 = vld [vmem:[#allocation17 + $0x398] sm:$0xf0] }
 0x53c   :  { %4986 = vmatpush.bf16.msrb.mxu2 %v7829_v8  ;;  %v7925_v8 = vor.u32 %v9155_v29, %v7922_v30  ;;  %v8296_v29 = vld [vmem:[#allocation19 + $0x20] sm:$0xf]  ;;  %v9251_v30 = vld [vmem:[#allocation19 + $0x24] sm:$0xf0]  ;;  %v7666_v51 = vld [vmem:[#allocation17 + $0x338] sm:$0xf0] }
 0x53d   :  { %4961 = vmatpush.bf16.msrb.mxu0 %v7557_v19  ;;  %v9253_v19 = vld [vmem:[#allocation19 + $0x34] sm:$0xf0] }
 0x53e   :  { %4923 = vmatpush.bf16.msrb.mxu1 %v8177_v36  ;;  %v8305_v28 = vor.u32 %v9253_v19, %v8304_v18  ;;  %v4746_v37 = vpop.f32.mrf.mxu3  ;;  %v8384_v36 = vld [vmem:[#allocation19 + $0xd0] sm:$0xf]  ;;  %v9183_v19 = vld [vmem:[#allocation17 + $0x60c] sm:$0xf] }
 0x53f   :  { %5001 = vmatpush.bf16.msra.mxu3 %v7925_v8  ;;  %v8297_v8 = vor.u32 %v9251_v30, %v8296_v29  ;;  %v8385_v41 = vor.u32 %v9273_v39, %v8384_v36  ;;  %v8274_v29 = vld [vmem:[#allocation17 + $0x7f8] sm:$0xf0]  ;;  %v9256_v37 = vld [vmem:[#allocation19 + $0x54] sm:$0xf]  ;;  %v8352_v39 = vld [vmem:[#allocation19 + $0x90] sm:$0xf] }
 0x540   :  { %4987 = vmatpush.bf16.msrb.mxu2 %v7813_v49  ;;  %v8149_v49 = vor.u32 %v9211_v63, %v8146_v45  ;;  %v8288_v63 = vld [vmem:[#allocation19 + $0x10] sm:$0xf]  ;;  %v9249_v45 = vld [vmem:[#allocation19 + $0x14] sm:$0xf0] }
 0x541   :  { %4962 = vmatpush.bf16.msrb.mxu0 %v7541_v33  ;;  %v8101_v33 = vor.u32 %v9199_v22, %v8098_v24  ;;  %v8330_v22 = vld [vmem:[#allocation19 + $0x68] sm:$0xf0]  ;;  %v8034_v24 = vld [vmem:[#allocation17 + $0x618] sm:$0xf0] }
 0x542   :  { %4924 = vmatpush.bf16.msrb.mxu1 %v8161_v54  ;;  %v7682_v54 = vld [vmem:[#allocation17 + $0x358] sm:$0xf0]  ;;  %v8037_v35 = vor.u32 %v9183_v19, %v8034_v24 }
 0x543   :  { %5002 = vmatpush.bf16.msra.mxu3 %v7909_v42  ;;  %v7685_v1 = vor.u32 %v9095_v53, %v7682_v54  ;;  %v9276_v53 = vld [vmem:[#allocation19 + $0xf4] sm:$0xf]  ;;  %v8402_v54 = vld [vmem:[#allocation19 + $0xf8] sm:$0xf0] }
 0x544   :  { %4988 = vmatpush.bf16.msrb.mxu2 %v7797_v4  ;;  %v7749_v4 = vor.u32 %v9111_v58, %v7746_v3  ;;  %v8386_v19 = vld [vmem:[#allocation19 + $0xd8] sm:$0xf0] }
 0x545   :  { %4963 = vmatpush.bf16.msrb.mxu0 %v7525_v10  ;;  %4925 = vmatmul.bf16.vlgmr.msrb.gmra.mxu1 %v10064_v31  ;;  %v8376_v10 = vld [vmem:[#allocation19 + $0xc0] sm:$0xf] }
 0x546   :  { %4969 = vmatpush.bf16.msra.mxu1 %v7765_v25  ;;  %5003 = vmatmul.bf16.vlgmr.msra.gmra.mxu3 %v10051_v13  ;;  %v8377_v42 = vor.u32 %v9271_v52, %v8376_v10  ;;  %v8280_v25 = vld [vmem:[#allocation19] sm:$0xf] }
 0x547   :  { %5453 = vmatpush.bf16.msrb.mxu3 %v8401_v7  ;;  %v8341_v7 = vor.u32 %v9260_v60, %v8338_v62  ;;  %v9274_v60 = vld [vmem:[#allocation19 + $0xe4] sm:$0xf]  ;;  %v8394_v62 = vld [vmem:[#allocation19 + $0xe8] sm:$0xf0] }
 0x548   :  { %4989 = vmatpush.bf16.msrb.mxu2 %v7781_v17  ;;  %4964 = vmatmul.bf16.vlgmr.msrb.gmra.mxu0 %v10034_v44  ;;  %v9275_v44 = vld [vmem:[#allocation19 + $0xe4] sm:$0xf0]  ;;  %v9103_v17 = vld [vmem:[#allocation17 + $0x38c] sm:$0xf] }
 0x549   :  { %5008 = vmatpush.bf16.msra.mxu0 %v8149_v49  ;;  %v8393_v2 = vor.u32 %v9275_v44, %v8392_v26  ;;  %v7717_v12 = vor.u32 %v9103_v17, %v7714_v27  ;;  %v8289_v49 = vor.u32 %v9249_v45, %v8288_v63  ;;  %v8360_v26 = vld [vmem:[#allocation19 + $0xa0] sm:$0xf]  ;;  %v9267_v44 = vld [vmem:[#allocation19 + $0xa4] sm:$0xf0]  ;;  %v9087_v17 = vld [vmem:[#allocation17 + $0x30c] sm:$0xf] }
 0x54a   :  { %4970 = vmatpush.bf16.msra.mxu1 %v7749_v4  ;;  %v8050_v4 = vld [vmem:[#allocation17 + $0x638] sm:$0xf0] }
 0x54b   :  { %4990 = vmatmul.bf16.vlgmr.msrb.gmra.mxu2 %v10038_v32  ;;  %v8133_v32 = vor.u32 %v9207_v47, %v8130_v56  ;;  %5454 = vmatpush.bf16.msrb.mxu3 %v8393_v2  ;;  %v9247_v47 = vld [vmem:[#allocation19 + $0x4] sm:$0xf0]  ;;  %v7650_v27 = vld [vmem:[#allocation17 + $0x318] sm:$0xf0]  ;;  %v9243_v2 = vld [vmem:[#allocation17 + $0x7ec] sm:$0xf] }
 0x54c   :  { %5440 = vmatpush.bf16.msra.mxu2 %v8337_v55  ;;  %v10096_v55 = vpop.f32.mrf.mxu0  ;;  %v8281_v11 = vor.u32 %v9247_v47, %v8280_v25  ;;  %v7653_v36 = vor.u32 %v9087_v17, %v7650_v27  ;;  %v8277_v34 = vor.u32 %v9243_v2, %v8274_v29  ;;  %v8258_v63 = vld [vmem:[#allocation17 + $0x7d8] sm:$0xf0]  ;;  %v8405_v47 = vor.u32 %v9276_v53, %v8402_v54  ;;  %v9270_v2 = vld [vmem:[#allocation19 + $0xc4] sm:$0xf]  ;;  %v8378_v29 = vld [vmem:[#allocation19 + $0xc8] sm:$0xf0] }
 0x54d   :  { %5009 = vmatpush.bf16.msra.mxu0 %v8133_v32  ;;  %v10100_v32 = vpop.f32.mrf.mxu3 }
 0x54e   :  { %v10098_v13 = vpop.f32.mrf.mxu2  ;;  %4971 = vmatpush.bf16.msra.mxu1 %v7733_v23  ;;  %v7669_v23 = vor.u32 %v9091_v5, %v7666_v51  ;;  %v9250_v5 = vld [vmem:[#allocation19 + $0x24] sm:$0xf]  ;;  %v8298_v51 = vld [vmem:[#allocation19 + $0x28] sm:$0xf0] }
 0x54f   :  { %5455 = vmatpush.bf16.msrb.mxu3 %v8385_v41  ;;  %v9239_v41 = vld [vmem:[#allocation17 + $0x7cc] sm:$0xf] }
 0x550   :  { %5441 = vmatpush.bf16.msra.mxu2 %v8329_v9  ;;  %v8066_v9 = vld [vmem:[#allocation17 + $0x658] sm:$0xf0]  ;;  %v8261_v10 = vor.u32 %v9239_v41, %v8258_v63 }
 0x551   :  { %5010 = vmatpush.bf16.msra.mxu0 %v8117_v21  ;;  %v8069_v3 = vor.u32 %v9191_v16, %v8066_v9  ;;  %v9258_v21 = vld [vmem:[#allocation19 + $0x64] sm:$0xf]  ;;  %v8314_v16 = vld [vmem:[#allocation19 + $0x48] sm:$0xf0]  ;;  %v9263_v9 = vld [vmem:[#allocation19 + $0x84] sm:$0xf0] }
 0x552   :  { %4972 = vmatpush.bf16.msra.mxu1 %v7717_v12  ;;  %v8333_v30 = vor.u32 %v9258_v21, %v8330_v22  ;;  %v8322_v12 = vld [vmem:[#allocation19 + $0x58] sm:$0xf0]  ;;  %v9227_v22 = vld [vmem:[#allocation17 + $0x76c] sm:$0xf] }
 0x553   :  { %5456 = vmatpush.bf16.msrb.mxu3 %v8377_v42  ;;  %v8325_v45 = vor.u32 %v9256_v37, %v8322_v12  ;;  %v8242_v42 = vld [vmem:[#allocation17 + $0x7b8] sm:$0xf0] }
 0x554   :  { %5442 = vmatpush.bf16.msra.mxu2 %v8321_v59  ;;  %v4707_v56 = vpop.f32.mrf.mxu0  ;;  %v9187_v59 = vld [vmem:[#allocation17 + $0x62c] sm:$0xf]  ;;  %v8194_v37 = vld [vmem:[#allocation17 + $0x758] sm:$0xf0] }
 0x555   :  { %5011 = vmatpush.bf16.msra.mxu0 %v8101_v33  ;;  %v8053_v18 = vor.u32 %v9187_v59, %v8050_v4  ;;  %v4798_v38 = vpop.f32.mrf.mxu3  ;;  %v8226_v4 = vld [vmem:[#allocation17 + $0x798] sm:$0xf0] }
 0x556   :  { %v4785_v58 = vpop.f32.mrf.mxu2  ;;  %4973 = vmatpush.bf16.msra.mxu1 %v7701_v48  ;;  %v8344_v48 = vld [vmem:[#allocation19 + $0x80] sm:$0xf]  ;;  %v8381_v38 = vor.u32 %v9270_v2, %v8378_v29 }
 0x557   :  { %v8345_v52 = vor.u32 %v9263_v9, %v8344_v48  ;;  %v9252_v58 = vld [vmem:[#allocation19 + $0x34] sm:$0xf]  ;;  %v9219_v9 = vld [vmem:[#allocation17 + $0x72c] sm:$0xf] }
 0x558   :  { %5443 = vmatpush.bf16.msra.mxu2 %v8313_v14  ;;  %v8369_v14 = vor.u32 %v9269_v57, %v8368_v6  ;;  %v8397_v57 = vor.u32 %v9274_v60, %v8394_v62  ;;  %v9264_v62 = vld [vmem:[#allocation19 + $0x94] sm:$0xf] }
 0x559   :  { %5012 = vmatpush.bf16.msra.mxu0 %v8085_v46  ;;  %v9254_v46 = vld [vmem:[#allocation19 + $0x44] sm:$0xf] }
 0x55a   :  { %4974 = vmatpush.bf16.msra.mxu1 %v7685_v1  ;;  %5457 = vmatpush.bf16.msrb.mxu3 %v8369_v14  ;;  %v8317_v25 = vor.u32 %v9254_v46, %v8314_v16  ;;  %v4693_v1 = vadd.f32 %v10088_v61, %v10080_v20  ;;  %v8301_v20 = vor.u32 %v9250_v5, %v8298_v51  ;;  %v8370_v46 = vld [vmem:[#allocation19 + $0xb8] sm:$0xf0] }
 0x55c   :  { %5444 = vmatpush.bf16.msra.mxu2 %v8305_v28  ;;  %v8361_v28 = vor.u32 %v9267_v44, %v8360_v26  ;;  %v10102_v33 = vpop.f32.mrf.mxu0  ;;  %v9248_v26 = vld [vmem:[#allocation19 + $0x14] sm:$0xf]  ;;  %v8290_v44 = vld [vmem:[#allocation19 + $0x18] sm:$0xf0] }
 0x55d   :  { %5013 = vmatpush.bf16.msra.mxu0 %v8069_v3  ;;  %v8306_v3 = vld [vmem:[#allocation19 + $0x38] sm:$0xf0]  ;;  %v8293_v12 = vor.u32 %v9248_v26, %v8290_v44 }
 0x55e   :  { %4975 = vmatpush.bf16.msra.mxu1 %v7669_v23  ;;  %5458 = vmatpush.bf16.msrb.mxu3 %v8361_v28  ;;  %v8309_v6 = vor.u32 %v9252_v58, %v8306_v3  ;;  %v8210_v23 = vld [vmem:[#allocation17 + $0x778] sm:$0xf0]  ;;  %v9215_v58 = vld [vmem:[#allocation17 + $0x70c] sm:$0xf] }
 0x55f   :  { %v4718_v14 = vpop.f32.mrf.mxu1  ;;  %v8213_v28 = vor.u32 %v9227_v22, %v8210_v23  ;;  %v8162_v3 = vld [vmem:[#allocation17 + $0x718] sm:$0xf0]  ;;  %v9291_v22 = vld [vmem:[#allocation19 + $0x164] sm:$0xf0] }
 0x560   :  { %5445 = vmatpush.bf16.msra.mxu2 %v8297_v8  ;;  %v8353_v8 = vor.u32 %v9265_v40, %v8352_v39  ;;  %v9246_v39 = vld [vmem:[#allocation19 + $0x4] sm:$0xf]  ;;  %v8282_v40 = vld [vmem:[#allocation19 + $0x8] sm:$0xf0] }
 0x561   :  { %5014 = vmatpush.bf16.msra.mxu0 %v8053_v18  ;;  %v9272_v18 = vld [vmem:[#allocation19 + $0xd4] sm:$0xf] }
 0x562   :  { %4976 = vmatpush.bf16.msra.mxu1 %v7653_v36  ;;  %5459 = vmatpush.bf16.msrb.mxu3 %v8353_v8  ;;  %v8389_v61 = vor.u32 %v9272_v18, %v8386_v19 }
 0x564   :  { %5446 = vmatpush.bf16.msra.mxu2 %v8289_v49  ;;  %v9235_v49 = vld [vmem:[#allocation17 + $0x7ac] sm:$0xf]  ;;  %v4759_v56 = vpop.f32.mrf.mxu0 }
 0x565   :  { %5015 = vmatpush.bf16.msra.mxu0 %v8037_v35  ;;  %4977 = vmatmul.bf16.vlgmr.msra.gmra.mxu1 %v10030_v15  ;;  %v8245_v59 = vor.u32 %v9235_v49, %v8242_v42  ;;  %v4706_v15 = vadd.f32 %v10096_v55, %v4693_v1  ;;  %v10114_v55 = vld [vmem:[%s10215_s16] sm:$0xf]  ;;  %v9223_v35 = vld [vmem:[#allocation17 + $0x74c] sm:$0xf]  ;;  %v8354_v1 = vld [vmem:[#allocation19 + $0x98] sm:$0xf0] }
 0x566   :  { %5021 = vmatpush.bf16.msrb.mxu1 %v8277_v34  ;;  %5460 = vmatpush.bf16.msrb.mxu3 %v8345_v52  ;;  %v3332_v27 = vperm.slane %v10114_v55, 2  ;;  %v8197_v63 = vor.u32 %v9223_v35, %v8194_v37  ;;  %v3331_v16 = vperm.slane %v10114_v55, 1  ;;  %v8285_v52 = vor.u32 %v9246_v39, %v8282_v40  ;;  %v9285_v35 = vld [vmem:[#allocation19 + $0x134] sm:$0xf0]  ;;  %s10254_s16 = sld [smem:[#allocation41_spill]] }
 0x567   :  { %v4719_v21 = vadd.f32 %v4718_v14, %v4706_v15  ;;  %v4720_v41 = vpop.f32.mrf.mxu1  ;;  %v8357_v15 = vor.u32 %v9264_v62, %v8354_v1  ;;  %v8346_v14 = vld [vmem:[#allocation19 + $0x88] sm:$0xf0]  ;;  %v9286_v1 = vld [vmem:[#allocation19 + $0x144] sm:$0xf] }
 0x568   :  { %5447 = vmatpush.bf16.msra.mxu2 %v8281_v11  ;;  %5016 = vmatmul.bf16.vlgmr.msra.gmra.mxu0 %v10057_v43  ;;  %v9231_v43 = vld [vmem:[#allocation17 + $0x78c] sm:$0xf]  ;;  %v4848_v48 = vpop.f32.mrf.mxu3  ;;  %v4732_v56 = vadd.f32 %v10086_v50, %v3331_v16 }
 0x569   :  { %vm5034_vm8 = vcmp.gt.f32.partialorder %v4719_v21, 0.0  ;;  %v5038_v17 = vmul.f32 0.01, %v4719_v21 }
 0x56a   :  { %5022 = vmatpush.bf16.msrb.mxu1 %v8261_v10  ;;  %5505 = vmatpush.bf16.msra.mxu3 %v8405_v47  ;;  %v8178_v10 = vld [vmem:[#allocation17 + $0x738] sm:$0xf0]  ;;  %v8362_v47 = vld [vmem:[#allocation19 + $0xa8] sm:$0xf0]  ;;  %v4745_v60 = vadd.f32 %v10091_v0, %v4732_v56  ;;  %v9288_v56 = vld [vmem:[#allocation19 + $0x154] sm:$0xf] }
 0x56b   :  { %v8181_v42 = vor.u32 %v9219_v9, %v8178_v10  ;;  %v9292_v9 = vld [vmem:[#allocation19 + $0x174] sm:$0xf]  ;;  %v8466_v10 = vld [vmem:[#allocation19 + $0x178] sm:$0xf0] }
 0x56c   :  { %5492 = vmatpush.bf16.msrb.mxu2 %v8341_v7  ;;  %v8229_v7 = vor.u32 %v9231_v43, %v8226_v4  ;;  %v10109_v24 = vpop.f32.mrf.mxu0  ;;  %v8464_v43 = vld [vmem:[#allocation19 + $0x170] sm:$0xf]  ;;  %v4758_v5 = vadd.f32 %v10102_v33, %v4745_v60 }
 0x56e   :  { %v4835_v11 = vpop.f32.mrf.mxu2  ;;  %5023 = vmatpush.bf16.msrb.mxu1 %v8245_v59  ;;  %5506 = vmatpush.bf16.msra.mxu3 %v8397_v57  ;;  %v9293_v57 = vld [vmem:[#allocation19 + $0x174] sm:$0xf0] }
 0x56f   :  { %v4836_v8 = vadd.f32 %v4835_v11, %v3332_v27  ;;  %v4770_v4 = vpop.f32.mrf.mxu1  ;;  %v8465_v50 = vor.u32 %v9293_v57, %v8464_v43  ;;  %v9262_v11 = vld [vmem:[#allocation19 + $0x84] sm:$0xf]  ;;  %v8440_v27 = vld [vmem:[#allocation19 + $0x140] sm:$0xf]  ;;  %v8442_v43 = vld [vmem:[#allocation19 + $0x148] sm:$0xf0] }
 0x570   :  { %5493 = vmatpush.bf16.msrb.mxu2 %v8333_v30  ;;  %v5042_v30 = vsel %vm5034_vm8, %v4719_v21, %v5038_v17  ;;  %v4850_v51 = vpop.f32.mrf.mxu3  ;;  %v8349_v0 = vor.u32 %v9262_v11, %v8346_v14  ;;  %v8456_v21 = vld [vmem:[#allocation19 + $0x160] sm:$0xf]  ;;  %v9284_v57 = vld [vmem:[#allocation19 + $0x134] sm:$0xf] }
 0x571   :  { %v5111_v36 = vpack.c.bf16 %v5042_v30, %v5042_v30  ;;  %v10118_v54 = vadd.f32 %v4848_v48, %v4836_v8  ;;  %5466 = vmatpush.bf16.msrb.mxu0 %v8465_v50  ;;  %v8457_v33 = vor.u32 %v9291_v22, %v8456_v21  ;;  %v9279_v48 = vld [vmem:[#allocation19 + $0x104] sm:$0xf0]  ;;  %v8426_v50 = vld [vmem:[#allocation19 + $0x128] sm:$0xf0]  ;;  %v9280_v22 = vld [vmem:[#allocation19 + $0x114] sm:$0xf] }
 0x572   :  { %5024 = vmatpush.bf16.msrb.mxu1 %v8229_v7  ;;  %5507 = vmatpush.bf16.msra.mxu3 %v8389_v61  ;;  %v4771_v7 = vadd.f32 %v4770_v4, %v4758_v5  ;;  %v9289_v61 = vld [vmem:[#allocation19 + $0x154] sm:$0xf0]  ;;  %v8445_v4 = vor.u32 %v9286_v1, %v8442_v43  ;;  %v8434_v5 = vld [vmem:[#allocation19 + $0x138] sm:$0xf0]  ;;  %v9308_v1 = vld [vmem:[#allocation19 + $0x1f4] sm:$0xf] }
 0x573   :  { %5448 = vmatmul.bf16.vlgmr.msra.gmra.mxu2 %v5111_v36  ;;  %v8437_v51 = vor.u32 %v9284_v57, %v8434_v5  ;;  %v8530_v43 = vld [vmem:[#allocation19 + $0x1f8] sm:$0xf0]  ;;  %v8522_v57 = vld [vmem:[#allocation19 + $0x1e8] sm:$0xf0] }
 0x574   :  { %5494 = vmatpush.bf16.msrb.mxu2 %v8325_v45  ;;  %v9268_v45 = vld [vmem:[#allocation19 + $0xb4] sm:$0xf]  ;;  %v4811_v49 = vpop.f32.mrf.mxu0  ;;  %v4784_v18 = vadd.f32 %v10098_v13, %v4771_v7 }
 0x575   :  { %v8373_v53 = vor.u32 %v9268_v45, %v8370_v46  ;;  %5467 = vmatpush.bf16.msrb.mxu0 %v8457_v33  ;;  %v9281_v45 = vld [vmem:[#allocation19 + $0x114] sm:$0xf0]  ;;  %v8408_v46 = vld [vmem:[#allocation19 + $0x100] sm:$0xf]  ;;  %v8469_v49 = vor.u32 %v9292_v9, %v8466_v10  ;;  %v8418_v33 = vld [vmem:[#allocation19 + $0x118] sm:$0xf0] }
 0x576   :  { %v4837_v34 = vpop.f32.mrf.mxu2  ;;  %5025 = vmatpush.bf16.msrb.mxu1 %v8213_v28  ;;  %5508 = vmatpush.bf16.msra.mxu3 %v8381_v38  ;;  %v4797_v23 = vadd.f32 %v10100_v32, %v4784_v18  ;;  %v9287_v28 = vld [vmem:[#allocation19 + $0x144] sm:$0xf0]  ;;  %v8432_v32 = vld [vmem:[#allocation19 + $0x130] sm:$0xf]  ;;  %v8424_v38 = vld [vmem:[#allocation19 + $0x120] sm:$0xf] }
 0x577   :  { %v4772_v19 = vpop.f32.mrf.mxu1  ;;  %v8441_v29 = vor.u32 %v9287_v28, %v8440_v27  ;;  %v9299_v9 = vld [vmem:[#allocation19 + $0x1a4] sm:$0xf0] }
 0x578   :  { %5495 = vmatpush.bf16.msrb.mxu2 %v8317_v25  ;;  %v9266_v25 = vld [vmem:[#allocation19 + $0xa4] sm:$0xf]  ;;  %v4810_v17 = vadd.f32 %v10109_v24, %v4797_v23 }
 0x579   :  { %v8365_v59 = vor.u32 %v9266_v25, %v8362_v47  ;;  %v8458_v25 = vld [vmem:[#allocation19 + $0x168] sm:$0xf0]  ;;  %v9278_v23 = vld [vmem:[#allocation19 + $0x104] sm:$0xf] }
 0x57a   :  { %5026 = vmatpush.bf16.msrb.mxu1 %v8197_v63  ;;  %5509 = vmatpush.bf16.msra.mxu3 %v8373_v53  ;;  %v8416_v63 = vld [vmem:[#allocation19 + $0x110] sm:$0xf]  ;;  %v8409_v53 = vor.u32 %v9279_v48, %v8408_v46  ;;  %v8488_v48 = vld [vmem:[#allocation19 + $0x1a0] sm:$0xf] }
 0x57b   :  { %v8417_v16 = vor.u32 %v9281_v45, %v8416_v63  ;;  %v8496_v45 = vld [vmem:[#allocation19 + $0x1b0] sm:$0xf] }
 0x57c   :  { %5496 = vmatpush.bf16.msrb.mxu2 %v8309_v6  ;;  %v8165_v6 = vor.u32 %v9215_v58, %v8162_v3  ;;  %v8450_v58 = vld [vmem:[#allocation19 + $0x158] sm:$0xf0] }
 0x57d   :  { %v8453_v3 = vor.u32 %v9288_v56, %v8450_v58  ;;  %v9297_v56 = vld [vmem:[#allocation19 + $0x194] sm:$0xf0] }
 0x57e   :  { %5027 = vmatpush.bf16.msrb.mxu1 %v8181_v42  ;;  %5510 = vmatpush.bf16.msra.mxu3 %v8365_v59  ;;  %v9290_v42 = vld [vmem:[#allocation19 + $0x164] sm:$0xf] }
 0x57f   :  { %v8461_v47 = vor.u32 %v9290_v42, %v8458_v25 }
 0x580   :  { %5497 = vmatpush.bf16.msrb.mxu2 %v8301_v20  ;;  %v8448_v20 = vld [vmem:[#allocation19 + $0x150] sm:$0xf] }
 0x581   :  { %v8449_v26 = vor.u32 %v9289_v61, %v8448_v20  ;;  %v8410_v20 = vld [vmem:[#allocation19 + $0x108] sm:$0xf0]  ;;  %v8528_v61 = vld [vmem:[#allocation19 + $0x1f0] sm:$0xf] }
 0x582   :  { %5028 = vmatpush.bf16.msrb.mxu1 %v8165_v6  ;;  %5511 = vmatpush.bf16.msra.mxu3 %v8357_v15  ;;  %v10129_v13 = vpop.f32.mrf.mxu0  ;;  %v3333_v6 = vperm.slane %v10114_v55, 3  ;;  %v9282_v15 = vld [vmem:[#allocation19 + $0x124] sm:$0xf]  ;;  %v8421_v55 = vor.u32 %v9280_v22, %v8418_v33  ;;  %v8413_v28 = vor.u32 %v9278_v23, %v8410_v20  ;;  %v8498_v22 = vld [vmem:[#allocation19 + $0x1b8] sm:$0xf0] }
 0x583   :  { %5468 = vmatpush.bf16.msrb.mxu0 %v8449_v26  ;;  %v9309_v26 = vld [vmem:[#allocation19 + $0x1f4] sm:$0xf0]  ;;  %v9298_v23 = vld [vmem:[#allocation19 + $0x1a4] sm:$0xf] }
 0x584   :  { %5498 = vmatpush.bf16.msrb.mxu2 %v8293_v12  ;;  %v8433_v12 = vor.u32 %v9285_v35, %v8432_v32  ;;  %v9307_v32 = vld [vmem:[#allocation19 + $0x1e4] sm:$0xf0] }
 0x585   :  { %5029 = vmatmul.bf16.vlgmr.msrb.gmra.mxu1 %v10064_v31  ;;  %v4822_v31 = vpop.f32.mrf.mxu1 }
 0x586   :  { %5512 = vmatpush.bf16.msra.mxu3 %v8349_v0  ;;  %v4823_v2 = vadd.f32 %v4822_v31, %v4810_v17  ;;  %v8429_v0 = vor.u32 %v9282_v15, %v8426_v50  ;;  %v4862_v17 = vadd.f32 %v10129_v13, %v10118_v54  ;;  %v8529_v31 = vor.u32 %v9309_v26, %v8528_v61  ;;  %v8514_v15 = vld [vmem:[#allocation19 + $0x1d8] sm:$0xf0] }
 0x587   :  { %5469 = vmatpush.bf16.msrb.mxu0 %v8441_v29 }
 0x588   :  { %5499 = vmatpush.bf16.msrb.mxu2 %v8285_v52  ;;  %vm5035_vm9 = vcmp.gt.f32.partialorder %v4823_v2, 0.0  ;;  %v5039_v30 = vmul.f32 0.01, %v4823_v2  ;;  %5479 = vmatpush.bf16.msra.mxu1 %v8529_v31  ;;  %v8482_v31 = vld [vmem:[#allocation19 + $0x198] sm:$0xf0] }
 0x58a   :  { %v5043_v37 = vsel %vm5035_vm9, %v4823_v2, %v5039_v30  ;;  %v4863_v8 = vpop.f32.mrf.mxu0  ;;  %v8520_v30 = vld [vmem:[#allocation19 + $0x1e0] sm:$0xf] }
 0x58b   :  { %5500 = vmatmul.bf16.vlgmr.msrb.gmra.mxu2 %v5111_v36  ;;  %v9283_v36 = vld [vmem:[#allocation19 + $0x124] sm:$0xf0]  ;;  %v5112_v39 = vpack.c.bf16 %v5043_v37, %v5043_v37  ;;  %v10131_v24 = vpop.f32.mrf.mxu3  ;;  %5470 = vmatpush.bf16.msrb.mxu0 %v8433_v12  ;;  %v8521_v35 = vor.u32 %v9307_v32, %v8520_v30  ;;  %v8512_v12 = vld [vmem:[#allocation19 + $0x1d0] sm:$0xf] }
 0x58c   :  { %v8425_v34 = vor.u32 %v9283_v36, %v8424_v38  ;;  %v9305_v38 = vld [vmem:[#allocation19 + $0x1d4] sm:$0xf0]  ;;  %v9303_v8 = vld [vmem:[#allocation19 + $0x1c4] sm:$0xf0] }
 0x58d   :  { %v4824_v41 = vpop.f32.mrf.mxu1  ;;  %5461 = vmatmul.bf16.vlgmr.msrb.gmra.mxu3 %v5112_v39  ;;  %5480 = vmatpush.bf16.msra.mxu1 %v8521_v35  ;;  %v8513_v36 = vor.u32 %v9305_v38, %v8512_v12 }
 0x58e   :  { %v10126_v44 = vpop.f32.mrf.mxu2 }
 0x58f   :  { %5471 = vmatpush.bf16.msrb.mxu0 %v8425_v34  ;;  %v8504_v34 = vld [vmem:[#allocation19 + $0x1c0] sm:$0xf] }
 0x591   :  { %5481 = vmatpush.bf16.msra.mxu1 %v8513_v36 }
 0x593   :  { %v4902_v52 = vpop.f32.mrf.mxu3  ;;  %5472 = vmatpush.bf16.msrb.mxu0 %v8417_v16 }
 0x596   :  { %v4889_v40 = vpop.f32.mrf.mxu2 }
 0x597   :  { %5473 = vmatpush.bf16.msrb.mxu0 %v8409_v53 }
 0x59b   :  { %5518 = vmatpush.bf16.msra.mxu0 %v8469_v49  ;;  %v8489_v49 = vor.u32 %v9299_v9, %v8488_v48 }
 0x59d   :  { %5513 = vmatmul.bf16.vlgmr.msra.gmra.mxu3 %v5112_v39 }
 0x59f   :  { %5519 = vmatpush.bf16.msra.mxu0 %v8461_v47  ;;  %v8480_v47 = vld [vmem:[#allocation19 + $0x190] sm:$0xf] }
 0x5a0   :  { %v8481_v58 = vor.u32 %v9297_v56, %v8480_v47  ;;  %v9324_v47 = vld [vmem:[#allocation20 + $0x70] sm:$0xff]  ;;  %v9315_v56 = vld [vmem:[#allocation20 + $0x28] sm:$0xff] }
 0x5a2   :  { %v4874_v60 = vpop.f32.mrf.mxu1  ;;  %v4913_v62 = vpop.f32.mrf.mxu0 }
 0x5a3   :  { %5520 = vmatpush.bf16.msra.mxu0 %v8453_v3  ;;  %v4875_v2 = vadd.f32 %v4874_v60, %v4862_v17  ;;  %v9295_v60 = vld [vmem:[#allocation19 + $0x184] sm:$0xf0]  ;;  %v9296_v17 = vld [vmem:[#allocation19 + $0x194] sm:$0xf] }
 0x5a5   :  { %v4888_v29 = vadd.f32 %v10126_v44, %v4875_v2  ;;  %v8505_v44 = vor.u32 %v9303_v8, %v8504_v34  ;;  %v8474_v2 = vld [vmem:[#allocation19 + $0x188] sm:$0xf0] }
 0x5a7   :  { %5521 = vmatpush.bf16.msra.mxu0 %v8445_v4  ;;  %v4901_v37 = vadd.f32 %v10131_v24, %v4888_v29  ;;  %5482 = vmatpush.bf16.msra.mxu1 %v8505_v44  ;;  %v9301_v24 = vld [vmem:[#allocation19 + $0x1b4] sm:$0xf0]  ;;  %v8533_v4 = vor.u32 %v9308_v1, %v8530_v43 }
 0x5a8   :  { %v8497_v16 = vor.u32 %v9301_v24, %v8496_v45 }
 0x5a9   :  { %v4914_v39 = vadd.f32 %v4913_v62, %v4901_v37 }
 0x5aa   :  { %v4876_v19 = vpop.f32.mrf.mxu1  ;;  %v4915_v21 = vpop.f32.mrf.mxu0 }
 0x5ab   :  { %v4952_v7 = vpop.f32.mrf.mxu3  ;;  %5522 = vmatpush.bf16.msra.mxu0 %v8437_v51  ;;  %5483 = vmatpush.bf16.msra.mxu1 %v8497_v16  ;;  %v9304_v51 = vld [vmem:[#allocation19 + $0x1d4] sm:$0xf] }
 0x5ac   :  { %v8517_v50 = vor.u32 %v9304_v51, %v8514_v15  ;;  %v9300_v21 = vld [vmem:[#allocation19 + $0x1b4] sm:$0xf]  ;;  %v9321_v51 = vld [vmem:[#allocation20 + $0x58] sm:$0xff] }
 0x5ad   :  { %v8501_v33 = vor.u32 %v9300_v21, %v8498_v22  ;;  %v9320_v15 = vld [vmem:[#allocation20 + $0x50] sm:$0xff] }
 0x5ae   :  { %v4939_v59 = vpop.f32.mrf.mxu2 }
 0x5af   :  { %v4940_v11 = vadd.f32 %v4939_v59, %v3333_v6  ;;  %5523 = vmatpush.bf16.msra.mxu0 %v8429_v0  ;;  %5484 = vmatpush.bf16.msra.mxu1 %v8489_v49  ;;  %v8472_v59 = vld [vmem:[#allocation19 + $0x180] sm:$0xf]  ;;  %v9306_v6 = vld [vmem:[#allocation19 + $0x1e4] sm:$0xf]  ;;  %v8506_v0 = vld [vmem:[#allocation19 + $0x1c8] sm:$0xf0] }
 0x5b0   :  { %v8473_v62 = vor.u32 %v9295_v60, %v8472_v59  ;;  %v8525_v5 = vor.u32 %v9306_v6, %v8522_v57  ;;  %v9317_v49 = vld [vmem:[#allocation20 + $0x38] sm:$0xff]  ;;  %v9323_v6 = vld [vmem:[#allocation20 + $0x68] sm:$0xff]  ;;  %v9310_v57 = vld [vmem:[#allocation20] sm:$0xff] }
 0x5b1   :  { %v10134_v18 = vadd.f32 %v4952_v7, %v4940_v11  ;;  %v9302_v7 = vld [vmem:[#allocation19 + $0x1c4] sm:$0xf]  ;;  %5684 = vmatpush.bf16.msra.mxu2 %v9317_v49  ;;  %v9313_v59 = vld [vmem:[#allocation20 + $0x18] sm:$0xff] }
 0x5b2   :  { %v8509_v19 = vor.u32 %v9302_v7, %v8506_v0  ;;  %v9332_v7 = vld [vmem:[%s10220_s21 + $0x30] sm:$0xff] }
 0x5b3   :  { %v4954_v27 = vpop.f32.mrf.mxu3  ;;  %5524 = vmatpush.bf16.msra.mxu0 %v8421_v55  ;;  %5485 = vmatpush.bf16.msra.mxu1 %v8481_v58  ;;  %v8490_v55 = vld [vmem:[#allocation19 + $0x1a8] sm:$0xf0] }
 0x5b4   :  { %v8493_v61 = vor.u32 %v9298_v23, %v8490_v55  ;;  %v9294_v27 = vld [vmem:[#allocation19 + $0x184] sm:$0xf] }
 0x5b5   :  { %v8477_v30 = vor.u32 %v9294_v27, %v8474_v2  ;;  %v9331_v2 = vld [vmem:[%s10220_s21 + $0x28] sm:$0xff] }
 0x5b6   :  { %v4941_v14 = vpop.f32.mrf.mxu2 }
 0x5b7   :  { %5525 = vmatpush.bf16.msra.mxu0 %v8413_v28  ;;  %5486 = vmatpush.bf16.msra.mxu1 %v8473_v62  ;;  %v8485_v28 = vor.u32 %v9296_v17, %v8482_v31  ;;  %v9312_v62 = vld [vmem:[#allocation20 + $0x10] sm:$0xff] }
 0x5bb   :  { %5531 = vmatpush.bf16.msrb.mxu1 %v8533_v4  ;;  %v9311_v4 = vld [vmem:[#allocation20 + $0x8] sm:$0xff] }
 0x5bf   :  { %5532 = vmatpush.bf16.msrb.mxu1 %v8525_v5  ;;  %v9322_v5 = vld [vmem:[#allocation20 + $0x60] sm:$0xff] }
 0x5c2   :  { %v4926_v40 = vpop.f32.mrf.mxu1 }
 0x5c3   :  { %v4927_v41 = vadd.f32 %v4926_v40, %v4914_v39  ;;  %5533 = vmatpush.bf16.msrb.mxu1 %v8517_v50  ;;  %v9319_v50 = vld [vmem:[#allocation20 + $0x48] sm:$0xff] }
 0x5c5   :  { %v10142_v13 = vpop.f32.mrf.mxu0  ;;  %vm5036_vm10 = vcmp.gt.f32.partialorder %v4927_v41, 0.0  ;;  %v5040_v63 = vmul.f32 0.01, %v4927_v41 }
 0x5c6   :  { %v4966_v29 = vadd.f32 %v10142_v13, %v10134_v18  ;;  %v5110_v18 = vld [vmem:[%s10217_s18] sm:$0x3] }
 0x5c7   :  { %v5044_v46 = vsel %vm5036_vm10, %v4927_v41, %v5040_v63  ;;  %5534 = vmatpush.bf16.msrb.mxu1 %v8509_v19  ;;  %v5116_v45 = vperm.slane %v5110_v18, 0  ;;  %v5117_v48 = vperm.slane %v5110_v18, 1 }
 0x5c8   :  { %v5113_v10 = vpack.c.bf16 %v5044_v46, %v5044_v46 }
 0x5c9   :  { %v5004_v53 = vpop.f32.mrf.mxu3 }
 0x5ca   :  { %v4928_v42 = vpop.f32.mrf.mxu1  ;;  %5474 = vmatmul.bf16.vlgmr.msrb.gmra.mxu0 %v5113_v10 }
 0x5cb   :  { %5535 = vmatpush.bf16.msrb.mxu1 %v8501_v33  ;;  %v9325_v42 = vld [vmem:[#allocation20 + $0x78] sm:$0xff] }
 0x5cc   :  { %5697 = vmatpush.bf16.msrb.mxu3 %v9325_v42 }
 0x5cd   :  { %v4967_v25 = vpop.f32.mrf.mxu0 }
 0x5ce   :  { %v10140_v54 = vpop.f32.mrf.mxu2  ;;  %v9316_v25 = vld [vmem:[#allocation20 + $0x30] sm:$0xff] }
 0x5cf   :  { %5536 = vmatpush.bf16.msrb.mxu1 %v8493_v61  ;;  %5685 = vmatpush.bf16.msra.mxu2 %v9316_v25 }
 0x5d0   :  { %5698 = vmatpush.bf16.msrb.mxu3 %v9324_v47 }
 0x5d1   :  { %v5006_v3 = vpop.f32.mrf.mxu3 }
 0x5d2   :  { %v9314_v3 = vld [vmem:[#allocation20 + $0x20] sm:$0xff] }
 0x5d3   :  { %5537 = vmatpush.bf16.msrb.mxu1 %v8485_v28  ;;  %5686 = vmatpush.bf16.msra.mxu2 %v9315_v56 }
 0x5d4   :  { %5699 = vmatpush.bf16.msrb.mxu3 %v9323_v6 }
 0x5d6   :  { %v4993_v52 = vpop.f32.mrf.mxu2 }
 0x5d7   :  { %5538 = vmatpush.bf16.msrb.mxu1 %v8477_v30  ;;  %5687 = vmatpush.bf16.msra.mxu2 %v9314_v3  ;;  %v9329_v30 = vld [vmem:[%s10220_s21 + $0x18] sm:$0xff] }
 0x5d8   :  { %5700 = vmatpush.bf16.msrb.mxu3 %v9322_v5 }
 0x5da   :  { %5526 = vmatmul.bf16.vlgmr.msra.gmra.mxu0 %v5113_v10 }
 0x5db   :  { %5688 = vmatpush.bf16.msra.mxu2 %v9313_v59 }
 0x5dc   :  { %5701 = vmatpush.bf16.msrb.mxu3 %v9321_v51 }
 0x5df   :  { %5689 = vmatpush.bf16.msra.mxu2 %v9312_v62 }
 0x5e0   :  { %5702 = vmatpush.bf16.msrb.mxu3 %v9320_v15 }
 0x5e2   :  { %v4978_v14 = vpop.f32.mrf.mxu1 }
 0x5e3   :  { %v4979_v32 = vadd.f32 %v4978_v14, %v4966_v29  ;;  %5690 = vmatpush.bf16.msra.mxu2 %v9311_v4  ;;  %v9333_v14 = vld [vmem:[%s10220_s21 + $0x38] sm:$0xff]  ;;  %v9330_v29 = vld [vmem:[%s10220_s21 + $0x20] sm:$0xff] }
 0x5e4   :  { %5703 = vmatpush.bf16.msrb.mxu3 %v9319_v50  ;;  %5782 = vmatpush.bf16.msrb.mxu0 %v9333_v14 }
 0x5e5   :  { %v5017_v11 = vpop.f32.mrf.mxu0  ;;  %v4992_v35 = vadd.f32 %v10140_v54, %v4979_v32  ;;  %v9328_v32 = vld [vmem:[%s10220_s21 + $0x10] sm:$0xff] }
 0x5e7   :  { %v5005_v12 = vadd.f32 %v5004_v53, %v4992_v35  ;;  %5691 = vmatpush.bf16.msra.mxu2 %v9310_v57  ;;  %v9327_v35 = vld [vmem:[%s10220_s21 + $0x8] sm:$0xff] }
 0x5e8   :  { %5783 = vmatpush.bf16.msrb.mxu0 %v9332_v7 }
 0x5e9   :  { %v5018_v38 = vadd.f32 %v5017_v11, %v5005_v12  ;;  %v9318_v11 = vld [vmem:[#allocation20 + $0x40] sm:$0xff]  ;;  %v9337_v12 = vld [vmem:[%s10222_s23 + $0x18] sm:$0xff] }
 0x5ea   :  { %v4980_v26 = vpop.f32.mrf.mxu1  ;;  %5704 = vmatpush.bf16.msrb.mxu3 %v9318_v11 }
 0x5ec   :  { %5784 = vmatpush.bf16.msrb.mxu0 %v9331_v2 }
 0x5ed   :  { %v5019_v20 = vpop.f32.mrf.mxu0 }
 0x5f0   :  { %5785 = vmatpush.bf16.msrb.mxu0 %v9330_v29 }
 0x5f4   :  { %5786 = vmatpush.bf16.msrb.mxu0 %v9329_v30 }
 0x5f6   :  { %v5449_v37 = vpop.f32.mrf.mxu2 }
 0x5f7   :  { %v5450_v54 = vadd.f32 %v5449_v37, %v5116_v45  ;;  %v9326_v37 = vld [vmem:[%s10220_s21] sm:$0xff]  ;;  %v9335_v45 = vld [vmem:[%s10222_s23 + $0x8] sm:$0xff] }
 0x5f8   :  { %5787 = vmatpush.bf16.msrb.mxu0 %v9328_v32 }
 0x5fc   :  { %5788 = vmatpush.bf16.msrb.mxu0 %v9327_v35 }
 0x5fe   :  { %v5451_v36 = vpop.f32.mrf.mxu2 }
 0x600   :  { %5789 = vmatpush.bf16.msrb.mxu0 %v9326_v37 }
 0x602   :  { %v5030_v39 = vpop.f32.mrf.mxu1 }
 0x603   :  { %v5031_v40 = vadd.f32 %v5030_v39, %v5018_v38  ;;  %v9336_v38 = vld [vmem:[%s10222_s23 + $0x10] sm:$0xff] }
 0x605   :  { %vm5037_vm11 = vcmp.gt.f32.partialorder %v5031_v40, 0.0  ;;  %v5041_v34 = vmul.f32 0.01, %v5031_v40 }
 0x607   :  { %v5045_v8 = vsel %vm5037_vm11, %v5031_v40, %v5041_v34  ;;  %v9363_v40 = vld [vmem:[%s10219_s20] ss:$0 sm:$0xff] }
 0x608   :  { %v5114_v41 = vpack.c.bf16 %v5045_v8, %v5045_v8 }
 0x60a   :  { %v5032_v63 = vpop.f32.mrf.mxu1  ;;  %5487 = vmatmul.bf16.vlgmr.msra.gmra.mxu1 %v5114_v41 }
 0x60b   :  { %5842 = vmatpush.bf16.msra.mxu1 %v9337_v12 }
 0x60e   :  { %v5501_v44 = vpop.f32.mrf.mxu2 }
 0x60f   :  { %v5502_v9 = vadd.f32 %v5501_v44, %v5117_v48  ;;  %5843 = vmatpush.bf16.msra.mxu1 %v9336_v38 }
 0x610   :  { %v5462_v24 = vpop.f32.mrf.mxu3 }
 0x611   :  { %v5463_v46 = vadd.f32 %v5462_v24, %v5450_v54  ;;  %v9334_v54 = vld [vmem:[%s10222_s23] sm:$0xff]  ;;  %s9716_s23 = smov [#allocation22]  }
 0x612   :  { %v9364_v24 = vld [vmem:[%s10254_s16] ss:$0 sm:$0xff]  ;;  %s5860_s25 = sshll.u32 %s9716_s23, 4  ;;  %s5861_s25 = int_to_ptr.vmem [resolvable:$true] %s5860_s25 }
 0x613   :  { %5844 = vmatpush.bf16.msra.mxu1 %v9335_v45 }
 0x616   :  { %v5503_v13 = vpop.f32.mrf.mxu2 }
 0x617   :  { %5845 = vmatpush.bf16.msra.mxu1 %v9334_v54 }
 0x618   :  { %v5464_v16 = vpop.f32.mrf.mxu3 }
 0x61a   :  { %5539 = vmatmul.bf16.vlgmr.msrb.gmra.mxu1 %v5114_v41 }
 0x620   :  { %v5514_v10 = vpop.f32.mrf.mxu3 }
 0x621   :  { %v5515_v52 = vadd.f32 %v5514_v10, %v5502_v9 }
 0x628   :  { %v5516_v53 = vpop.f32.mrf.mxu3 }
 0x629   :  { %v9365_v53 = vld [vmem:[%s10255_s7] ss:$0 sm:$0xff] }
 0x647   :  { %v5475_v58 = vpop.f32.mrf.mxu0 }
 0x648   :  { %v5476_v0 = vadd.f32 %v5475_v58, %v5463_v46 }
 0x64f   :  { %v5477_v60 = vpop.f32.mrf.mxu0 }
 0x657   :  { %v5527_v1 = vpop.f32.mrf.mxu0 }
 0x658   :  { %v5528_v20 = vadd.f32 %v5527_v1, %v5515_v52 }
 0x65f   :  { %v5529_v43 = vpop.f32.mrf.mxu0 }
 0x687   :  { %v5488_v19 = vpop.f32.mrf.mxu1 }
 0x688   :  { %v5489_v21 = vadd.f32 %v5488_v19, %v5476_v0 }
 0x68a   :  { %vm5544_vm12 = vcmp.gt.f32.partialorder %v5489_v21, 0.0  ;;  %v5546_v22 = vmul.f32 0.01, %v5489_v21 }
 0x68c   :  { %v5548_v33 = vsel %vm5544_vm12, %v5489_v21, %v5546_v22 }
 0x68d   :  { %v5583_v23 = vpack.c.bf16 %v5548_v33, %v5548_v33 }
 0x68f   :  { %v5490_v55 = vpop.f32.mrf.mxu1  ;;  %5692 = vmatmul.bf16.vlgmr.msra.gmra.mxu2 %v5583_v23 }
 0x697   :  { %v5540_v61 = vpop.f32.mrf.mxu1 }
 0x698   :  { %v5541_v26 = vadd.f32 %v5540_v61, %v5528_v20 }
 0x69a   :  { %vm5545_vm13 = vcmp.gt.f32.partialorder %v5541_v26, 0.0  ;;  %v5547_v17 = vmul.f32 0.01, %v5541_v26 }
 0x69c   :  { %v5549_v31 = vsel %vm5545_vm13, %v5541_v26, %v5547_v17 }
 0x69d   :  { %v5584_v27 = vpack.c.bf16 %v5549_v31, %v5549_v31 }
 0x69f   :  { %v5542_v28 = vpop.f32.mrf.mxu1  ;;  %5705 = vmatmul.bf16.vlgmr.msrb.gmra.mxu3 %v5584_v27 }
 0x712   :  { %v5693_v36 = vpop.f32.mrf.mxu2 }
 0x713   :  { %v5694_v34 = vadd.f32 %v9363_v40, %v5693_v36 }
 0x71a   :  { %v5695_v39 = vpop.f32.mrf.mxu2 }
 0x722   :  { %v5706_v8 = vpop.f32.mrf.mxu3 }
 0x723   :  { %v5707_v41 = vadd.f32 %v5706_v8, %v5694_v34 }
 0x725   :  { %vm5710_vm14 = vcmp.gt.f32.partialorder %v5707_v41, 0.0  ;;  %v5711_v44 = vmul.f32 0.01, %v5707_v41 }
 0x727   :  { %v5712_v63 = vsel %vm5710_vm14, %v5707_v41, %v5711_v44 }
 0x728   :  { %v5730_v18 = vpack.c.bf16 %v5712_v63, %v5712_v63 }
 0x72a   :  { %v5708_v13 = vpop.f32.mrf.mxu3  ;;  %5790 = vmatmul.bf16.vlgmr.msrb.gmra.mxu0 %v5730_v18 }
 0x7a7   :  { %v5791_v46 = vpop.f32.mrf.mxu0 }
 0x7a8   :  { %v5792_v16 = vadd.f32 %v9364_v24, %v5791_v46 }
 0x7aa   :  { %vm5795_vm15 = vcmp.gt.f32.partialorder %v5792_v16, 0.0  ;;  %v5796_v48 = vmul.f32 0.01, %v5792_v16 }
 0x7ac   :  { %v5797_v9 = vsel %vm5795_vm15, %v5792_v16, %v5796_v48 }
 0x7ad   :  { %v5807_v10 = vpack.c.bf16 %v5797_v9, %v5797_v9 }
 0x7af   :  { %v5793_v52 = vpop.f32.mrf.mxu0  ;;  %8646 = vmatmul.msk.bf16.vlgmr.msra.gmra.mxu1 %vm399_vm7, %v5807_v10 }
 0x82c   :  { %v5847_v49 = vpop.f32.mrf.mxu1 }
 0x82d   :  { %v5848_v42 = vadd.f32 %v9365_v53, %v5847_v49 }
 0x82f   :  { %vm5851_vm0 = vcmp.gt.f32.partialorder %v5848_v42, 0.0  ;;  %v5852_v25 = vmul.f32 0.01, %v5848_v42 }
 0x831   :  { %v5853_v47 = vsel %vm5851_vm0, %v5848_v42, %v5852_v25 }
 0x832   :  { %5854 = vst [vmem:[#allocation22] sm:$0x3] %v5853_v47 }
 0x833   :  { %5865 = dma.vmem_to_hbm [thread:$0]  %s5861_s25, 32, %s5863_s24, [#allocation4]  }
 0x834   :  { %v5849_v56 = vpop.f32.mrf.mxu1 }
 0x835   :  { %9694 = dma.done.wait [#allocation4], 32  }
 0x836   :  { %9695 = vsyncadd [#allocation4], 4294967264 }
 0x837   :  { %5870 = vsyncpa [#allocation3], 1 }
 0x838   :  { %5871 = vsyncpa [#allocation6], 1 }
 0x839   :  { %5872 = vsyncpa [#allocation9], 1 }
 0x83a   :  { %5873 = vsyncpa [#allocation12], 1 }
 0x83b   :  { %5874 = vsyncpa [#allocation15], 1 }
 0x83c   :  { %5875 = vsyncpa [#allocation18], 1 }
 0x83d   :  { %5876 = vsyncpa [#allocation21], 1 }
 0x83e   :  { %5877 = vsyncpa [#allocation4], 1 }

</bundles_post_ra>
